<compile_context>
chip_gen: v5e
topology: v5e:2x2
jax: 0.10.0
libtpu: 0.0.40
codegen_flags: <defaults>
</compile_context>

<pallas_src>
import functools
import math

import jax
import jax.numpy as jnp
from jax.experimental import pallas as pl
from jax.experimental.pallas import tpu as pltpu


# Flip to jnp.bfloat16 on v6e/v7x for full MXU throughput (accumulation and
# LayerNorm statistics stay f32); kept f32 here to match the f32 PyTorch ref.
_MATMUL_DTYPE = jnp.float32


def _mm_t(a, w):
    """a @ w.T on the MXU without materializing a transpose (contract last dims)."""
    return jax.lax.dot_general(
        a.astype(_MATMUL_DTYPE), w.astype(_MATMUL_DTYPE),
        dimension_numbers=(((1,), (1,)), ((), ())),
        preferred_element_type=jnp.float32)


def _layernorm(h, g, b, eps):
    # PyTorch LayerNorm: biased variance, eps inside the sqrt, f32 statistics.
    mean = jnp.mean(h, axis=-1, keepdims=True)
    var = jnp.mean((h - mean) ** 2, axis=-1, keepdims=True)
    return (h - mean) * jax.lax.rsqrt(var + eps) * g + b


# ---------------------------------------------------------------------------
# Kernels
# ---------------------------------------------------------------------------
def _embed_kernel(x_ref, w_ref, b_ref, o_ref):
    y = _mm_t(x_ref[...], w_ref[...]) + b_ref[...]
    o_ref[...] = y.astype(o_ref.dtype)


def embed_linear(x2d, w, b, *, row_block=128):
    """Row-tiled y = x @ w.T + b with the weight resident across grid steps."""
    M, Din = x2d.shape
    Dout = w.shape[0]
    tm = min(row_block, M)
    return pl.pallas_call(
        _embed_kernel,
        out_shape=jax.ShapeDtypeStruct((M, Dout), jnp.float32),
        grid=(pl.cdiv(M, tm),),
        in_specs=[
            pl.BlockSpec((tm, Din), lambda i: (i, 0)),
            pl.BlockSpec((Dout, Din), lambda i: (0, 0)),   # resident weight
            pl.BlockSpec((1, Dout), lambda i: (0, 0)),
        ],
        out_specs=pl.BlockSpec((tm, Dout), lambda i: (i, 0)),
        compiler_params=pltpu.CompilerParams(dimension_semantics=("parallel",)),
    )(x2d, w, b.reshape(1, Dout))


def _encoder_layer_kernel(x_ref, wqkv_ref, bqkv_ref, wo_ref, bo_ref,
                          ln1g_ref, ln1b_ref, w1_ref, b1_ref,
                          w2_ref, b2_ref, ln2g_ref, ln2b_ref,
                          o_ref, *, nhead, scale, eps):
    x = x_ref[0]                                   # (S, H), resident in VMEM
    S, H = x.shape
    hd = H // nhead

    # ---- fused QKV projection: x @ Wqkv^T + b ------------------------------
    qkv = _mm_t(x, wqkv_ref[...]) + bqkv_ref[...]  # (S, 3H)

    # ---- multi-head attention; head merge folded into the out-projection ---
    wo = wo_ref[...]                               # (H, H) PyTorch (out, in)
    attn = jnp.zeros((S, H), jnp.float32)
    for h in range(nhead):                         # static, unrolled
        q = qkv[:, h * hd:(h + 1) * hd]
        k = qkv[:, H + h * hd:H + (h + 1) * hd]
        v = qkv[:, 2 * H + h * hd:2 * H + (h + 1) * hd]
        s = _mm_t(q, k) * scale                    # (S, S) == q @ k^T
        m = jnp.max(s, axis=-1, keepdims=True)
        p = jnp.exp(s - m)
        p = p * pl.reciprocal(jnp.sum(p, axis=-1, keepdims=True), approx=True)
        ctx = jnp.dot(p.astype(_MATMUL_DTYPE), v.astype(_MATMUL_DTYPE),
                      preferred_element_type=jnp.float32)      # (S, hd)
        # head h of concat(heads) @ Wo^T  ==  ctx @ Wo[:, h*hd:(h+1)*hd]^T
        attn = attn + _mm_t(ctx, wo[:, h * hd:(h + 1) * hd])   # (S, H) lane-dense
    attn = attn + bo_ref[...]

    # ---- post-norm residual block 1 -----------------------------------------
    h1 = _layernorm(x + attn, ln1g_ref[...], ln1b_ref[...], eps)

    # ---- feed-forward (ReLU; eval-mode dropout = identity) -------------------
    ff = jnp.maximum(_mm_t(h1, w1_ref[...]) + b1_ref[...], 0.0)   # (S, FF)
    ff = _mm_t(ff, w2_ref[...]) + b2_ref[...]                     # (S, H)

    # ---- post-norm residual block 2 -----------------------------------------
    h2 = _layernorm(h1 + ff, ln2g_ref[...], ln2b_ref[...], eps)
    o_ref[0] = h2.astype(o_ref.dtype)


def encoder_layer(x, p, nhead):
    """One fused TransformerEncoderLayer: grid over batch, weights resident."""
    B, S, H = x.shape
    hd = H // nhead
    kernel = functools.partial(_encoder_layer_kernel, nhead=nhead,
                               scale=1.0 / math.sqrt(hd), eps=1e-5)

    def resident(arr):
        nd = arr.ndim
        def index_map(b):
            return (0,) * nd
        return pl.BlockSpec(arr.shape, index_map)

    weights = [
        p["in_proj_w"], p["in_proj_b"].reshape(1, -1),
        p["out_proj_w"], p["out_proj_b"].reshape(1, -1),
        p["ln1_g"].reshape(1, -1), p["ln1_b"].reshape(1, -1),
        p["lin1_w"], p["lin1_b"].reshape(1, -1),
        p["lin2_w"], p["lin2_b"].reshape(1, -1),
        p["ln2_g"].reshape(1, -1), p["ln2_b"].reshape(1, -1),
    ]
    return pl.pallas_call(
        kernel,
        out_shape=jax.ShapeDtypeStruct((B, S, H), jnp.float32),
        grid=(B,),
        in_specs=[pl.BlockSpec((1, S, H), lambda b: (b, 0, 0))]
                 + [resident(w) for w in weights],
        out_specs=pl.BlockSpec((1, S, H), lambda b: (b, 0, 0)),
        compiler_params=pltpu.CompilerParams(dimension_semantics=("parallel",)),
    )(x, *weights)
    # TODO(synk): for long sequences / large B*S, tile the seq axis with a
    # flash-style online softmax instead of one (S, H) block per batch element.


# ---------------------------------------------------------------------------
# Model wrapper
# ---------------------------------------------------------------------------
def transformer_encoder_forward(features, params, nhead=4, row_block=128):
    B, S, Din = features.shape
    H = params["emb_w"].shape[0]
    x2 = embed_linear(features.reshape(B * S, Din), params["emb_w"],
                      params["emb_b"], row_block=row_block)
    x = x2.reshape(B, S, H)
    for lp in params["layers"]:
        x = encoder_layer(x, lp, nhead)
    return x


# ---------------------------------------------------------------------------
# Deterministic parameter construction
# ---------------------------------------------------------------------------
def init_params(key, input_size, hidden_size, num_layers, dim_feedforward=2048):
    def dense(k, shape, scale=0.02):
        return (scale * jax.random.normal(k, shape)).astype(jnp.float32)

    keys = jax.random.split(key, 1 + num_layers)
    ek = jax.random.split(keys[0], 2)
    params = {
        "emb_w": dense(ek[0], (hidden_size, input_size)),
        "emb_b": dense(ek[1], (hidden_size,)),
        "layers": [],
    }
    for li in range(num_layers):
        lk = jax.random.split(keys[1 + li], 8)
        params["layers"].append({
            "in_proj_w": dense(lk[0], (3 * hidden_size, hidden_size)),
            "in_proj_b": dense(lk[1], (3 * hidden_size,)),
            "out_proj_w": dense(lk[2], (hidden_size, hidden_size)),
            "out_proj_b": dense(lk[3], (hidden_size,)),
            "lin1_w": dense(lk[4], (dim_feedforward, hidden_size)),
            "lin1_b": dense(lk[5], (dim_feedforward,)),
            "lin2_w": dense(lk[6], (hidden_size, dim_feedforward)),
            "lin2_b": dense(lk[7], (hidden_size,)),
            "ln1_g": jnp.ones((hidden_size,), jnp.float32),
            "ln1_b": jnp.zeros((hidden_size,), jnp.float32),
            "ln2_g": jnp.ones((hidden_size,), jnp.float32),
            "ln2_b": jnp.zeros((hidden_size,), jnp.float32),
        })
    return params


if __name__ == "__main__":
    B, S = 2, 8
    input_size, hidden_size, num_layers, nhead = 16, 32, 2, 4

    root = jax.random.PRNGKey(0)
    k_x, k_p = jax.random.split(root)
    features = jax.random.normal(k_x, (B, S, input_size), dtype=jnp.float32)
    params = init_params(k_p, input_size, hidden_size, num_layers)

    fwd = jax.jit(functools.partial(transformer_encoder_forward,
                                    nhead=nhead, row_block=8))
    out = jax.block_until_ready(fwd(features, params))
    assert out.shape == (B, S, hidden_size), out.shape
    assert bool(jnp.all(jnp.isfinite(out)))
    print("KERNEL_OK")
</pallas_src>

<mosaic_0001>
module attributes {stable_mosaic.version = 11 : i64} {
  func.func @_embed_kernel(%arg0: i32, %arg1: memref<8x16xf32, #tpu.memory_space<vmem>>, %arg2: memref<32x16xf32, #tpu.memory_space<vmem>>, %arg3: memref<1x32xf32, #tpu.memory_space<vmem>>, %arg4: memref<8x32xf32, #tpu.memory_space<vmem>>) attributes {dimension_semantics = [#tpu.dimension_semantics<parallel>], iteration_bounds = array<i64: 2>, scalar_prefetch = 0 : i64, scratch_operands = 0 : i64, tpu.core_type = #tpu.core_type<tc>, window_params = [{transform_indices = @transform_0, window_bounds = array<i64: 8, 16>}, {pipeline_mode = #tpu.pipeline_mode<synchronous>, transform_indices = @transform_1, window_bounds = array<i64: 32, 16>}, {pipeline_mode = #tpu.pipeline_mode<synchronous>, transform_indices = @transform_2, window_bounds = array<i64: 1, 32>}, {transform_indices = @transform_3, window_bounds = array<i64: 8, 32>}]} {
    %c0 = arith.constant 0 : index
    %c0_0 = arith.constant 0 : index
    %0 = vector.load %arg1[%c0, %c0_0] : memref<8x16xf32, #tpu.memory_space<vmem>>, vector<8x16xf32>
    %c0_1 = arith.constant 0 : index
    %c0_2 = arith.constant 0 : index
    %1 = vector.load %arg2[%c0_1, %c0_2] : memref<32x16xf32, #tpu.memory_space<vmem>>, vector<32x16xf32>
    %cst = arith.constant dense<0.000000e+00> : vector<8x32xf32>
    %2 = tpu.matmul %0, %1, %cst {dimension_numbers = #tpu.dot_dimension_numbers<[1], [1], [0], [0], [0, 0, 1, 0], [], []>} : vector<8x16xf32>, vector<32x16xf32>, vector<8x32xf32> -> vector<8x32xf32>
    %c0_3 = arith.constant 0 : index
    %c0_4 = arith.constant 0 : index
    %3 = vector.load %arg3[%c0_3, %c0_4] : memref<1x32xf32, #tpu.memory_space<vmem>>, vector<1x32xf32>
    %4 = vector.broadcast %3 : vector<1x32xf32> to vector<8x32xf32>
    %5 = arith.addf %2, %4 : vector<8x32xf32>
    %c0_5 = arith.constant 0 : index
    %c0_6 = arith.constant 0 : index
    %6 = vector.load %arg4[%c0_5, %c0_6] : memref<8x32xf32, #tpu.memory_space<vmem>>, vector<8x32xf32>
    tpu.vector_store %arg4[%c0_5, %c0_6], %5 {strides = array<i32>} : memref<8x32xf32, #tpu.memory_space<vmem>>, vector<8x32xf32>,
    return
  }
  func.func @transform_0(%arg0: i32) -> (i32, i32) {
    %c0_i32 = arith.constant 0 : i32
    %c0_i32_0 = arith.constant 0 : i32
    return %arg0, %c0_i32 : i32, i32
  }
  func.func @transform_1(%arg0: i32) -> (i32, i32) {
    %c0_i32 = arith.constant 0 : i32
    %c0_i32_0 = arith.constant 0 : i32
    %c0_i32_1 = arith.constant 0 : i32
    return %c0_i32, %c0_i32_0 : i32, i32
  }
  func.func @transform_2(%arg0: i32) -> (i32, i32) {
    %c0_i32 = arith.constant 0 : i32
    %c0_i32_0 = arith.constant 0 : i32
    %c0_i32_1 = arith.constant 0 : i32
    return %c0_i32, %c0_i32_0 : i32, i32
  }
  func.func @transform_3(%arg0: i32) -> (i32, i32) {
    %c0_i32 = arith.constant 0 : i32
    %c0_i32_0 = arith.constant 0 : i32
    return %arg0, %c0_i32 : i32, i32
  }
}

module attributes {stable_mosaic.version = 11 : i64} {
  func.func @_encoder_layer_kernel(%arg0: i32, %arg1: memref<1x8x32xf32, #tpu.memory_space<vmem>>, %arg2: memref<96x32xf32, #tpu.memory_space<vmem>>, %arg3: memref<1x96xf32, #tpu.memory_space<vmem>>, %arg4: memref<32x32xf32, #tpu.memory_space<vmem>>, %arg5: memref<1x32xf32, #tpu.memory_space<vmem>>, %arg6: memref<1x32xf32, #tpu.memory_space<vmem>>, %arg7: memref<1x32xf32, #tpu.memory_space<vmem>>, %arg8: memref<2048x32xf32, #tpu.memory_space<vmem>>, %arg9: memref<1x2048xf32, #tpu.memory_space<vmem>>, %arg10: memref<32x2048xf32, #tpu.memory_space<vmem>>, %arg11: memref<1x32xf32, #tpu.memory_space<vmem>>, %arg12: memref<1x32xf32, #tpu.memory_space<vmem>>, %arg13: memref<1x32xf32, #tpu.memory_space<vmem>>, %arg14: memref<1x8x32xf32, #tpu.memory_space<vmem>>) attributes {dimension_semantics = [#tpu.dimension_semantics<parallel>], iteration_bounds = array<i64: 2>, scalar_prefetch = 0 : i64, scratch_operands = 0 : i64, tpu.core_type = #tpu.core_type<tc>, window_params = [{transform_indices = @transform_0, window_bounds = array<i64: 1, 8, 32>}, {pipeline_mode = #tpu.pipeline_mode<synchronous>, transform_indices = @transform_1, window_bounds = array<i64: 96, 32>}, {pipeline_mode = #tpu.pipeline_mode<synchronous>, transform_indices = @transform_2, window_bounds = array<i64: 1, 96>}, {pipeline_mode = #tpu.pipeline_mode<synchronous>, transform_indices = @transform_3, window_bounds = array<i64: 32, 32>}, {pipeline_mode = #tpu.pipeline_mode<synchronous>, transform_indices = @transform_4, window_bounds = array<i64: 1, 32>}, {pipeline_mode = #tpu.pipeline_mode<synchronous>, transform_indices = @transform_5, window_bounds = array<i64: 1, 32>}, {pipeline_mode = #tpu.pipeline_mode<synchronous>, transform_indices = @transform_6, window_bounds = array<i64: 1, 32>}, {pipeline_mode = #tpu.pipeline_mode<synchronous>, transform_indices = @transform_7, window_bounds = array<i64: 2048, 32>}, {pipeline_mode = #tpu.pipeline_mode<synchronous>, transform_indices = @transform_8, window_bounds = array<i64: 1, 2048>}, {pipeline_mode = #tpu.pipeline_mode<synchronous>, transform_indices = @transform_9, window_bounds = array<i64: 32, 2048>}, {pipeline_mode = #tpu.pipeline_mode<synchronous>, transform_indices = @transform_10, window_bounds = array<i64: 1, 32>}, {pipeline_mode = #tpu.pipeline_mode<synchronous>, transform_indices = @transform_11, window_bounds = array<i64: 1, 32>}, {pipeline_mode = #tpu.pipeline_mode<synchronous>, transform_indices = @transform_12, window_bounds = array<i64: 1, 32>}, {transform_indices = @transform_13, window_bounds = array<i64: 1, 8, 32>}]} {
    %c0 = arith.constant 0 : index
    %c0_0 = arith.constant 0 : index
    %c0_1 = arith.constant 0 : index
    %0 = vector.load %arg1[%c0, %c0_0, %c0_1] : memref<1x8x32xf32, #tpu.memory_space<vmem>>, vector<1x8x32xf32>
    %1 = vector.shape_cast %0 : vector<1x8x32xf32> to vector<8x32xf32>
    %c0_2 = arith.constant 0 : index
    %c0_3 = arith.constant 0 : index
    %2 = vector.load %arg2[%c0_2, %c0_3] : memref<96x32xf32, #tpu.memory_space<vmem>>, vector<96x32xf32>
    %cst = arith.constant dense<0.000000e+00> : vector<8x96xf32>
    %3 = tpu.matmul %1, %2, %cst {dimension_numbers = #tpu.dot_dimension_numbers<[1], [1], [0], [0], [0, 0, 1, 0], [], []>} : vector<8x32xf32>, vector<96x32xf32>, vector<8x96xf32> -> vector<8x96xf32>
    %c0_4 = arith.constant 0 : index
    %c0_5 = arith.constant 0 : index
    %4 = vector.load %arg3[%c0_4, %c0_5] : memref<1x96xf32, #tpu.memory_space<vmem>>, vector<1x96xf32>
    %5 = vector.broadcast %4 : vector<1x96xf32> to vector<8x96xf32>
    %6 = arith.addf %3, %5 : vector<8x96xf32>
    %c0_6 = arith.constant 0 : index
    %c0_7 = arith.constant 0 : index
    %7 = vector.load %arg4[%c0_6, %c0_7] : memref<32x32xf32, #tpu.memory_space<vmem>>, vector<32x32xf32>
    %cst_8 = arith.constant 0.000000e+00 : f32
    %8 = vector.broadcast %cst_8 : f32 to vector<8x32xf32>
    %9 = vector.extract_strided_slice %6 {offsets = [0, 0], sizes = [8, 8], strides = [1, 1]} : vector<8x96xf32> to vector<8x8xf32>
    %10 = vector.extract_strided_slice %6 {offsets = [0, 32], sizes = [8, 8], strides = [1, 1]} : vector<8x96xf32> to vector<8x8xf32>
    %11 = vector.extract_strided_slice %6 {offsets = [0, 64], sizes = [8, 8], strides = [1, 1]} : vector<8x96xf32> to vector<8x8xf32>
    %cst_9 = arith.constant dense<0.000000e+00> : vector<8x8xf32>
    %12 = tpu.matmul %9, %10, %cst_9 {dimension_numbers = #tpu.dot_dimension_numbers<[1], [1], [0], [0], [0, 0, 1, 0], [], []>} : vector<8x8xf32>, vector<8x8xf32>, vector<8x8xf32> -> vector<8x8xf32>
    %cst_10 = arith.constant 0.353553385 : f32
    %13 = vector.broadcast %cst_10 : f32 to vector<8x8xf32>
    %14 = arith.mulf %12, %13 : vector<8x8xf32>
    %cst_11 = arith.constant dense<0xFF800000> : vector<8xf32>
    %15 = vector.multi_reduction <maximumf>, %14, %cst_11 [1] : vector<8x8xf32> to vector<8xf32>
    %16 = vector.shape_cast %15 : vector<8xf32> to vector<8x1xf32>
    %17 = vector.broadcast %16 : vector<8x1xf32> to vector<8x8xf32>
    %18 = arith.subf %14, %17 : vector<8x8xf32>
    %19 = math.exp %18 : vector<8x8xf32>
    %cst_12 = arith.constant dense<0.000000e+00> : vector<8xf32>
    %20 = vector.multi_reduction <add>, %19, %cst_12 [1] : vector<8x8xf32> to vector<8xf32>
    %21 = vector.shape_cast %20 : vector<8xf32> to vector<8x1xf32>
    %22 = tpu.reciprocal %21 {approx = true} : vector<8x1xf32> -> vector<8x1xf32>
    %23 = vector.broadcast %22 : vector<8x1xf32> to vector<8x8xf32>
    %24 = arith.mulf %19, %23 : vector<8x8xf32>
    %cst_13 = arith.constant dense<0.000000e+00> : vector<8x8xf32>
    %25 = tpu.matmul %24, %11, %cst_13 {dimension_numbers = #tpu.dot_dimension_numbers<[1], [0], [0], [1], [0, 0, 1, 1], [], []>} : vector<8x8xf32>, vector<8x8xf32>, vector<8x8xf32> -> vector<8x8xf32>
    %26 = vector.extract_strided_slice %7 {offsets = [0, 0], sizes = [32, 8], strides = [1, 1]} : vector<32x32xf32> to vector<32x8xf32>
    %cst_14 = arith.constant dense<0.000000e+00> : vector<8x32xf32>
    %27 = tpu.matmul %25, %26, %cst_14 {dimension_numbers = #tpu.dot_dimension_numbers<[1], [1], [0], [0], [0, 0, 1, 0], [], []>} : vector<8x8xf32>, vector<32x8xf32>, vector<8x32xf32> -> vector<8x32xf32>
    %28 = arith.addf %8, %27 : vector<8x32xf32>
    %29 = vector.extract_strided_slice %6 {offsets = [0, 8], sizes = [8, 8], strides = [1, 1]} : vector<8x96xf32> to vector<8x8xf32>
    %30 = vector.extract_strided_slice %6 {offsets = [0, 40], sizes = [8, 8], strides = [1, 1]} : vector<8x96xf32> to vector<8x8xf32>
    %31 = vector.extract_strided_slice %6 {offsets = [0, 72], sizes = [8, 8], strides = [1, 1]} : vector<8x96xf32> to vector<8x8xf32>
    %cst_15 = arith.constant dense<0.000000e+00> : vector<8x8xf32>
    %32 = tpu.matmul %29, %30, %cst_15 {dimension_numbers = #tpu.dot_dimension_numbers<[1], [1], [0], [0], [0, 0, 1, 0], [], []>} : vector<8x8xf32>, vector<8x8xf32>, vector<8x8xf32> -> vector<8x8xf32>
    %cst_16 = arith.constant 0.353553385 : f32
    %33 = vector.broadcast %cst_16 : f32 to vector<8x8xf32>
    %34 = arith.mulf %32, %33 : vector<8x8xf32>
    %cst_17 = arith.constant dense<0xFF800000> : vector<8xf32>
    %35 = vector.multi_reduction <maximumf>, %34, %cst_17 [1] : vector<8x8xf32> to vector<8xf32>
    %36 = vector.shape_cast %35 : vector<8xf32> to vector<8x1xf32>
    %37 = vector.broadcast %36 : vector<8x1xf32> to vector<8x8xf32>
    %38 = arith.subf %34, %37 : vector<8x8xf32>
    %39 = math.exp %38 : vector<8x8xf32>
    %cst_18 = arith.constant dense<0.000000e+00> : vector<8xf32>
    %40 = vector.multi_reduction <add>, %39, %cst_18 [1] : vector<8x8xf32> to vector<8xf32>
    %41 = vector.shape_cast %40 : vector<8xf32> to vector<8x1xf32>
    %42 = tpu.reciprocal %41 {approx = true} : vector<8x1xf32> -> vector<8x1xf32>
    %43 = vector.broadcast %42 : vector<8x1xf32> to vector<8x8xf32>
    %44 = arith.mulf %39, %43 : vector<8x8xf32>
    %cst_19 = arith.constant dense<0.000000e+00> : vector<8x8xf32>
    %45 = tpu.matmul %44, %31, %cst_19 {dimension_numbers = #tpu.dot_dimension_numbers<[1], [0], [0], [1], [0, 0, 1, 1], [], []>} : vector<8x8xf32>, vector<8x8xf32>, vector<8x8xf32> -> vector<8x8xf32>
    %46 = vector.extract_strided_slice %7 {offsets = [0, 8], sizes = [32, 8], strides = [1, 1]} : vector<32x32xf32> to vector<32x8xf32>
    %cst_20 = arith.constant dense<0.000000e+00> : vector<8x32xf32>
    %47 = tpu.matmul %45, %46, %cst_20 {dimension_numbers = #tpu.dot_dimension_numbers<[1], [1], [0], [0], [0, 0, 1, 0], [], []>} : vector<8x8xf32>, vector<32x8xf32>, vector<8x32xf32> -> vector<8x32xf32>
    %48 = arith.addf %28, %47 : vector<8x32xf32>
    %49 = vector.extract_strided_slice %6 {offsets = [0, 16], sizes = [8, 8], strides = [1, 1]} : vector<8x96xf32> to vector<8x8xf32>
    %50 = vector.extract_strided_slice %6 {offsets = [0, 48], sizes = [8, 8], strides = [1, 1]} : vector<8x96xf32> to vector<8x8xf32>
    %51 = vector.extract_strided_slice %6 {offsets = [0, 80], sizes = [8, 8], strides = [1, 1]} : vector<8x96xf32> to vector<8x8xf32>
    %cst_21 = arith.constant dense<0.000000e+00> : vector<8x8xf32>
    %52 = tpu.matmul %49, %50, %cst_21 {dimension_numbers = #tpu.dot_dimension_numbers<[1], [1], [0], [0], [0, 0, 1, 0], [], []>} : vector<8x8xf32>, vector<8x8xf32>, vector<8x8xf32> -> vector<8x8xf32>
    %cst_22 = arith.constant 0.353553385 : f32
    %53 = vector.broadcast %cst_22 : f32 to vector<8x8xf32>
    %54 = arith.mulf %52, %53 : vector<8x8xf32>
    %cst_23 = arith.constant dense<0xFF800000> : vector<8xf32>
    %55 = vector.multi_reduction <maximumf>, %54, %cst_23 [1] : vector<8x8xf32> to vector<8xf32>
    %56 = vector.shape_cast %55 : vector<8xf32> to vector<8x1xf32>
    %57 = vector.broadcast %56 : vector<8x1xf32> to vector<8x8xf32>
    %58 = arith.subf %54, %57 : vector<8x8xf32>
    %59 = math.exp %58 : vector<8x8xf32>
    %cst_24 = arith.constant dense<0.000000e+00> : vector<8xf32>
    %60 = vector.multi_reduction <add>, %59, %cst_24 [1] : vector<8x8xf32> to vector<8xf32>
    %61 = vector.shape_cast %60 : vector<8xf32> to vector<8x1xf32>
    %62 = tpu.reciprocal %61 {approx = true} : vector<8x1xf32> -> vector<8x1xf32>
    %63 = vector.broadcast %62 : vector<8x1xf32> to vector<8x8xf32>
    %64 = arith.mulf %59, %63 : vector<8x8xf32>
    %cst_25 = arith.constant dense<0.000000e+00> : vector<8x8xf32>
    %65 = tpu.matmul %64, %51, %cst_25 {dimension_numbers = #tpu.dot_dimension_numbers<[1], [0], [0], [1], [0, 0, 1, 1], [], []>} : vector<8x8xf32>, vector<8x8xf32>, vector<8x8xf32> -> vector<8x8xf32>
    %66 = vector.extract_strided_slice %7 {offsets = [0, 16], sizes = [32, 8], strides = [1, 1]} : vector<32x32xf32> to vector<32x8xf32>
    %cst_26 = arith.constant dense<0.000000e+00> : vector<8x32xf32>
    %67 = tpu.matmul %65, %66, %cst_26 {dimension_numbers = #tpu.dot_dimension_numbers<[1], [1], [0], [0], [0, 0, 1, 0], [], []>} : vector<8x8xf32>, vector<32x8xf32>, vector<8x32xf32> -> vector<8x32xf32>
    %68 = arith.addf %48, %67 : vector<8x32xf32>
    %69 = vector.extract_strided_slice %6 {offsets = [0, 24], sizes = [8, 8], strides = [1, 1]} : vector<8x96xf32> to vector<8x8xf32>
    %70 = vector.extract_strided_slice %6 {offsets = [0, 56], sizes = [8, 8], strides = [1, 1]} : vector<8x96xf32> to vector<8x8xf32>
    %71 = vector.extract_strided_slice %6 {offsets = [0, 88], sizes = [8, 8], strides = [1, 1]} : vector<8x96xf32> to vector<8x8xf32>
    %cst_27 = arith.constant dense<0.000000e+00> : vector<8x8xf32>
    %72 = tpu.matmul %69, %70, %cst_27 {dimension_numbers = #tpu.dot_dimension_numbers<[1], [1], [0], [0], [0, 0, 1, 0], [], []>} : vector<8x8xf32>, vector<8x8xf32>, vector<8x8xf32> -> vector<8x8xf32>
    %cst_28 = arith.constant 0.353553385 : f32
    %73 = vector.broadcast %cst_28 : f32 to vector<8x8xf32>
    %74 = arith.mulf %72, %73 : vector<8x8xf32>
    %cst_29 = arith.constant dense<0xFF800000> : vector<8xf32>
    %75 = vector.multi_reduction <maximumf>, %74, %cst_29 [1] : vector<8x8xf32> to vector<8xf32>
    %76 = vector.shape_cast %75 : vector<8xf32> to vector<8x1xf32>
    %77 = vector.broadcast %76 : vector<8x1xf32> to vector<8x8xf32>
    %78 = arith.subf %74, %77 : vector<8x8xf32>
    %79 = math.exp %78 : vector<8x8xf32>
    %cst_30 = arith.constant dense<0.000000e+00> : vector<8xf32>
    %80 = vector.multi_reduction <add>, %79, %cst_30 [1] : vector<8x8xf32> to vector<8xf32>
    %81 = vector.shape_cast %80 : vector<8xf32> to vector<8x1xf32>
    %82 = tpu.reciprocal %81 {approx = true} : vector<8x1xf32> -> vector<8x1xf32>
    %83 = vector.broadcast %82 : vector<8x1xf32> to vector<8x8xf32>
    %84 = arith.mulf %79, %83 : vector<8x8xf32>
    %cst_31 = arith.constant dense<0.000000e+00> : vector<8x8xf32>
    %85 = tpu.matmul %84, %71, %cst_31 {dimension_numbers = #tpu.dot_dimension_numbers<[1], [0], [0], [1], [0, 0, 1, 1], [], []>} : vector<8x8xf32>, vector<8x8xf32>, vector<8x8xf32> -> vector<8x8xf32>
    %86 = vector.extract_strided_slice %7 {offsets = [0, 24], sizes = [32, 8], strides = [1, 1]} : vector<32x32xf32> to vector<32x8xf32>
    %cst_32 = arith.constant dense<0.000000e+00> : vector<8x32xf32>
    %87 = tpu.matmul %85, %86, %cst_32 {dimension_numbers = #tpu.dot_dimension_numbers<[1], [1], [0], [0], [0, 0, 1, 0], [], []>} : vector<8x8xf32>, vector<32x8xf32>, vector<8x32xf32> -> vector<8x32xf32>
    %88 = arith.addf %68, %87 : vector<8x32xf32>
    %c0_33 = arith.constant 0 : index
    %c0_34 = arith.constant 0 : index
    %89 = vector.load %arg5[%c0_33, %c0_34] : memref<1x32xf32, #tpu.memory_space<vmem>>, vector<1x32xf32>
    %90 = vector.broadcast %89 : vector<1x32xf32> to vector<8x32xf32>
    %91 = arith.addf %88, %90 : vector<8x32xf32>
    %92 = arith.addf %1, %91 : vector<8x32xf32>
    %c0_35 = arith.constant 0 : index
    %c0_36 = arith.constant 0 : index
    %93 = vector.load %arg6[%c0_35, %c0_36] : memref<1x32xf32, #tpu.memory_space<vmem>>, vector<1x32xf32>
    %c0_37 = arith.constant 0 : index
    %c0_38 = arith.constant 0 : index
    %94 = vector.load %arg7[%c0_37, %c0_38] : memref<1x32xf32, #tpu.memory_space<vmem>>, vector<1x32xf32>
    %cst_39 = arith.constant dense<0.000000e+00> : vector<8xf32>
    %95 = vector.multi_reduction <add>, %92, %cst_39 [1] : vector<8x32xf32> to vector<8xf32>
    %96 = vector.shape_cast %95 : vector<8xf32> to vector<8x1xf32>
    %cst_40 = arith.constant 3.200000e+01 : f32
    %97 = vector.broadcast %cst_40 : f32 to vector<8x1xf32>
    %98 = arith.divf %96, %97 : vector<8x1xf32>
    %99 = vector.broadcast %98 : vector<8x1xf32> to vector<8x32xf32>
    %100 = arith.subf %92, %99 : vector<8x32xf32>
    %101 = arith.mulf %100, %100 : vector<8x32xf32>
    %cst_41 = arith.constant dense<0.000000e+00> : vector<8xf32>
    %102 = vector.multi_reduction <add>, %101, %cst_41 [1] : vector<8x32xf32> to vector<8xf32>
    %103 = vector.shape_cast %102 : vector<8xf32> to vector<8x1xf32>
    %cst_42 = arith.constant 3.200000e+01 : f32
    %104 = vector.broadcast %cst_42 : f32 to vector<8x1xf32>
    %105 = arith.divf %103, %104 : vector<8x1xf32>
    %106 = vector.broadcast %98 : vector<8x1xf32> to vector<8x32xf32>
    %107 = arith.subf %92, %106 : vector<8x32xf32>
    %cst_43 = arith.constant 9.99999974E-6 : f32
    %108 = vector.broadcast %cst_43 : f32 to vector<8x1xf32>
    %109 = arith.addf %105, %108 : vector<8x1xf32>
    %110 = math.rsqrt %109 : vector<8x1xf32>
    %111 = vector.broadcast %110 : vector<8x1xf32> to vector<8x32xf32>
    %112 = arith.mulf %107, %111 : vector<8x32xf32>
    %113 = vector.broadcast %93 : vector<1x32xf32> to vector<8x32xf32>
    %114 = arith.mulf %112, %113 : vector<8x32xf32>
    %115 = vector.broadcast %94 : vector<1x32xf32> to vector<8x32xf32>
    %116 = arith.addf %114, %115 : vector<8x32xf32>
    %c0_44 = arith.constant 0 : index
    %c0_45 = arith.constant 0 : index
    %117 = vector.load %arg8[%c0_44, %c0_45] : memref<2048x32xf32, #tpu.memory_space<vmem>>, vector<2048x32xf32>
    %cst_46 = arith.constant dense<0.000000e+00> : vector<8x2048xf32>
    %118 = tpu.matmul %116, %117, %cst_46 {dimension_numbers = #tpu.dot_dimension_numbers<[1], [1], [0], [0], [0, 0, 1, 0], [], []>} : vector<8x32xf32>, vector<2048x32xf32>, vector<8x2048xf32> -> vector<8x2048xf32>
    %c0_47 = arith.constant 0 : index
    %c0_48 = arith.constant 0 : index
    %119 = vector.load %arg9[%c0_47, %c0_48] : memref<1x2048xf32, #tpu.memory_space<vmem>>, vector<1x2048xf32>
    %120 = vector.broadcast %119 : vector<1x2048xf32> to vector<8x2048xf32>
    %121 = arith.addf %118, %120 : vector<8x2048xf32>
    %cst_49 = arith.constant 0.000000e+00 : f32
    %122 = vector.broadcast %cst_49 : f32 to vector<8x2048xf32>
    %123 = arith.maximumf %121, %122 : vector<8x2048xf32>
    %c0_50 = arith.constant 0 : index
    %c0_51 = arith.constant 0 : index
    %124 = vector.load %arg10[%c0_50, %c0_51] : memref<32x2048xf32, #tpu.memory_space<vmem>>, vector<32x2048xf32>
    %cst_52 = arith.constant dense<0.000000e+00> : vector<8x32xf32>
    %125 = tpu.matmul %123, %124, %cst_52 {dimension_numbers = #tpu.dot_dimension_numbers<[1], [1], [0], [0], [0, 0, 1, 0], [], []>} : vector<8x2048xf32>, vector<32x2048xf32>, vector<8x32xf32> -> vector<8x32xf32>
    %c0_53 = arith.constant 0 : index
    %c0_54 = arith.constant 0 : index
    %126 = vector.load %arg11[%c0_53, %c0_54] : memref<1x32xf32, #tpu.memory_space<vmem>>, vector<1x32xf32>
    %127 = vector.broadcast %126 : vector<1x32xf32> to vector<8x32xf32>
    %128 = arith.addf %125, %127 : vector<8x32xf32>
    %129 = arith.addf %116, %128 : vector<8x32xf32>
    %c0_55 = arith.constant 0 : index
    %c0_56 = arith.constant 0 : index
    %130 = vector.load %arg12[%c0_55, %c0_56] : memref<1x32xf32, #tpu.memory_space<vmem>>, vector<1x32xf32>
    %c0_57 = arith.constant 0 : index
    %c0_58 = arith.constant 0 : index
    %131 = vector.load %arg13[%c0_57, %c0_58] : memref<1x32xf32, #tpu.memory_space<vmem>>, vector<1x32xf32>
    %cst_59 = arith.constant dense<0.000000e+00> : vector<8xf32>
    %132 = vector.multi_reduction <add>, %129, %cst_59 [1] : vector<8x32xf32> to vector<8xf32>
    %133 = vector.shape_cast %132 : vector<8xf32> to vector<8x1xf32>
    %cst_60 = arith.constant 3.200000e+01 : f32
    %134 = vector.broadcast %cst_60 : f32 to vector<8x1xf32>
    %135 = arith.divf %133, %134 : vector<8x1xf32>
    %136 = vector.broadcast %135 : vector<8x1xf32> to vector<8x32xf32>
    %137 = arith.subf %129, %136 : vector<8x32xf32>
    %138 = arith.mulf %137, %137 : vector<8x32xf32>
    %cst_61 = arith.constant dense<0.000000e+00> : vector<8xf32>
    %139 = vector.multi_reduction <add>, %138, %cst_61 [1] : vector<8x32xf32> to vector<8xf32>
    %140 = vector.shape_cast %139 : vector<8xf32> to vector<8x1xf32>
    %cst_62 = arith.constant 3.200000e+01 : f32
    %141 = vector.broadcast %cst_62 : f32 to vector<8x1xf32>
    %142 = arith.divf %140, %141 : vector<8x1xf32>
    %143 = vector.broadcast %135 : vector<8x1xf32> to vector<8x32xf32>
    %144 = arith.subf %129, %143 : vector<8x32xf32>
    %cst_63 = arith.constant 9.99999974E-6 : f32
    %145 = vector.broadcast %cst_63 : f32 to vector<8x1xf32>
    %146 = arith.addf %142, %145 : vector<8x1xf32>
    %147 = math.rsqrt %146 : vector<8x1xf32>
    %148 = vector.broadcast %147 : vector<8x1xf32> to vector<8x32xf32>
    %149 = arith.mulf %144, %148 : vector<8x32xf32>
    %150 = vector.broadcast %130 : vector<1x32xf32> to vector<8x32xf32>
    %151 = arith.mulf %149, %150 : vector<8x32xf32>
    %152 = vector.broadcast %131 : vector<1x32xf32> to vector<8x32xf32>
    %153 = arith.addf %151, %152 : vector<8x32xf32>
    %c0_64 = arith.constant 0 : index
    %c0_65 = arith.constant 0 : index
    %c0_66 = arith.constant 0 : index
    %154 = vector.load %arg14[%c0_64, %c0_65, %c0_66] : memref<1x8x32xf32, #tpu.memory_space<vmem>>, vector<1x8x32xf32>
    %155 = vector.shape_cast %154 : vector<1x8x32xf32> to vector<8x32xf32>
    %156 = vector.shape_cast %153 : vector<8x32xf32> to vector<1x8x32xf32>
    tpu.vector_store %arg14[%c0_64, %c0_65, %c0_66], %156 {strides = array<i32>} : memref<1x8x32xf32, #tpu.memory_space<vmem>>, vector<1x8x32xf32>,
    return
  }
  func.func @transform_0(%arg0: i32) -> (i32, i32, i32) {
    %c0_i32 = arith.constant 0 : i32
    %c0_i32_0 = arith.constant 0 : i32
    %c0_i32_1 = arith.constant 0 : i32
    return %arg0, %c0_i32, %c0_i32_0 : i32, i32, i32
  }
  func.func @transform_1(%arg0: i32) -> (i32, i32) {
    %c0_i32 = arith.constant 0 : i32
    %c0_i32_0 = arith.constant 0 : i32
    %c0_i32_1 = arith.constant 0 : i32
    return %c0_i32, %c0_i32_0 : i32, i32
  }
  func.func @transform_2(%arg0: i32) -> (i32, i32) {
    %c0_i32 = arith.constant 0 : i32
    %c0_i32_0 = arith.constant 0 : i32
    %c0_i32_1 = arith.constant 0 : i32
    return %c0_i32, %c0_i32_0 : i32, i32
  }
  func.func @transform_3(%arg0: i32) -> (i32, i32) {
    %c0_i32 = arith.constant 0 : i32
    %c0_i32_0 = arith.constant 0 : i32
    %c0_i32_1 = arith.constant 0 : i32
    return %c0_i32, %c0_i32_0 : i32, i32
  }
  func.func @transform_4(%arg0: i32) -> (i32, i32) {
    %c0_i32 = arith.constant 0 : i32
    %c0_i32_0 = arith.constant 0 : i32
    %c0_i32_1 = arith.constant 0 : i32
    return %c0_i32, %c0_i32_0 : i32, i32
  }
  func.func @transform_5(%arg0: i32) -> (i32, i32) {
    %c0_i32 = arith.constant 0 : i32
    %c0_i32_0 = arith.constant 0 : i32
    %c0_i32_1 = arith.constant 0 : i32
    return %c0_i32, %c0_i32_0 : i32, i32
  }
  func.func @transform_6(%arg0: i32) -> (i32, i32) {
    %c0_i32 = arith.constant 0 : i32
    %c0_i32_0 = arith.constant 0 : i32
    %c0_i32_1 = arith.constant 0 : i32
    return %c0_i32, %c0_i32_0 : i32, i32
  }
  func.func @transform_7(%arg0: i32) -> (i32, i32) {
    %c0_i32 = arith.constant 0 : i32
    %c0_i32_0 = arith.constant 0 : i32
    %c0_i32_1 = arith.constant 0 : i32
    return %c0_i32, %c0_i32_0 : i32, i32
  }
  func.func @transform_8(%arg0: i32) -> (i32, i32) {
    %c0_i32 = arith.constant 0 : i32
    %c0_i32_0 = arith.constant 0 : i32
    %c0_i32_1 = arith.constant 0 : i32
    return %c0_i32, %c0_i32_0 : i32, i32
  }
  func.func @transform_9(%arg0: i32) -> (i32, i32) {
    %c0_i32 = arith.constant 0 : i32
    %c0_i32_0 = arith.constant 0 : i32
    %c0_i32_1 = arith.constant 0 : i32
    return %c0_i32, %c0_i32_0 : i32, i32
  }
  func.func @transform_10(%arg0: i32) -> (i32, i32) {
    %c0_i32 = arith.constant 0 : i32
    %c0_i32_0 = arith.constant 0 : i32
    %c0_i32_1 = arith.constant 0 : i32
    return %c0_i32, %c0_i32_0 : i32, i32
  }
  func.func @transform_11(%arg0: i32) -> (i32, i32) {
    %c0_i32 = arith.constant 0 : i32
    %c0_i32_0 = arith.constant 0 : i32
    %c0_i32_1 = arith.constant 0 : i32
    return %c0_i32, %c0_i32_0 : i32, i32
  }
  func.func @transform_12(%arg0: i32) -> (i32, i32) {
    %c0_i32 = arith.constant 0 : i32
    %c0_i32_0 = arith.constant 0 : i32
    %c0_i32_1 = arith.constant 0 : i32
    return %c0_i32, %c0_i32_0 : i32, i32
  }
  func.func @transform_13(%arg0: i32) -> (i32, i32, i32) {
    %c0_i32 = arith.constant 0 : i32
    %c0_i32_0 = arith.constant 0 : i32
    %c0_i32_1 = arith.constant 0 : i32
    return %arg0, %c0_i32, %c0_i32_0 : i32, i32, i32
  }
}

module attributes {stable_mosaic.version = 11 : i64} {
  func.func @_encoder_layer_kernel(%arg0: i32, %arg1: memref<1x8x32xf32, #tpu.memory_space<vmem>>, %arg2: memref<96x32xf32, #tpu.memory_space<vmem>>, %arg3: memref<1x96xf32, #tpu.memory_space<vmem>>, %arg4: memref<32x32xf32, #tpu.memory_space<vmem>>, %arg5: memref<1x32xf32, #tpu.memory_space<vmem>>, %arg6: memref<1x32xf32, #tpu.memory_space<vmem>>, %arg7: memref<1x32xf32, #tpu.memory_space<vmem>>, %arg8: memref<2048x32xf32, #tpu.memory_space<vmem>>, %arg9: memref<1x2048xf32, #tpu.memory_space<vmem>>, %arg10: memref<32x2048xf32, #tpu.memory_space<vmem>>, %arg11: memref<1x32xf32, #tpu.memory_space<vmem>>, %arg12: memref<1x32xf32, #tpu.memory_space<vmem>>, %arg13: memref<1x32xf32, #tpu.memory_space<vmem>>, %arg14: memref<1x8x32xf32, #tpu.memory_space<vmem>>) attributes {dimension_semantics = [#tpu.dimension_semantics<parallel>], iteration_bounds = array<i64: 2>, scalar_prefetch = 0 : i64, scratch_operands = 0 : i64, tpu.core_type = #tpu.core_type<tc>, window_params = [{transform_indices = @transform_0, window_bounds = array<i64: 1, 8, 32>}, {pipeline_mode = #tpu.pipeline_mode<synchronous>, transform_indices = @transform_1, window_bounds = array<i64: 96, 32>}, {pipeline_mode = #tpu.pipeline_mode<synchronous>, transform_indices = @transform_2, window_bounds = array<i64: 1, 96>}, {pipeline_mode = #tpu.pipeline_mode<synchronous>, transform_indices = @transform_3, window_bounds = array<i64: 32, 32>}, {pipeline_mode = #tpu.pipeline_mode<synchronous>, transform_indices = @transform_4, window_bounds = array<i64: 1, 32>}, {pipeline_mode = #tpu.pipeline_mode<synchronous>, transform_indices = @transform_5, window_bounds = array<i64: 1, 32>}, {pipeline_mode = #tpu.pipeline_mode<synchronous>, transform_indices = @transform_6, window_bounds = array<i64: 1, 32>}, {pipeline_mode = #tpu.pipeline_mode<synchronous>, transform_indices = @transform_7, window_bounds = array<i64: 2048, 32>}, {pipeline_mode = #tpu.pipeline_mode<synchronous>, transform_indices = @transform_8, window_bounds = array<i64: 1, 2048>}, {pipeline_mode = #tpu.pipeline_mode<synchronous>, transform_indices = @transform_9, window_bounds = array<i64: 32, 2048>}, {pipeline_mode = #tpu.pipeline_mode<synchronous>, transform_indices = @transform_10, window_bounds = array<i64: 1, 32>}, {pipeline_mode = #tpu.pipeline_mode<synchronous>, transform_indices = @transform_11, window_bounds = array<i64: 1, 32>}, {pipeline_mode = #tpu.pipeline_mode<synchronous>, transform_indices = @transform_12, window_bounds = array<i64: 1, 32>}, {transform_indices = @transform_13, window_bounds = array<i64: 1, 8, 32>}]} {
    %c0 = arith.constant 0 : index
    %c0_0 = arith.constant 0 : index
    %c0_1 = arith.constant 0 : index
    %0 = vector.load %arg1[%c0, %c0_0, %c0_1] : memref<1x8x32xf32, #tpu.memory_space<vmem>>, vector<1x8x32xf32>
    %1 = vector.shape_cast %0 : vector<1x8x32xf32> to vector<8x32xf32>
    %c0_2 = arith.constant 0 : index
    %c0_3 = arith.constant 0 : index
    %2 = vector.load %arg2[%c0_2, %c0_3] : memref<96x32xf32, #tpu.memory_space<vmem>>, vector<96x32xf32>
    %cst = arith.constant dense<0.000000e+00> : vector<8x96xf32>
    %3 = tpu.matmul %1, %2, %cst {dimension_numbers = #tpu.dot_dimension_numbers<[1], [1], [0], [0], [0, 0, 1, 0], [], []>} : vector<8x32xf32>, vector<96x32xf32>, vector<8x96xf32> -> vector<8x96xf32>
    %c0_4 = arith.constant 0 : index
    %c0_5 = arith.constant 0 : index
    %4 = vector.load %arg3[%c0_4, %c0_5] : memref<1x96xf32, #tpu.memory_space<vmem>>, vector<1x96xf32>
    %5 = vector.broadcast %4 : vector<1x96xf32> to vector<8x96xf32>
    %6 = arith.addf %3, %5 : vector<8x96xf32>
    %c0_6 = arith.constant 0 : index
    %c0_7 = arith.constant 0 : index
    %7 = vector.load %arg4[%c0_6, %c0_7] : memref<32x32xf32, #tpu.memory_space<vmem>>, vector<32x32xf32>
    %cst_8 = arith.constant 0.000000e+00 : f32
    %8 = vector.broadcast %cst_8 : f32 to vector<8x32xf32>
    %9 = vector.extract_strided_slice %6 {offsets = [0, 0], sizes = [8, 8], strides = [1, 1]} : vector<8x96xf32> to vector<8x8xf32>
    %10 = vector.extract_strided_slice %6 {offsets = [0, 32], sizes = [8, 8], strides = [1, 1]} : vector<8x96xf32> to vector<8x8xf32>
    %11 = vector.extract_strided_slice %6 {offsets = [0, 64], sizes = [8, 8], strides = [1, 1]} : vector<8x96xf32> to vector<8x8xf32>
    %cst_9 = arith.constant dense<0.000000e+00> : vector<8x8xf32>
    %12 = tpu.matmul %9, %10, %cst_9 {dimension_numbers = #tpu.dot_dimension_numbers<[1], [1], [0], [0], [0, 0, 1, 0], [], []>} : vector<8x8xf32>, vector<8x8xf32>, vector<8x8xf32> -> vector<8x8xf32>
    %cst_10 = arith.constant 0.353553385 : f32
    %13 = vector.broadcast %cst_10 : f32 to vector<8x8xf32>
    %14 = arith.mulf %12, %13 : vector<8x8xf32>
    %cst_11 = arith.constant dense<0xFF800000> : vector<8xf32>
    %15 = vector.multi_reduction <maximumf>, %14, %cst_11 [1] : vector<8x8xf32> to vector<8xf32>
    %16 = vector.shape_cast %15 : vector<8xf32> to vector<8x1xf32>
    %17 = vector.broadcast %16 : vector<8x1xf32> to vector<8x8xf32>
    %18 = arith.subf %14, %17 : vector<8x8xf32>
    %19 = math.exp %18 : vector<8x8xf32>
    %cst_12 = arith.constant dense<0.000000e+00> : vector<8xf32>
    %20 = vector.multi_reduction <add>, %19, %cst_12 [1] : vector<8x8xf32> to vector<8xf32>
    %21 = vector.shape_cast %20 : vector<8xf32> to vector<8x1xf32>
    %22 = tpu.reciprocal %21 {approx = true} : vector<8x1xf32> -> vector<8x1xf32>
    %23 = vector.broadcast %22 : vector<8x1xf32> to vector<8x8xf32>
    %24 = arith.mulf %19, %23 : vector<8x8xf32>
    %cst_13 = arith.constant dense<0.000000e+00> : vector<8x8xf32>
    %25 = tpu.matmul %24, %11, %cst_13 {dimension_numbers = #tpu.dot_dimension_numbers<[1], [0], [0], [1], [0, 0, 1, 1], [], []>} : vector<8x8xf32>, vector<8x8xf32>, vector<8x8xf32> -> vector<8x8xf32>
    %26 = vector.extract_strided_slice %7 {offsets = [0, 0], sizes = [32, 8], strides = [1, 1]} : vector<32x32xf32> to vector<32x8xf32>
    %cst_14 = arith.constant dense<0.000000e+00> : vector<8x32xf32>
    %27 = tpu.matmul %25, %26, %cst_14 {dimension_numbers = #tpu.dot_dimension_numbers<[1], [1], [0], [0], [0, 0, 1, 0], [], []>} : vector<8x8xf32>, vector<32x8xf32>, vector<8x32xf32> -> vector<8x32xf32>
    %28 = arith.addf %8, %27 : vector<8x32xf32>
    %29 = vector.extract_strided_slice %6 {offsets = [0, 8], sizes = [8, 8], strides = [1, 1]} : vector<8x96xf32> to vector<8x8xf32>
    %30 = vector.extract_strided_slice %6 {offsets = [0, 40], sizes = [8, 8], strides = [1, 1]} : vector<8x96xf32> to vector<8x8xf32>
    %31 = vector.extract_strided_slice %6 {offsets = [0, 72], sizes = [8, 8], strides = [1, 1]} : vector<8x96xf32> to vector<8x8xf32>
    %cst_15 = arith.constant dense<0.000000e+00> : vector<8x8xf32>
    %32 = tpu.matmul %29, %30, %cst_15 {dimension_numbers = #tpu.dot_dimension_numbers<[1], [1], [0], [0], [0, 0, 1, 0], [], []>} : vector<8x8xf32>, vector<8x8xf32>, vector<8x8xf32> -> vector<8x8xf32>
    %cst_16 = arith.constant 0.353553385 : f32
    %33 = vector.broadcast %cst_16 : f32 to vector<8x8xf32>
    %34 = arith.mulf %32, %33 : vector<8x8xf32>
    %cst_17 = arith.constant dense<0xFF800000> : vector<8xf32>
    %35 = vector.multi_reduction <maximumf>, %34, %cst_17 [1] : vector<8x8xf32> to vector<8xf32>
    %36 = vector.shape_cast %35 : vector<8xf32> to vector<8x1xf32>
    %37 = vector.broadcast %36 : vector<8x1xf32> to vector<8x8xf32>
    %38 = arith.subf %34, %37 : vector<8x8xf32>
    %39 = math.exp %38 : vector<8x8xf32>
    %cst_18 = arith.constant dense<0.000000e+00> : vector<8xf32>
    %40 = vector.multi_reduction <add>, %39, %cst_18 [1] : vector<8x8xf32> to vector<8xf32>
    %41 = vector.shape_cast %40 : vector<8xf32> to vector<8x1xf32>
    %42 = tpu.reciprocal %41 {approx = true} : vector<8x1xf32> -> vector<8x1xf32>
    %43 = vector.broadcast %42 : vector<8x1xf32> to vector<8x8xf32>
    %44 = arith.mulf %39, %43 : vector<8x8xf32>
    %cst_19 = arith.constant dense<0.000000e+00> : vector<8x8xf32>
    %45 = tpu.matmul %44, %31, %cst_19 {dimension_numbers = #tpu.dot_dimension_numbers<[1], [0], [0], [1], [0, 0, 1, 1], [], []>} : vector<8x8xf32>, vector<8x8xf32>, vector<8x8xf32> -> vector<8x8xf32>
    %46 = vector.extract_strided_slice %7 {offsets = [0, 8], sizes = [32, 8], strides = [1, 1]} : vector<32x32xf32> to vector<32x8xf32>
    %cst_20 = arith.constant dense<0.000000e+00> : vector<8x32xf32>
    %47 = tpu.matmul %45, %46, %cst_20 {dimension_numbers = #tpu.dot_dimension_numbers<[1], [1], [0], [0], [0, 0, 1, 0], [], []>} : vector<8x8xf32>, vector<32x8xf32>, vector<8x32xf32> -> vector<8x32xf32>
    %48 = arith.addf %28, %47 : vector<8x32xf32>
    %49 = vector.extract_strided_slice %6 {offsets = [0, 16], sizes = [8, 8], strides = [1, 1]} : vector<8x96xf32> to vector<8x8xf32>
    %50 = vector.extract_strided_slice %6 {offsets = [0, 48], sizes = [8, 8], strides = [1, 1]} : vector<8x96xf32> to vector<8x8xf32>
    %51 = vector.extract_strided_slice %6 {offsets = [0, 80], sizes = [8, 8], strides = [1, 1]} : vector<8x96xf32> to vector<8x8xf32>
    %cst_21 = arith.constant dense<0.000000e+00> : vector<8x8xf32>
    %52 = tpu.matmul %49, %50, %cst_21 {dimension_numbers = #tpu.dot_dimension_numbers<[1], [1], [0], [0], [0, 0, 1, 0], [], []>} : vector<8x8xf32>, vector<8x8xf32>, vector<8x8xf32> -> vector<8x8xf32>
    %cst_22 = arith.constant 0.353553385 : f32
    %53 = vector.broadcast %cst_22 : f32 to vector<8x8xf32>
    %54 = arith.mulf %52, %53 : vector<8x8xf32>
    %cst_23 = arith.constant dense<0xFF800000> : vector<8xf32>
    %55 = vector.multi_reduction <maximumf>, %54, %cst_23 [1] : vector<8x8xf32> to vector<8xf32>
    %56 = vector.shape_cast %55 : vector<8xf32> to vector<8x1xf32>
    %57 = vector.broadcast %56 : vector<8x1xf32> to vector<8x8xf32>
    %58 = arith.subf %54, %57 : vector<8x8xf32>
    %59 = math.exp %58 : vector<8x8xf32>
    %cst_24 = arith.constant dense<0.000000e+00> : vector<8xf32>
    %60 = vector.multi_reduction <add>, %59, %cst_24 [1] : vector<8x8xf32> to vector<8xf32>
    %61 = vector.shape_cast %60 : vector<8xf32> to vector<8x1xf32>
    %62 = tpu.reciprocal %61 {approx = true} : vector<8x1xf32> -> vector<8x1xf32>
    %63 = vector.broadcast %62 : vector<8x1xf32> to vector<8x8xf32>
    %64 = arith.mulf %59, %63 : vector<8x8xf32>
    %cst_25 = arith.constant dense<0.000000e+00> : vector<8x8xf32>
    %65 = tpu.matmul %64, %51, %cst_25 {dimension_numbers = #tpu.dot_dimension_numbers<[1], [0], [0], [1], [0, 0, 1, 1], [], []>} : vector<8x8xf32>, vector<8x8xf32>, vector<8x8xf32> -> vector<8x8xf32>
    %66 = vector.extract_strided_slice %7 {offsets = [0, 16], sizes = [32, 8], strides = [1, 1]} : vector<32x32xf32> to vector<32x8xf32>
    %cst_26 = arith.constant dense<0.000000e+00> : vector<8x32xf32>
    %67 = tpu.matmul %65, %66, %cst_26 {dimension_numbers = #tpu.dot_dimension_numbers<[1], [1], [0], [0], [0, 0, 1, 0], [], []>} : vector<8x8xf32>, vector<32x8xf32>, vector<8x32xf32> -> vector<8x32xf32>
    %68 = arith.addf %48, %67 : vector<8x32xf32>
    %69 = vector.extract_strided_slice %6 {offsets = [0, 24], sizes = [8, 8], strides = [1, 1]} : vector<8x96xf32> to vector<8x8xf32>
    %70 = vector.extract_strided_slice %6 {offsets = [0, 56], sizes = [8, 8], strides = [1, 1]} : vector<8x96xf32> to vector<8x8xf32>
    %71 = vector.extract_strided_slice %6 {offsets = [0, 88], sizes = [8, 8], strides = [1, 1]} : vector<8x96xf32> to vector<8x8xf32>
    %cst_27 = arith.constant dense<0.000000e+00> : vector<8x8xf32>
    %72 = tpu.matmul %69, %70, %cst_27 {dimension_numbers = #tpu.dot_dimension_numbers<[1], [1], [0], [0], [0, 0, 1, 0], [], []>} : vector<8x8xf32>, vector<8x8xf32>, vector<8x8xf32> -> vector<8x8xf32>
    %cst_28 = arith.constant 0.353553385 : f32
    %73 = vector.broadcast %cst_28 : f32 to vector<8x8xf32>
    %74 = arith.mulf %72, %73 : vector<8x8xf32>
    %cst_29 = arith.constant dense<0xFF800000> : vector<8xf32>
    %75 = vector.multi_reduction <maximumf>, %74, %cst_29 [1] : vector<8x8xf32> to vector<8xf32>
    %76 = vector.shape_cast %75 : vector<8xf32> to vector<8x1xf32>
    %77 = vector.broadcast %76 : vector<8x1xf32> to vector<8x8xf32>
    %78 = arith.subf %74, %77 : vector<8x8xf32>
    %79 = math.exp %78 : vector<8x8xf32>
    %cst_30 = arith.constant dense<0.000000e+00> : vector<8xf32>
    %80 = vector.multi_reduction <add>, %79, %cst_30 [1] : vector<8x8xf32> to vector<8xf32>
    %81 = vector.shape_cast %80 : vector<8xf32> to vector<8x1xf32>
    %82 = tpu.reciprocal %81 {approx = true} : vector<8x1xf32> -> vector<8x1xf32>
    %83 = vector.broadcast %82 : vector<8x1xf32> to vector<8x8xf32>
    %84 = arith.mulf %79, %83 : vector<8x8xf32>
    %cst_31 = arith.constant dense<0.000000e+00> : vector<8x8xf32>
    %85 = tpu.matmul %84, %71, %cst_31 {dimension_numbers = #tpu.dot_dimension_numbers<[1], [0], [0], [1], [0, 0, 1, 1], [], []>} : vector<8x8xf32>, vector<8x8xf32>, vector<8x8xf32> -> vector<8x8xf32>
    %86 = vector.extract_strided_slice %7 {offsets = [0, 24], sizes = [32, 8], strides = [1, 1]} : vector<32x32xf32> to vector<32x8xf32>
    %cst_32 = arith.constant dense<0.000000e+00> : vector<8x32xf32>
    %87 = tpu.matmul %85, %86, %cst_32 {dimension_numbers = #tpu.dot_dimension_numbers<[1], [1], [0], [0], [0, 0, 1, 0], [], []>} : vector<8x8xf32>, vector<32x8xf32>, vector<8x32xf32> -> vector<8x32xf32>
    %88 = arith.addf %68, %87 : vector<8x32xf32>
    %c0_33 = arith.constant 0 : index
    %c0_34 = arith.constant 0 : index
    %89 = vector.load %arg5[%c0_33, %c0_34] : memref<1x32xf32, #tpu.memory_space<vmem>>, vector<1x32xf32>
    %90 = vector.broadcast %89 : vector<1x32xf32> to vector<8x32xf32>
    %91 = arith.addf %88, %90 : vector<8x32xf32>
    %92 = arith.addf %1, %91 : vector<8x32xf32>
    %c0_35 = arith.constant 0 : index
    %c0_36 = arith.constant 0 : index
    %93 = vector.load %arg6[%c0_35, %c0_36] : memref<1x32xf32, #tpu.memory_space<vmem>>, vector<1x32xf32>
    %c0_37 = arith.constant 0 : index
    %c0_38 = arith.constant 0 : index
    %94 = vector.load %arg7[%c0_37, %c0_38] : memref<1x32xf32, #tpu.memory_space<vmem>>, vector<1x32xf32>
    %cst_39 = arith.constant dense<0.000000e+00> : vector<8xf32>
    %95 = vector.multi_reduction <add>, %92, %cst_39 [1] : vector<8x32xf32> to vector<8xf32>
    %96 = vector.shape_cast %95 : vector<8xf32> to vector<8x1xf32>
    %cst_40 = arith.constant 3.200000e+01 : f32
    %97 = vector.broadcast %cst_40 : f32 to vector<8x1xf32>
    %98 = arith.divf %96, %97 : vector<8x1xf32>
    %99 = vector.broadcast %98 : vector<8x1xf32> to vector<8x32xf32>
    %100 = arith.subf %92, %99 : vector<8x32xf32>
    %101 = arith.mulf %100, %100 : vector<8x32xf32>
    %cst_41 = arith.constant dense<0.000000e+00> : vector<8xf32>
    %102 = vector.multi_reduction <add>, %101, %cst_41 [1] : vector<8x32xf32> to vector<8xf32>
    %103 = vector.shape_cast %102 : vector<8xf32> to vector<8x1xf32>
    %cst_42 = arith.constant 3.200000e+01 : f32
    %104 = vector.broadcast %cst_42 : f32 to vector<8x1xf32>
    %105 = arith.divf %103, %104 : vector<8x1xf32>
    %106 = vector.broadcast %98 : vector<8x1xf32> to vector<8x32xf32>
    %107 = arith.subf %92, %106 : vector<8x32xf32>
    %cst_43 = arith.constant 9.99999974E-6 : f32
    %108 = vector.broadcast %cst_43 : f32 to vector<8x1xf32>
    %109 = arith.addf %105, %108 : vector<8x1xf32>
    %110 = math.rsqrt %109 : vector<8x1xf32>
    %111 = vector.broadcast %110 : vector<8x1xf32> to vector<8x32xf32>
    %112 = arith.mulf %107, %111 : vector<8x32xf32>
    %113 = vector.broadcast %93 : vector<1x32xf32> to vector<8x32xf32>
    %114 = arith.mulf %112, %113 : vector<8x32xf32>
    %115 = vector.broadcast %94 : vector<1x32xf32> to vector<8x32xf32>
    %116 = arith.addf %114, %115 : vector<8x32xf32>
    %c0_44 = arith.constant 0 : index
    %c0_45 = arith.constant 0 : index
    %117 = vector.load %arg8[%c0_44, %c0_45] : memref<2048x32xf32, #tpu.memory_space<vmem>>, vector<2048x32xf32>
    %cst_46 = arith.constant dense<0.000000e+00> : vector<8x2048xf32>
    %118 = tpu.matmul %116, %117, %cst_46 {dimension_numbers = #tpu.dot_dimension_numbers<[1], [1], [0], [0], [0, 0, 1, 0], [], []>} : vector<8x32xf32>, vector<2048x32xf32>, vector<8x2048xf32> -> vector<8x2048xf32>
    %c0_47 = arith.constant 0 : index
    %c0_48 = arith.constant 0 : index
    %119 = vector.load %arg9[%c0_47, %c0_48] : memref<1x2048xf32, #tpu.memory_space<vmem>>, vector<1x2048xf32>
    %120 = vector.broadcast %119 : vector<1x2048xf32> to vector<8x2048xf32>
    %121 = arith.addf %118, %120 : vector<8x2048xf32>
    %cst_49 = arith.constant 0.000000e+00 : f32
    %122 = vector.broadcast %cst_49 : f32 to vector<8x2048xf32>
    %123 = arith.maximumf %121, %122 : vector<8x2048xf32>
    %c0_50 = arith.constant 0 : index
    %c0_51 = arith.constant 0 : index
    %124 = vector.load %arg10[%c0_50, %c0_51] : memref<32x2048xf32, #tpu.memory_space<vmem>>, vector<32x2048xf32>
    %cst_52 = arith.constant dense<0.000000e+00> : vector<8x32xf32>
    %125 = tpu.matmul %123, %124, %cst_52 {dimension_numbers = #tpu.dot_dimension_numbers<[1], [1], [0], [0], [0, 0, 1, 0], [], []>} : vector<8x2048xf32>, vector<32x2048xf32>, vector<8x32xf32> -> vector<8x32xf32>
    %c0_53 = arith.constant 0 : index
    %c0_54 = arith.constant 0 : index
    %126 = vector.load %arg11[%c0_53, %c0_54] : memref<1x32xf32, #tpu.memory_space<vmem>>, vector<1x32xf32>
    %127 = vector.broadcast %126 : vector<1x32xf32> to vector<8x32xf32>
    %128 = arith.addf %125, %127 : vector<8x32xf32>
    %129 = arith.addf %116, %128 : vector<8x32xf32>
    %c0_55 = arith.constant 0 : index
    %c0_56 = arith.constant 0 : index
    %130 = vector.load %arg12[%c0_55, %c0_56] : memref<1x32xf32, #tpu.memory_space<vmem>>, vector<1x32xf32>
    %c0_57 = arith.constant 0 : index
    %c0_58 = arith.constant 0 : index
    %131 = vector.load %arg13[%c0_57, %c0_58] : memref<1x32xf32, #tpu.memory_space<vmem>>, vector<1x32xf32>
    %cst_59 = arith.constant dense<0.000000e+00> : vector<8xf32>
    %132 = vector.multi_reduction <add>, %129, %cst_59 [1] : vector<8x32xf32> to vector<8xf32>
    %133 = vector.shape_cast %132 : vector<8xf32> to vector<8x1xf32>
    %cst_60 = arith.constant 3.200000e+01 : f32
    %134 = vector.broadcast %cst_60 : f32 to vector<8x1xf32>
    %135 = arith.divf %133, %134 : vector<8x1xf32>
    %136 = vector.broadcast %135 : vector<8x1xf32> to vector<8x32xf32>
    %137 = arith.subf %129, %136 : vector<8x32xf32>
    %138 = arith.mulf %137, %137 : vector<8x32xf32>
    %cst_61 = arith.constant dense<0.000000e+00> : vector<8xf32>
    %139 = vector.multi_reduction <add>, %138, %cst_61 [1] : vector<8x32xf32> to vector<8xf32>
    %140 = vector.shape_cast %139 : vector<8xf32> to vector<8x1xf32>
    %cst_62 = arith.constant 3.200000e+01 : f32
    %141 = vector.broadcast %cst_62 : f32 to vector<8x1xf32>
    %142 = arith.divf %140, %141 : vector<8x1xf32>
    %143 = vector.broadcast %135 : vector<8x1xf32> to vector<8x32xf32>
    %144 = arith.subf %129, %143 : vector<8x32xf32>
    %cst_63 = arith.constant 9.99999974E-6 : f32
    %145 = vector.broadcast %cst_63 : f32 to vector<8x1xf32>
    %146 = arith.addf %142, %145 : vector<8x1xf32>
    %147 = math.rsqrt %146 : vector<8x1xf32>
    %148 = vector.broadcast %147 : vector<8x1xf32> to vector<8x32xf32>
    %149 = arith.mulf %144, %148 : vector<8x32xf32>
    %150 = vector.broadcast %130 : vector<1x32xf32> to vector<8x32xf32>
    %151 = arith.mulf %149, %150 : vector<8x32xf32>
    %152 = vector.broadcast %131 : vector<1x32xf32> to vector<8x32xf32>
    %153 = arith.addf %151, %152 : vector<8x32xf32>
    %c0_64 = arith.constant 0 : index
    %c0_65 = arith.constant 0 : index
    %c0_66 = arith.constant 0 : index
    %154 = vector.load %arg14[%c0_64, %c0_65, %c0_66] : memref<1x8x32xf32, #tpu.memory_space<vmem>>, vector<1x8x32xf32>
    %155 = vector.shape_cast %154 : vector<1x8x32xf32> to vector<8x32xf32>
    %156 = vector.shape_cast %153 : vector<8x32xf32> to vector<1x8x32xf32>
    tpu.vector_store %arg14[%c0_64, %c0_65, %c0_66], %156 {strides = array<i32>} : memref<1x8x32xf32, #tpu.memory_space<vmem>>, vector<1x8x32xf32>,
    return
  }
  func.func @transform_0(%arg0: i32) -> (i32, i32, i32) {
    %c0_i32 = arith.constant 0 : i32
    %c0_i32_0 = arith.constant 0 : i32
    %c0_i32_1 = arith.constant 0 : i32
    return %arg0, %c0_i32, %c0_i32_0 : i32, i32, i32
  }
  func.func @transform_1(%arg0: i32) -> (i32, i32) {
    %c0_i32 = arith.constant 0 : i32
    %c0_i32_0 = arith.constant 0 : i32
    %c0_i32_1 = arith.constant 0 : i32
    return %c0_i32, %c0_i32_0 : i32, i32
  }
  func.func @transform_2(%arg0: i32) -> (i32, i32) {
    %c0_i32 = arith.constant 0 : i32
    %c0_i32_0 = arith.constant 0 : i32
    %c0_i32_1 = arith.constant 0 : i32
    return %c0_i32, %c0_i32_0 : i32, i32
  }
  func.func @transform_3(%arg0: i32) -> (i32, i32) {
    %c0_i32 = arith.constant 0 : i32
    %c0_i32_0 = arith.constant 0 : i32
    %c0_i32_1 = arith.constant 0 : i32
    return %c0_i32, %c0_i32_0 : i32, i32
  }
  func.func @transform_4(%arg0: i32) -> (i32, i32) {
    %c0_i32 = arith.constant 0 : i32
    %c0_i32_0 = arith.constant 0 : i32
    %c0_i32_1 = arith.constant 0 : i32
    return %c0_i32, %c0_i32_0 : i32, i32
  }
  func.func @transform_5(%arg0: i32) -> (i32, i32) {
    %c0_i32 = arith.constant 0 : i32
    %c0_i32_0 = arith.constant 0 : i32
    %c0_i32_1 = arith.constant 0 : i32
    return %c0_i32, %c0_i32_0 : i32, i32
  }
  func.func @transform_6(%arg0: i32) -> (i32, i32) {
    %c0_i32 = arith.constant 0 : i32
    %c0_i32_0 = arith.constant 0 : i32
    %c0_i32_1 = arith.constant 0 : i32
    return %c0_i32, %c0_i32_0 : i32, i32
  }
  func.func @transform_7(%arg0: i32) -> (i32, i32) {
    %c0_i32 = arith.constant 0 : i32
    %c0_i32_0 = arith.constant 0 : i32
    %c0_i32_1 = arith.constant 0 : i32
    return %c0_i32, %c0_i32_0 : i32, i32
  }
  func.func @transform_8(%arg0: i32) -> (i32, i32) {
    %c0_i32 = arith.constant 0 : i32
    %c0_i32_0 = arith.constant 0 : i32
    %c0_i32_1 = arith.constant 0 : i32
    return %c0_i32, %c0_i32_0 : i32, i32
  }
  func.func @transform_9(%arg0: i32) -> (i32, i32) {
    %c0_i32 = arith.constant 0 : i32
    %c0_i32_0 = arith.constant 0 : i32
    %c0_i32_1 = arith.constant 0 : i32
    return %c0_i32, %c0_i32_0 : i32, i32
  }
  func.func @transform_10(%arg0: i32) -> (i32, i32) {
    %c0_i32 = arith.constant 0 : i32
    %c0_i32_0 = arith.constant 0 : i32
    %c0_i32_1 = arith.constant 0 : i32
    return %c0_i32, %c0_i32_0 : i32, i32
  }
  func.func @transform_11(%arg0: i32) -> (i32, i32) {
    %c0_i32 = arith.constant 0 : i32
    %c0_i32_0 = arith.constant 0 : i32
    %c0_i32_1 = arith.constant 0 : i32
    return %c0_i32, %c0_i32_0 : i32, i32
  }
  func.func @transform_12(%arg0: i32) -> (i32, i32) {
    %c0_i32 = arith.constant 0 : i32
    %c0_i32_0 = arith.constant 0 : i32
    %c0_i32_1 = arith.constant 0 : i32
    return %c0_i32, %c0_i32_0 : i32, i32
  }
  func.func @transform_13(%arg0: i32) -> (i32, i32, i32) {
    %c0_i32 = arith.constant 0 : i32
    %c0_i32_0 = arith.constant 0 : i32
    %c0_i32_1 = arith.constant 0 : i32
    return %arg0, %c0_i32, %c0_i32_0 : i32, i32, i32
  }
}

</mosaic_0001>

<bundles_post_ra>
// kernel: transformer_encoder_forward.3
= control target key start
LH: loop header
LB: loop body
LE: loop exit
PB: predicated region body
PF: predicated region fallthrough
CT: control target
= control target key end

     0   :  { %s317_s12 = smov 0   ;;  %s349_s0 = inlined_call_operand.vmem [shape: f32[16,16], index: 0, kind: input, shape index: {}]   ;;  %s350_s1 = inlined_call_operand.vmem [shape: f32[32,16], index: 1, kind: input, shape index: {}]   ;;  %s351_s2 = inlined_call_operand.vmem [shape: f32[1,32], index: 2, kind: input, shape index: {}]   ;;  %s352_s3 = inlined_call_operand.vmem [shape: f32[16,32], index: 3, kind: output, shape index: {}]  }
   0x1 LB: > { %s266_s13 = sadd.s32 4294967295, %s295_s12   ;;  %p270_p0 = scmp.ge.s32.totalorder %s295_s12, 1  ;;  %s295_s12 = sphi %s317_s12, %s13_s12  }
   0x2   : > { %p136_p1 = scmp.lt.s32.totalorder %s295_s12, 3 }
   0x4   : > { %p137_p2 = pnand %p270_p0, %p136_p1 }
   0x5   : > { %p158_p3 = scmp.lt.s32.totalorder (!%p137_p2), %s266_s13, 1 }
   0x6   : > { %140 = sbr.rel (%p137_p2) target bundleno = 156 (0x9c), region = 32 }
   0xb   : > { %v170_v0 = vld [vmem:[%s350_s1 + $0x18] sm:$0xff]  ;;  %vm175_vm0 = vcmask 130048   ;;  %v169_v1 = vld [vmem:[%s350_s1 + $0x10] sm:$0xff]  ;;  %s354_s13 = smov (!%p158_p3, %s266_s13), 1  ;;  %v168_v2 = vld [vmem:[%s350_s1 + $0x8] sm:$0xff]  ;;  %vm211_vm1 = vcmask 261120  }
   0xc   : > { %273 = vmatpush.xpose.msk.msra.mxu0 %vm175_vm0, %v170_v0  ;;  %s271_s20 = sshll.u32 %s354_s13, 3  ;;  %v167_v3 = vld [vmem:[%s350_s1] sm:$0xff] }
   0xd   : > { %s161_s25 = scalar_lea.vmem %s349_s0, %s271_s20  ;;  %v288_v5 = vld [vmem:[%s351_s2] ss:$0 sm:$0xff]  ;;  %s165_s30 = scalar_lea.vmem %s352_s3, %s271_s20 }
   0xe   : > { %v166_v4 = vld [vmem:[%s161_s25] sm:$0xff] }
  0x10   : > { %274 = vmatpush.xpose.msk.msra.mxu0 %vm175_vm0, %v169_v1 }
  0x14   : > { %275 = vmatpush.xpose.msk.msra.mxu0 %vm175_vm0, %v168_v2 }
  0x18   : > { %276 = vmatpush.xpose.msk.msra.mxu0 %vm175_vm0, %v167_v3 }
  0x1b   : > { %277 = vmatmul.msk.f32.vlgmr.msra.gmra.mxu0 %vm175_vm0, %v166_v4 }
  0x98   : > { %v208_v6 = vpop.f32.mrf.mxu0 }
  0x99   : > { %v209_v7 = vadd.f32 %v288_v5, %v208_v6 }
  0x9b   : > { %212 = vst.msk [vmem:[%s165_s30] sm:$0xff] %vm211_vm1, %v209_v7 }
  0x9c PF: > { %s13_s12 = sadd.s32 1, %s295_s12  }
  0x9d   : > { %p10_p4 = scmp.ge.s32.totalorder %s13_s12, 4  }
  0x9f   :  { %12 = sbr.rel (!%p10_p4) target bundleno = 1 (0x1), region = 62 }

// kernel: transformer_encoder_forward.4
= control target key start
LH: loop header
LB: loop body
LE: loop exit
PB: predicated region body
PF: predicated region fallthrough
CT: control target
= control target key end

     0   :  { %s3319_s25 = smov 0   ;;  %s4815_s0 = inlined_call_operand.vmem [shape: f32[2,8,32], index: 0, kind: input, shape index: {}]   ;;  %s4816_s1 = inlined_call_operand.vmem [shape: f32[96,32], index: 1, kind: input, shape index: {}]   ;;  %s4817_s2 = inlined_call_operand.vmem [shape: f32[1,96], index: 2, kind: input, shape index: {}]   ;;  %s4818_s3 = inlined_call_operand.vmem [shape: f32[32,32], index: 3, kind: input, shape index: {}]   ;;  %s4819_s4 = inlined_call_operand.vmem [shape: f32[1,32], index: 4, kind: input, shape index: {}]   ;;  %s4820_s5 = inlined_call_operand.vmem [shape: f32[1,32], index: 5, kind: input, shape index: {}]   ;;  %s4821_s6 = inlined_call_operand.vmem [shape: f32[1,32], index: 6, kind: input, shape index: {}]   ;;  %s4822_s7 = inlined_call_operand.vmem [shape: f32[2048,32], index: 7, kind: input, shape index: {}]   ;;  %s4823_s8 = inlined_call_operand.vmem [shape: f32[1,2048], index: 8, kind: input, shape index: {}]   ;;  %s4824_s9 = inlined_call_operand.vmem [shape: f32[32,2048], index: 9, kind: input, shape index: {}]   ;;  %s4825_s10 = inlined_call_operand.vmem [shape: f32[1,32], index: 10, kind: input, shape index: {}]   ;;  %s4826_s11 = inlined_call_operand.vmem [shape: f32[1,32], index: 11, kind: input, shape index: {}]   ;;  %s4827_s12 = inlined_call_operand.vmem [shape: f32[1,32], index: 12, kind: input, shape index: {}]   ;;  %s4828_s13 = inlined_call_operand.vmem [shape: f32[2,8,32], index: 13, kind: output, shape index: {}]  }
   0x1 LB: > { %s2854_s26 = sadd.s32 4294967295, %s3235_s25   ;;  %p2858_p0 = scmp.ge.s32.totalorder %s3235_s25, 1  ;;  %s3235_s25 = sphi %s3319_s25, %s23_s25  }
   0x2   : > { %p386_p1 = scmp.lt.s32.totalorder %s3235_s25, 3 }
   0x4   : > { %p387_p2 = pnand %p2858_p0, %p386_p1 }
   0x5   : > { %p428_p3 = scmp.lt.s32.totalorder (!%p387_p2), %s2854_s26, 1  ;;  %s3237_s27 = smov (!%p387_p2), 120  }
   0x6   : > { %390 = sbr.rel (%p387_p2) target bundleno = 2445 (0x98d), region = 72  ;;  %s3238_s28 = smov (!%p387_p2), 96  }
   0x7   : > { %s3239_s29 = smov (!%p387_p2), 88   ;;  %s3240_s30 = smov (!%p387_p2), 56  }
   0x8   : > { %s3241_s14 = smov (!%p387_p2), 72   ;;  %s3242_s15 = smov (!%p387_p2), 80  }
   0x9   : > { %s3243_s16 = smov (!%p387_p2), 104  }
   0xb   : > { %v448_v0 = vld [vmem:[%s4816_s1 + $0x58] sm:$0xff]  ;;  %vm453_vm0 = vcmask 261120   ;;  %v447_v1 = vld [vmem:[%s4816_s1 + $0x50] sm:$0xff]  ;;  %v446_v2 = vld [vmem:[%s4816_s1 + $0x48] sm:$0xff]  ;;  %s4830_s26 = smov (!%p428_p3, %s2854_s26), 1  ;;  %vm520_vm1 = vcmask 64512  }
   0xc   : > { %2861 = vmatpush.xpose.msk.msra.mxu0 %vm453_vm0, %v448_v0  ;;  %v445_v3 = vld [vmem:[%s4816_s1 + $0x40] sm:$0xff]  ;;  %v444_v4 = vld [vmem:[%s4816_s1 + $0x38] sm:$0xff]  ;;  %v443_v5 = vld [vmem:[%s4816_s1 + $0x30] sm:$0xff]  ;;  %s2859_s17 = sshll.u32 %s4830_s26, 3 }
   0xd   : > { %v442_v6 = vld [vmem:[%s4816_s1 + $0x28] sm:$0xff]  ;;  %v441_v7 = vld [vmem:[%s4816_s1 + $0x20] sm:$0xff]  ;;  %v440_v8 = vld [vmem:[%s4816_s1 + $0x18] sm:$0xff]  ;;  %s431_s22 = scalar_lea.vmem %s4815_s0, %s2859_s17 }
   0xe   : > { %v439_v9 = vld [vmem:[%s4816_s1 + $0x10] sm:$0xff]  ;;  %v438_v10 = vld [vmem:[%s4816_s1 + $0x8] sm:$0xff]  ;;  %v437_v11 = vld [vmem:[%s4816_s1] sm:$0xff] }
   0xf   : > { %v3383_v12 = vld [vmem:[%s431_s22] sm:$0xff]  ;;  %v3411_v25 = vld [vmem:[%s4818_s3 + $0x18] sm:$0xff]  ;;  %v3418_v26 = vld [vmem:[%s4818_s3 + $0x10] sm:$0xff] }
  0x10   : > { %2862 = vmatpush.xpose.msk.msra.mxu0 %vm453_vm0, %v447_v1  ;;  %v3200_v13 = vld [vmem:[%s4817_s2] ss:$0 sm:$0xff]  ;;  %v3425_v27 = vld [vmem:[%s4818_s3 + $0x8] sm:$0xff] }
  0x11   : > { %v3432_v28 = vld [vmem:[%s4818_s3] sm:$0xff] }
  0x14   : > { %2863 = vmatpush.xpose.msk.msra.mxu0 %vm453_vm0, %v446_v2 }
  0x18   : > { %2864 = vmatpush.xpose.msk.msra.mxu0 %vm453_vm0, %v445_v3 }
  0x1c   : > { %2865 = vmatpush.xpose.msk.msra.mxu0 %vm453_vm0, %v444_v4 }
  0x20   : > { %2866 = vmatpush.xpose.msk.msra.mxu0 %vm453_vm0, %v443_v5 }
  0x24   : > { %2867 = vmatpush.xpose.msk.msra.mxu0 %vm453_vm0, %v442_v6 }
  0x28   : > { %2868 = vmatpush.xpose.msk.msra.mxu0 %vm453_vm0, %v441_v7 }
  0x2c   : > { %2869 = vmatpush.xpose.msk.msra.mxu0 %vm453_vm0, %v440_v8 }
  0x30   : > { %2870 = vmatpush.xpose.msk.msra.mxu0 %vm453_vm0, %v439_v9 }
  0x34   : > { %2871 = vmatpush.xpose.msk.msra.mxu0 %vm453_vm0, %v438_v10 }
  0x38   : > { %2872 = vmatpush.xpose.msk.msra.mxu0 %vm453_vm0, %v437_v11 }
  0x3b   : > { %2873 = vmatmul.msk.f32.vlgmr.msra.gmra.mxu0 %vm453_vm0, %v3383_v12 }
  0xb8   : > { %v510_v14 = vpop.f32.mrf.mxu0 }
  0xb9   : > { %v3390_v15 = vadd.f32 %v3200_v13, %v510_v14 }
  0xbb   : > { %583 = vrot.lane.b32.xlu1 %v3390_v15, %s3237_s27  ;;  %518 = vrot.lane.b32.xlu0 %v3390_v15, %s3238_s28 }
  0xc3   : > { %585 = vrot.lane.b32.xlu0 %v3390_v15, %s3239_s29  ;;  %s3244_s29 = smov 64  }
 0x12d   : > { %v519_v16 = vpop.permute.xlu0 %518  ;;  %v584_v18 = vpop.permute.xlu1 %583 }
 0x12e   : > { %2874 = vmatpush.xpose.msk.msra.mxu1 %vm520_vm1, %v519_v16 }
 0x131   : > { %2875 = vmatmul.msk.f32.vlgmr.msra.gmra.mxu1 %vm520_vm1, %v3390_v15 }
 0x135   : > { %v586_v17 = vpop.permute.xlu0 %585 }
 0x136   : > { %2877 = vmatpush.xpose.msk.msra.mxu3 %vm520_vm1, %v586_v17 }
 0x139   : > { %2878 = vmatmul.msk.f32.vlgmr.msra.gmra.mxu3 %vm520_vm1, %v584_v18 }
 0x13a   : > { %2885 = vmatpush.xpose.msk.msrb.mxu3 %vm520_vm1, %v3411_v25 }
 0x13e   : > { %2886 = vmatpush.xpose.msk.msrb.mxu3 %vm520_vm1, %v3418_v26 }
 0x142   : > { %2887 = vmatpush.xpose.msk.msrb.mxu3 %vm520_vm1, %v3425_v27 }
 0x146   : > { %2888 = vmatpush.xpose.msk.msrb.mxu3 %vm520_vm1, %v3432_v28 }
 0x1ae   : > { %v542_v19 = vpop.f32.mrf.mxu1 }
 0x1af   : > { %v545_v20 = vmul.f32 0.35355338, %v542_v19 }
 0x1b1   : > { %v546_v21 = vsel %vm520_vm1, %v545_v20, -inf }
 0x1b2   : > { %547 = vmax.xlane.f32.xlu1 %v546_v21 }
 0x1bc   : > { %v608_v22 = vpop.f32.mrf.mxu3 }
 0x1bd   : > { %v611_v23 = vmul.f32 0.35355338, %v608_v22 }
 0x1bf   : > { %v612_v24 = vsel %vm520_vm1, %v611_v23, -inf }
 0x1c0   : > { %613 = vmax.xlane.f32.xlu0 %v612_v24 }
 0x1cb   : > { %623 = vrot.lane.b32.xlu1 %v3390_v15, %s3240_s30  ;;  %s3245_s30 = smov 112  }
 0x1d3   : > { %831 = vrot.lane.b32.xlu1 %v3390_v15, %s3241_s14  ;;  %s3246_s14 = smov 48  }
 0x1d4   : > { %725 = vrot.lane.b32.xlu0 %v3390_v15, %s3242_s15  ;;  %s3247_s15 = smov 40  }
 0x1dc   : > { %829 = vrot.lane.b32.xlu0 %v3390_v15, %s3243_s16 }
 0x225   : > { %v548_v29 = vpop.xlane.xlu1 %547 }
 0x226   : > { %v549_v30 = vsub.f32 %v545_v20, %v548_v29 }
 0x228   : > { %v550_v31 = vmul.f32 1.442695, %v549_v30 }
 0x22a   : > { %3207 = vpow2.f32 %v550_v31 }
 0x230   : > { %v3208_v32 = vpop.eup %3207 }
 0x231   : > { %v552_v33 = vsel %vm520_vm1, %v3208_v32, 0.0 }
 0x232   : > { %553 = vadd.xlane.f32.xlu2 %v552_v33  ;;  %v3201_v33 = vld [vmem:[%s4819_s4] ss:$0 sm:$0xff] }
 0x233   : > { %v614_v36 = vpop.xlane.xlu0 %613 }
 0x234   : > { %v615_v37 = vsub.f32 %v611_v23, %v614_v36 }
 0x236   : > { %v616_v38 = vmul.f32 1.442695, %v615_v37 }
 0x238   : > { %3209 = vpow2.f32 %v616_v38 }
 0x23d   : > { %v624_v34 = vpop.permute.xlu1 %623 }
 0x23e   : > { %v3210_v39 = vpop.eup %3209 }
 0x23f   : > { %v618_v40 = vsel %vm520_vm1, %v3210_v39, 0.0 }
 0x245   : > { %v832_v35 = vpop.permute.xlu1 %831 }
 0x246   : > { %2898 = vmatpush.xpose.msk.msra.mxu3 %vm520_vm1, %v832_v35  ;;  %v726_v45 = vpop.permute.xlu0 %725 }
 0x24a   : > { %557 = vrot.lane.b32.xlu2 %v3390_v15, %s3244_s29 }
 0x24e   : > { %v830_v51 = vpop.permute.xlu0 %829 }
 0x273   : > { %619 = vadd.xlane.f32.xlu2 %v618_v40  ;;  %v995_v40 = vld [vmem:[%s4822_s7 + $0x78] sm:$0xff] }
 0x28b   : > { %723 = vrot.lane.b32.xlu2 %v3390_v15, %s3245_s30 }
 0x2a5   : > { %v554_v41 = vpop.xlane.xlu2 %553 }
 0x2a6   : > { %3211 = vrcp.f32 %v554_v41  ;;  %v1011_v41 = vld [vmem:[%s4822_s7 + $0xf8] sm:$0xff] }
 0x2ac   : > { %v3212_v42 = vpop.eup %3211 }
 0x2ad   : > { %v558_v43 = vpop.permute.xlu2 %557  ;;  %v556_v44 = vmul.f32 %v3212_v42, %v3208_v32  ;;  %v1027_v42 = vld [vmem:[%s4822_s7 + $0x178] sm:$0xff] }
 0x2ae   : > { %578 = vmatpush.msra.mxu2 %v558_v43  ;;  %v994_v43 = vld [vmem:[%s4822_s7 + $0x70] sm:$0xff] }
 0x2af   : > { %2876 = vmatmul.msk.f32.vlgmr.msra.gmra.mxu2 %vm520_vm1, %v556_v44  ;;  %v1010_v44 = vld [vmem:[%s4822_s7 + $0xf0] sm:$0xff] }
 0x2b0   : > { %644 = vmatpush.msrb.mxu2 %v624_v34 }
 0x2b2   : > { %2890 = vmatpush.xpose.msk.msra.mxu2 %vm520_vm1, %v726_v45 }
 0x2e6   : > { %v620_v46 = vpop.xlane.xlu2 %619 }
 0x2e7   : > { %3213 = vrcp.f32 %v620_v46  ;;  %v1026_v46 = vld [vmem:[%s4822_s7 + $0x170] sm:$0xff] }
 0x2ed   : > { %v3214_v47 = vpop.eup %3213 }
 0x2ee   : > { %v622_v48 = vmul.f32 %v3214_v47, %v3210_v39  ;;  %v724_v49 = vpop.permute.xlu2 %723  ;;  %v3248_v39 = vmov 32.0   ;;  %v1042_v47 = vld [vmem:[%s4822_s7 + $0x1f0] sm:$0xff] }
 0x2f0   : > { %2879 = vmatmul.msk.f32.vlgmr.msrb.gmra.mxu2 %vm520_vm1, %v622_v48 }
 0x2f8   : > { %2891 = vmatmul.msk.f32.vlgmr.msra.gmra.mxu2 %vm520_vm1, %v724_v49  ;;  %v993_v49 = vld [vmem:[%s4822_s7 + $0x68] sm:$0xff] }
 0x332   : > { %v580_v50 = vpop.f32.mrf.mxu2 }
 0x333   : > { %2889 = vmatmul.msk.f32.vlgmr.msrb.gmra.mxu3 %vm520_vm1, %v580_v50  ;;  %v1009_v50 = vld [vmem:[%s4822_s7 + $0xe8] sm:$0xff] }
 0x33b   : > { %2899 = vmatmul.msk.f32.vlgmr.msra.gmra.mxu3 %vm520_vm1, %v830_v51  ;;  %v1025_v51 = vld [vmem:[%s4822_s7 + $0x168] sm:$0xff] }
 0x373   : > { %v3448_v52 = vpop.f32.mrf.mxu2 }
 0x37b   : > { %v748_v53 = vpop.f32.mrf.mxu2 }
 0x37c   : > { %v751_v54 = vmul.f32 0.35355338, %v748_v53 }
 0x37e   : > { %v752_v55 = vsel %vm520_vm1, %v751_v54, -inf }
 0x37f   : > { %753 = vmax.xlane.f32.xlu1 %v752_v55  ;;  %v1008_v55 = vld [vmem:[%s4822_s7 + $0xe0] sm:$0xff] }
 0x3b6   : > { %v3451_v56 = vpop.f32.mrf.mxu3 }
 0x3be   : > { %v854_v57 = vpop.f32.mrf.mxu3 }
 0x3bf   : > { %v857_v58 = vmul.f32 0.35355338, %v854_v57  ;;  %v1040_v57 = vld [vmem:[%s4822_s7 + $0x1e0] sm:$0xff] }
 0x3c1   : > { %v858_v59 = vsel %vm520_vm1, %v857_v58, -inf }
 0x3c2   : > { %859 = vmax.xlane.f32.xlu0 %v858_v59  ;;  %v991_v59 = vld [vmem:[%s4822_s7 + $0x58] sm:$0xff] }
 0x3d6   : > { %763 = vrot.lane.b32.xlu0 %v3390_v15, %s3246_s14 }
 0x3de   : > { %657 = vrot.lane.b32.xlu0 %v3418_v26, %s3237_s27 }
 0x3e6   : > { %901 = vrot.lane.b32.xlu0 %v3411_v25, %s3243_s16 }
 0x3ee   : > { %899 = vrot.lane.b32.xlu0 %v3418_v26, %s3243_s16 }
 0x3f2   : > { %v754_v60 = vpop.xlane.xlu1 %753 }
 0x3f3   : > { %v755_v61 = vsub.f32 %v751_v54, %v754_v60  ;;  %v992_v54 = vld [vmem:[%s4822_s7 + $0x60] sm:$0xff]  ;;  %v1007_v60 = vld [vmem:[%s4822_s7 + $0xd8] sm:$0xff] }
 0x3f5   : > { %v756_v62 = vmul.f32 1.442695, %v755_v61  ;;  %v1023_v61 = vld [vmem:[%s4822_s7 + $0x158] sm:$0xff] }
 0x3f6   : > { %897 = vrot.lane.b32.xlu0 %v3425_v27, %s3243_s16 }
 0x3f7   : > { %3215 = vpow2.f32 %v756_v62  ;;  %v1039_v62 = vld [vmem:[%s4822_s7 + $0x1d8] sm:$0xff] }
 0x3fd   : > { %v3216_v63 = vpop.eup %3215 }
 0x3fe   : > { %v758_v0 = vsel %vm520_vm1, %v3216_v63, 0.0  ;;  %789 = vrot.lane.b32.xlu0 %v3432_v28, %s3245_s30 }
 0x3ff   : > { %759 = vadd.xlane.f32.xlu2 %v758_v0  ;;  %v990_v0 = vld [vmem:[%s4822_s7 + $0x50] sm:$0xff] }
 0x417   : > { %659 = vrot.lane.b32.xlu2 %v3411_v25, %s3237_s27 }
 0x41f   : > { %795 = vrot.lane.b32.xlu2 %v3411_v25, %s3245_s30 }
 0x427   : > { %793 = vrot.lane.b32.xlu2 %v3418_v26, %s3245_s30 }
 0x42f   : > { %895 = vrot.lane.b32.xlu2 %v3432_v28, %s3243_s16 }
 0x435   : > { %v860_v1 = vpop.xlane.xlu0 %859 }
 0x436   : > { %v861_v2 = vsub.f32 %v857_v58, %v860_v1  ;;  %v1006_v1 = vld [vmem:[%s4822_s7 + $0xd0] sm:$0xff] }
 0x438   : > { %v862_v3 = vmul.f32 1.442695, %v861_v2  ;;  %v1022_v2 = vld [vmem:[%s4822_s7 + $0x150] sm:$0xff] }
 0x43a   : > { %3217 = vpow2.f32 %v862_v3  ;;  %v1038_v3 = vld [vmem:[%s4822_s7 + $0x1d0] sm:$0xff] }
 0x440   : > { %v3218_v4 = vpop.eup %3217 }
 0x441   : > { %v864_v5 = vsel %vm520_vm1, %v3218_v4, 0.0 }
 0x442   : > { %865 = vadd.xlane.f32.xlu1 %v864_v5  ;;  %v989_v5 = vld [vmem:[%s4822_s7 + $0x48] sm:$0xff] }
 0x448   : > { %v764_v6 = vpop.permute.xlu0 %763 }
 0x449   : > { %784 = vmatpush.msrb.mxu2 %v764_v6  ;;  %v1005_v6 = vld [vmem:[%s4822_s7 + $0xc8] sm:$0xff] }
 0x450   : > { %v658_v11 = vpop.permute.xlu0 %657 }
 0x458   : > { %v902_v14 = vpop.permute.xlu0 %901 }
 0x459   : > { %2901 = vmatpush.xpose.msk.msrb.mxu3 %vm520_vm1, %v902_v14 }
 0x45b   : > { %869 = vrot.lane.b32.xlu1 %v3390_v15, %s3247_s15 }
 0x460   : > { %v900_v15 = vpop.permute.xlu0 %899 }
 0x461   : > { %2902 = vmatpush.xpose.msk.msrb.mxu3 %vm520_vm1, %v900_v15  ;;  %v1020_v15 = vld [vmem:[%s4822_s7 + $0x140] sm:$0xff] }
 0x463   : > { %655 = vrot.lane.b32.xlu1 %v3425_v27, %s3237_s27 }
 0x468   : > { %v898_v20 = vpop.permute.xlu0 %897 }
 0x469   : > { %2903 = vmatpush.xpose.msk.msrb.mxu3 %vm520_vm1, %v898_v20 }
 0x46b   : > { %653 = vrot.lane.b32.xlu1 %v3432_v28, %s3237_s27  ;;  %s435_s27 = scalar_lea.vmem %s4828_s13, %s2859_s17 }
 0x470   : > { %v790_v26 = vpop.permute.xlu0 %789 }
 0x472   : > { %v760_v7 = vpop.xlane.xlu2 %759 }
 0x473   : > { %3219 = vrcp.f32 %v760_v7  ;;  %791 = vrot.lane.b32.xlu1 %v3425_v27, %s3245_s30  ;;  %v1021_v7 = vld [vmem:[%s4822_s7 + $0x148] sm:$0xff] }
 0x479   : > { %v3220_v8 = vpop.eup %3219 }
 0x47a   : > { %v762_v9 = vmul.f32 %v3220_v8, %v3216_v63  ;;  %v660_v10 = vpop.permute.xlu2 %659  ;;  %v1037_v8 = vld [vmem:[%s4822_s7 + $0x1c8] sm:$0xff] }
 0x47b   : > { %2880 = vmatpush.xpose.msk.msrb.mxu1 %vm520_vm1, %v660_v10 }
 0x47c   : > { %2892 = vmatmul.msk.f32.vlgmr.msrb.gmra.mxu2 %vm520_vm1, %v762_v9 }
 0x47f   : > { %2881 = vmatpush.xpose.msk.msrb.mxu1 %vm520_vm1, %v658_v11  ;;  %v988_v11 = vld [vmem:[%s4822_s7 + $0x40] sm:$0xff] }
 0x482   : > { %v796_v19 = vpop.permute.xlu2 %795 }
 0x48a   : > { %v794_v22 = vpop.permute.xlu2 %793 }
 0x492   : > { %v896_v24 = vpop.permute.xlu2 %895 }
 0x493   : > { %2904 = vmatpush.xpose.msk.msrb.mxu3 %vm520_vm1, %v896_v24  ;;  %v1002_v24 = vld [vmem:[%s4822_s7 + $0xb0] sm:$0xff] }
 0x497   : > { %2940 = vmatpush.xpose.msk.msra.mxu3 %vm453_vm0, %v1027_v42  ;;  %v1030_v42 = vld [vmem:[%s4822_s7 + $0x190] sm:$0xff] }
 0x49b   : > { %2941 = vmatpush.xpose.msk.msra.mxu3 %vm453_vm0, %v1026_v46  ;;  %v980_v46 = vld [vmem:[%s4822_s7] sm:$0xff] }
 0x49f   : > { %2942 = vmatpush.xpose.msk.msra.mxu3 %vm453_vm0, %v1025_v51  ;;  %v1075_v51 = vld [vmem:[%s4822_s7 + $0x2f8] sm:$0xff] }
 0x4b5   : > { %v866_v13 = vpop.xlane.xlu1 %865 }
 0x4b6   : > { %3221 = vrcp.f32 %v866_v13  ;;  %v1004_v13 = vld [vmem:[%s4822_s7 + $0xc0] sm:$0xff] }
 0x4b7   : > { %3223 = vrcp.f32 %v3248_v39  ;;  %v982_v39 = vld [vmem:[%s4822_s7 + $0x10] sm:$0xff] }
 0x4bc   : > { %v3222_v16 = vpop.eup %3221 }
 0x4bd   : > { %v868_v17 = vmul.f32 %v3222_v16, %v3218_v4  ;;  %v3224_v45 = vpop.eup %3223  ;;  %v1036_v16 = vld [vmem:[%s4822_s7 + $0x1c0] sm:$0xff] }
 0x4be   : > { %v947_v48 = vmul.f32 32.0, %v3224_v45  ;;  %vm951_vm2 = vweird.f32 %v3224_v45 }
 0x4c0   : > { %v948_v53 = vsub.f32 1.0, %v947_v48  ;;  %v1012_v48 = vld [vmem:[%s4822_s7 + $0x100] sm:$0xff] }
 0x4c2   : > { %v949_v58 = vmul.f32 %v3224_v45, %v948_v53  ;;  %v1107_v53 = vld [vmem:[%s4822_s7 + $0x3f8] sm:$0xff] }
 0x4c4   : > { %v950_v63 = vadd.f32 %v3224_v45, %v949_v58  ;;  %v1057_v58 = vld [vmem:[%s4822_s7 + $0x268] sm:$0xff] }
 0x4c6   : > { %v3603_v4 = vsel %vm951_vm2, %v3224_v45, %v950_v63  ;;  %v1029_v45 = vld [vmem:[%s4822_s7 + $0x188] sm:$0xff]  ;;  %v1072_v63 = vld [vmem:[%s4822_s7 + $0x2e0] sm:$0xff] }
 0x4cd   : > { %v870_v18 = vpop.permute.xlu1 %869 }
 0x4ce   : > { %890 = vmatpush.msra.mxu2 %v870_v18  ;;  %v987_v18 = vld [vmem:[%s4822_s7 + $0x38] sm:$0xff] }
 0x4cf   : > { %2900 = vmatmul.msk.f32.vlgmr.msra.gmra.mxu2 %vm520_vm1, %v868_v17 }
 0x4d0   : > { %2906 = vmatpush.xpose.msk.msrb.mxu2 %vm453_vm0, %v995_v40  ;;  %v998_v40 = vld [vmem:[%s4822_s7 + $0x90] sm:$0xff] }
 0x4d4   : > { %2907 = vmatpush.xpose.msk.msrb.mxu2 %vm453_vm0, %v994_v43  ;;  %v997_v43 = vld [vmem:[%s4822_s7 + $0x88] sm:$0xff] }
 0x4d5   : > { %v656_v21 = vpop.permute.xlu1 %655 }
 0x4d6   : > { %2882 = vmatpush.xpose.msk.msrb.mxu1 %vm520_vm1, %v656_v21  ;;  %v1019_v21 = vld [vmem:[%s4822_s7 + $0x138] sm:$0xff] }
 0x4d8   : > { %2908 = vmatpush.xpose.msk.msrb.mxu2 %vm453_vm0, %v993_v49  ;;  %v1028_v49 = vld [vmem:[%s4822_s7 + $0x180] sm:$0xff] }
 0x4dc   : > { %2909 = vmatpush.xpose.msk.msrb.mxu2 %vm453_vm0, %v992_v54  ;;  %v1058_v54 = vld [vmem:[%s4822_s7 + $0x270] sm:$0xff] }
 0x4dd   : > { %v654_v23 = vpop.permute.xlu1 %653 }
 0x4de   : > { %2883 = vmatpush.xpose.msk.msrb.mxu1 %vm520_vm1, %v654_v23  ;;  %v986_v23 = vld [vmem:[%s4822_s7 + $0x30] sm:$0xff] }
 0x4e0   : > { %2910 = vmatpush.xpose.msk.msrb.mxu2 %vm453_vm0, %v991_v59  ;;  %v1073_v59 = vld [vmem:[%s4822_s7 + $0x2e8] sm:$0xff] }
 0x4e1   : > { %2884 = vmatmul.msk.f32.vlgmr.msrb.gmra.mxu1 %vm520_vm1, %v3448_v52  ;;  %v1041_v52 = vld [vmem:[%s4822_s7 + $0x1e8] sm:$0xff] }
 0x4e2   : > { %2893 = vmatpush.xpose.msk.msra.mxu1 %vm520_vm1, %v796_v19  ;;  %v1003_v19 = vld [vmem:[%s4822_s7 + $0xb8] sm:$0xff] }
 0x4e4   : > { %2911 = vmatpush.xpose.msk.msrb.mxu2 %vm453_vm0, %v990_v0  ;;  %v1088_v0 = vld [vmem:[%s4822_s7 + $0x360] sm:$0xff] }
 0x4e5   : > { %v792_v25 = vpop.permute.xlu1 %791 }
 0x4e6   : > { %2894 = vmatpush.xpose.msk.msra.mxu1 %vm520_vm1, %v794_v22  ;;  %v1035_v22 = vld [vmem:[%s4822_s7 + $0x1b8] sm:$0xff] }
 0x4e8   : > { %2912 = vmatpush.xpose.msk.msrb.mxu2 %vm453_vm0, %v989_v5  ;;  %v1087_v5 = vld [vmem:[%s4822_s7 + $0x358] sm:$0xff] }
 0x4ea   : > { %2895 = vmatpush.xpose.msk.msra.mxu1 %vm520_vm1, %v792_v25  ;;  %v1018_v25 = vld [vmem:[%s4822_s7 + $0x130] sm:$0xff] }
 0x4ec   : > { %2913 = vmatpush.xpose.msk.msrb.mxu2 %vm453_vm0, %v988_v11  ;;  %v1053_v11 = vld [vmem:[%s4822_s7 + $0x248] sm:$0xff] }
 0x4ee   : > { %2896 = vmatpush.xpose.msk.msra.mxu1 %vm520_vm1, %v790_v26  ;;  %v1034_v26 = vld [vmem:[%s4822_s7 + $0x1b0] sm:$0xff] }
 0x4f0   : > { %2914 = vmatpush.xpose.msk.msrb.mxu2 %vm453_vm0, %v987_v18  ;;  %v1068_v18 = vld [vmem:[%s4822_s7 + $0x2c0] sm:$0xff] }
 0x4f2   : > { %2923 = vmatpush.xpose.msk.msrb.mxu1 %vm453_vm0, %v1011_v41  ;;  %v1014_v41 = vld [vmem:[%s4822_s7 + $0x110] sm:$0xff] }
 0x4f4   : > { %2915 = vmatpush.xpose.msk.msrb.mxu2 %vm453_vm0, %v986_v23  ;;  %v1083_v23 = vld [vmem:[%s4822_s7 + $0x338] sm:$0xff] }
 0x4f6   : > { %2924 = vmatpush.xpose.msk.msrb.mxu1 %vm453_vm0, %v1010_v44  ;;  %v1013_v44 = vld [vmem:[%s4822_s7 + $0x108] sm:$0xff] }
 0x4fa   : > { %2925 = vmatpush.xpose.msk.msrb.mxu1 %vm453_vm0, %v1009_v50  ;;  %v1059_v50 = vld [vmem:[%s4822_s7 + $0x278] sm:$0xff] }
 0x4fe   : > { %2926 = vmatpush.xpose.msk.msrb.mxu1 %vm453_vm0, %v1008_v55  ;;  %v1074_v55 = vld [vmem:[%s4822_s7 + $0x2f0] sm:$0xff] }
 0x4ff   : > { %v786_v27 = vpop.f32.mrf.mxu2 }
 0x500   : > { %2897 = vmatmul.msk.f32.vlgmr.msra.gmra.mxu1 %vm520_vm1, %v786_v27  ;;  %v985_v27 = vld [vmem:[%s4822_s7 + $0x28] sm:$0xff] }
 0x501   : > { %2916 = vmatpush.xpose.msk.msrb.mxu2 %vm453_vm0, %v985_v27  ;;  %v1082_v27 = vld [vmem:[%s4822_s7 + $0x330] sm:$0xff] }
 0x502   : > { %2927 = vmatpush.xpose.msk.msrb.mxu1 %vm453_vm0, %v1007_v60  ;;  %v1089_v60 = vld [vmem:[%s4822_s7 + $0x368] sm:$0xff] }
 0x506   : > { %2928 = vmatpush.xpose.msk.msrb.mxu1 %vm453_vm0, %v1006_v1  ;;  %v1104_v1 = vld [vmem:[%s4822_s7 + $0x3e0] sm:$0xff] }
 0x50a   : > { %2929 = vmatpush.xpose.msk.msrb.mxu1 %vm453_vm0, %v1005_v6  ;;  %v1103_v6 = vld [vmem:[%s4822_s7 + $0x3d8] sm:$0xff] }
 0x50e   : > { %2930 = vmatpush.xpose.msk.msrb.mxu1 %vm453_vm0, %v1004_v13  ;;  %v1069_v13 = vld [vmem:[%s4822_s7 + $0x2c8] sm:$0xff] }
 0x512   : > { %2931 = vmatpush.xpose.msk.msrb.mxu1 %vm453_vm0, %v1003_v19  ;;  %v1084_v19 = vld [vmem:[%s4822_s7 + $0x340] sm:$0xff] }
 0x516   : > { %2932 = vmatpush.xpose.msk.msrb.mxu1 %vm453_vm0, %v1002_v24  ;;  %v1099_v24 = vld [vmem:[%s4822_s7 + $0x3b8] sm:$0xff] }
 0x552   : > { %v892_v28 = vpop.f32.mrf.mxu2 }
 0x553   : > { %2905 = vmatmul.msk.f32.vlgmr.msrb.gmra.mxu3 %vm520_vm1, %v892_v28  ;;  %v1001_v28 = vld [vmem:[%s4822_s7 + $0xa8] sm:$0xff] }
 0x554   : > { %2933 = vmatpush.xpose.msk.msrb.mxu1 %vm453_vm0, %v1001_v28  ;;  %v1098_v28 = vld [vmem:[%s4822_s7 + $0x3b0] sm:$0xff] }
 0x55e   : > { %v689_v29 = vpop.f32.mrf.mxu1 }
 0x55f   : > { %v721_v31 = vadd.f32 %v3451_v56, %v689_v29  ;;  %v1024_v56 = vld [vmem:[%s4822_s7 + $0x160] sm:$0xff]  ;;  %v1017_v29 = vld [vmem:[%s4822_s7 + $0x128] sm:$0xff] }
 0x560   : > { %2943 = vmatpush.xpose.msk.msra.mxu3 %vm453_vm0, %v1024_v56  ;;  %v1090_v56 = vld [vmem:[%s4822_s7 + $0x370] sm:$0xff] }
 0x564   : > { %2944 = vmatpush.xpose.msk.msra.mxu3 %vm453_vm0, %v1023_v61  ;;  %v1105_v61 = vld [vmem:[%s4822_s7 + $0x3e8] sm:$0xff] }
 0x568   : > { %2945 = vmatpush.xpose.msk.msra.mxu3 %vm453_vm0, %v1022_v2  ;;  %v1055_v2 = vld [vmem:[%s4822_s7 + $0x258] sm:$0xff] }
 0x56c   : > { %2946 = vmatpush.xpose.msk.msra.mxu3 %vm453_vm0, %v1021_v7  ;;  %v1054_v7 = vld [vmem:[%s4822_s7 + $0x250] sm:$0xff] }
 0x570   : > { %2947 = vmatpush.xpose.msk.msra.mxu3 %vm453_vm0, %v1020_v15  ;;  %v1085_v15 = vld [vmem:[%s4822_s7 + $0x348] sm:$0xff] }
 0x574   : > { %2948 = vmatpush.xpose.msk.msra.mxu3 %vm453_vm0, %v1019_v21  ;;  %v1051_v21 = vld [vmem:[%s4822_s7 + $0x238] sm:$0xff] }
 0x578   : > { %2949 = vmatpush.xpose.msk.msra.mxu3 %vm453_vm0, %v1018_v25  ;;  %v1050_v25 = vld [vmem:[%s4822_s7 + $0x230] sm:$0xff] }
 0x57c   : > { %2950 = vmatpush.xpose.msk.msra.mxu3 %vm453_vm0, %v1017_v29  ;;  %v1049_v29 = vld [vmem:[%s4822_s7 + $0x228] sm:$0xff] }
 0x57d   : > { %v825_v30 = vpop.f32.mrf.mxu1 }
 0x57e   : > { %v828_v32 = vadd.f32 %v825_v30, %v721_v31  ;;  %v1033_v30 = vld [vmem:[%s4822_s7 + $0x1a8] sm:$0xff]  ;;  %v984_v31 = vld [vmem:[%s4822_s7 + $0x20] sm:$0xff] }
 0x57f   : > { %2917 = vmatpush.xpose.msk.msrb.mxu2 %vm453_vm0, %v984_v31  ;;  %v1081_v31 = vld [vmem:[%s4822_s7 + $0x328] sm:$0xff] }
 0x5d6   : > { %v931_v34 = vpop.f32.mrf.mxu3 }
 0x5d7   : > { %v934_v35 = vadd.f32 %v931_v34, %v828_v32  ;;  %v1000_v32 = vld [vmem:[%s4822_s7 + $0xa0] sm:$0xff] }
 0x5d8   : > { %v1032_v34 = vld [vmem:[%s4822_s7 + $0x1a0] sm:$0xff]  ;;  %2934 = vmatpush.xpose.msk.msrb.mxu1 %vm453_vm0, %v1000_v32  ;;  %v1097_v32 = vld [vmem:[%s4822_s7 + $0x3a8] sm:$0xff] }
 0x5d9   : > { %v939_v36 = vadd.f32 %v3201_v33, %v934_v35  ;;  %v1016_v33 = vld [vmem:[%s4822_s7 + $0x120] sm:$0xff]  ;;  %v983_v35 = vld [vmem:[%s4822_s7 + $0x18] sm:$0xff] }
 0x5da   : > { %2951 = vmatpush.xpose.msk.msra.mxu3 %vm453_vm0, %v1016_v33  ;;  %2918 = vmatpush.xpose.msk.msrb.mxu2 %vm453_vm0, %v983_v35  ;;  %v1048_v33 = vld [vmem:[%s4822_s7 + $0x220] sm:$0xff] }
 0x5db   : > { %v3505_v37 = vadd.f32 %v939_v36, %v3383_v12  ;;  %v1043_v12 = vld [vmem:[%s4822_s7 + $0x1f8] sm:$0xff]  ;;  %v1080_v35 = vld [vmem:[%s4822_s7 + $0x320] sm:$0xff] }
 0x5dc   : > { %2957 = vmatpush.xpose.msk.msrb.mxu0 %vm453_vm0, %v1043_v12  ;;  %v999_v36 = vld [vmem:[%s4822_s7 + $0x98] sm:$0xff]  ;;  %v981_v12 = vld [vmem:[%s4822_s7 + $0x8] sm:$0xff] }
 0x5dd   : > { %v943_v38 = vsel %vm453_vm0, %v3505_v37, 0.0  ;;  %2935 = vmatpush.xpose.msk.msrb.mxu1 %vm453_vm0, %v999_v36  ;;  %v1096_v36 = vld [vmem:[%s4822_s7 + $0x3a0] sm:$0xff] }
 0x5de   : > { %944 = vadd.xlane.f32.xlu1 %v943_v38  ;;  %v1031_v38 = vld [vmem:[%s4822_s7 + $0x198] sm:$0xff]  ;;  %2919 = vmatpush.xpose.msk.msrb.mxu2 %vm453_vm0, %v982_v39 }
 0x5df   : > { %v1079_v39 = vld [vmem:[%s4822_s7 + $0x318] sm:$0xff] }
 0x5e0   : > { %2958 = vmatpush.xpose.msk.msrb.mxu0 %vm453_vm0, %v1042_v47  ;;  %v996_v47 = vld [vmem:[%s4822_s7 + $0x80] sm:$0xff] }
 0x5e1   : > { %2936 = vmatpush.xpose.msk.msrb.mxu1 %vm453_vm0, %v998_v40  ;;  %v1095_v40 = vld [vmem:[%s4822_s7 + $0x398] sm:$0xff] }
 0x5e2   : > { %2920 = vmatpush.xpose.msk.msrb.mxu2 %vm453_vm0, %v981_v12  ;;  %v1078_v12 = vld [vmem:[%s4822_s7 + $0x310] sm:$0xff] }
 0x5e4   : > { %2959 = vmatpush.xpose.msk.msrb.mxu0 %vm453_vm0, %v1041_v52  ;;  %v1091_v52 = vld [vmem:[%s4822_s7 + $0x378] sm:$0xff] }
 0x5e5   : > { %2937 = vmatpush.xpose.msk.msrb.mxu1 %vm453_vm0, %v997_v43  ;;  %v1094_v43 = vld [vmem:[%s4822_s7 + $0x390] sm:$0xff] }
 0x5e6   : > { %2921 = vmatpush.xpose.msk.msrb.mxu2 %vm453_vm0, %v980_v46  ;;  %v1077_v46 = vld [vmem:[%s4822_s7 + $0x308] sm:$0xff] }
 0x5e8   : > { %2960 = vmatpush.xpose.msk.msrb.mxu0 %vm453_vm0, %v1040_v57  ;;  %v1106_v57 = vld [vmem:[%s4822_s7 + $0x3f0] sm:$0xff] }
 0x5e9   : > { %2938 = vmatpush.xpose.msk.msrb.mxu1 %vm453_vm0, %v996_v47  ;;  %v1093_v47 = vld [vmem:[%s4822_s7 + $0x388] sm:$0xff] }
 0x5ea   : > { %2974 = vmatpush.xpose.msk.msra.mxu2 %vm453_vm0, %v1059_v50  ;;  %v1076_v50 = vld [vmem:[%s4822_s7 + $0x300] sm:$0xff] }
 0x5ec   : > { %2961 = vmatpush.xpose.msk.msrb.mxu0 %vm453_vm0, %v1039_v62  ;;  %v1056_v62 = vld [vmem:[%s4822_s7 + $0x260] sm:$0xff] }
 0x5ed   : > { %2991 = vmatpush.xpose.msk.msra.mxu1 %vm453_vm0, %v1075_v51  ;;  %v1092_v51 = vld [vmem:[%s4822_s7 + $0x380] sm:$0xff] }
 0x5ee   : > { %2975 = vmatpush.xpose.msk.msra.mxu2 %vm453_vm0, %v1058_v54 }
 0x5f0   : > { %2962 = vmatpush.xpose.msk.msrb.mxu0 %vm453_vm0, %v1038_v3  ;;  %v1071_v3 = vld [vmem:[%s4822_s7 + $0x2d8] sm:$0xff] }
 0x5f1   : > { %2992 = vmatpush.xpose.msk.msra.mxu1 %vm453_vm0, %v1074_v55 }
 0x5f2   : > { %2976 = vmatpush.xpose.msk.msra.mxu2 %vm453_vm0, %v1057_v58 }
 0x5f4   : > { %2963 = vmatpush.xpose.msk.msrb.mxu0 %vm453_vm0, %v1037_v8  ;;  %v1070_v8 = vld [vmem:[%s4822_s7 + $0x2d0] sm:$0xff] }
 0x5f5   : > { %2993 = vmatpush.xpose.msk.msra.mxu1 %vm453_vm0, %v1073_v59 }
 0x5f6   : > { %2977 = vmatpush.xpose.msk.msra.mxu2 %vm453_vm0, %v1056_v62 }
 0x5f8   : > { %2964 = vmatpush.xpose.msk.msrb.mxu0 %vm453_vm0, %v1036_v16  ;;  %v1101_v16 = vld [vmem:[%s4822_s7 + $0x3c8] sm:$0xff] }
 0x5f9   : > { %2994 = vmatpush.xpose.msk.msra.mxu1 %vm453_vm0, %v1072_v63  ;;  %v3203_v63 = vld [vmem:[%s4821_s6] ss:$0 sm:$0xff] }
 0x5fa   : > { %2978 = vmatpush.xpose.msk.msra.mxu2 %vm453_vm0, %v1055_v2 }
 0x5fc   : > { %2965 = vmatpush.xpose.msk.msrb.mxu0 %vm453_vm0, %v1035_v22  ;;  %v1067_v22 = vld [vmem:[%s4822_s7 + $0x2b8] sm:$0xff] }
 0x5fd   : > { %2995 = vmatpush.xpose.msk.msra.mxu1 %vm453_vm0, %v1071_v3  ;;  %v1123_v3 = vld [vmem:[%s4822_s7 + $0x478] sm:$0xff] }
 0x5fe   : > { %2979 = vmatpush.xpose.msk.msra.mxu2 %vm453_vm0, %v1054_v7  ;;  %v1122_v7 = vld [vmem:[%s4822_s7 + $0x470] sm:$0xff] }
 0x600   : > { %2966 = vmatpush.xpose.msk.msrb.mxu0 %vm453_vm0, %v1034_v26  ;;  %v1066_v26 = vld [vmem:[%s4822_s7 + $0x2b0] sm:$0xff] }
 0x601   : > { %2996 = vmatpush.xpose.msk.msra.mxu1 %vm453_vm0, %v1070_v8  ;;  %v1138_v8 = vld [vmem:[%s4822_s7 + $0x4f0] sm:$0xff] }
 0x602   : > { %2980 = vmatpush.xpose.msk.msra.mxu2 %vm453_vm0, %v1053_v11  ;;  %v1121_v11 = vld [vmem:[%s4822_s7 + $0x468] sm:$0xff] }
 0x604   : > { %2967 = vmatpush.xpose.msk.msrb.mxu0 %vm453_vm0, %v1033_v30  ;;  %v1065_v30 = vld [vmem:[%s4822_s7 + $0x2a8] sm:$0xff] }
 0x605   : > { %2997 = vmatpush.xpose.msk.msra.mxu1 %vm453_vm0, %v1069_v13  ;;  %v1137_v13 = vld [vmem:[%s4822_s7 + $0x4e8] sm:$0xff] }
 0x608   : > { %2968 = vmatpush.xpose.msk.msrb.mxu0 %vm453_vm0, %v1032_v34  ;;  %v1064_v34 = vld [vmem:[%s4822_s7 + $0x2a0] sm:$0xff] }
 0x609   : > { %2998 = vmatpush.xpose.msk.msra.mxu1 %vm453_vm0, %v1068_v18  ;;  %v1136_v18 = vld [vmem:[%s4822_s7 + $0x4e0] sm:$0xff] }
 0x60c   : > { %2969 = vmatpush.xpose.msk.msrb.mxu0 %vm453_vm0, %v1031_v38  ;;  %v1063_v38 = vld [vmem:[%s4822_s7 + $0x298] sm:$0xff] }
 0x60d   : > { %2999 = vmatpush.xpose.msk.msra.mxu1 %vm453_vm0, %v1067_v22  ;;  %v1135_v22 = vld [vmem:[%s4822_s7 + $0x4d8] sm:$0xff] }
 0x610   : > { %2970 = vmatpush.xpose.msk.msrb.mxu0 %vm453_vm0, %v1030_v42  ;;  %v1062_v42 = vld [vmem:[%s4822_s7 + $0x290] sm:$0xff] }
 0x611   : > { %3000 = vmatpush.xpose.msk.msra.mxu1 %vm453_vm0, %v1066_v26  ;;  %v1134_v26 = vld [vmem:[%s4822_s7 + $0x4d0] sm:$0xff] }
 0x614   : > { %2971 = vmatpush.xpose.msk.msrb.mxu0 %vm453_vm0, %v1029_v45  ;;  %v1061_v45 = vld [vmem:[%s4822_s7 + $0x288] sm:$0xff] }
 0x615   : > { %3001 = vmatpush.xpose.msk.msra.mxu1 %vm453_vm0, %v1065_v30  ;;  %v1133_v30 = vld [vmem:[%s4822_s7 + $0x4c8] sm:$0xff] }
 0x618   : > { %2972 = vmatpush.xpose.msk.msrb.mxu0 %vm453_vm0, %v1028_v49  ;;  %v1060_v49 = vld [vmem:[%s4822_s7 + $0x280] sm:$0xff] }
 0x619   : > { %3002 = vmatpush.xpose.msk.msra.mxu1 %vm453_vm0, %v1064_v34  ;;  %v1132_v34 = vld [vmem:[%s4822_s7 + $0x4c0] sm:$0xff] }
 0x61c   : > { %3025 = vmatpush.xpose.msk.msra.mxu0 %vm453_vm0, %v1107_v53 }
 0x61d   : > { %3003 = vmatpush.xpose.msk.msra.mxu1 %vm453_vm0, %v1063_v38  ;;  %v1131_v38 = vld [vmem:[%s4822_s7 + $0x4b8] sm:$0xff] }
 0x620   : > { %3026 = vmatpush.xpose.msk.msra.mxu0 %vm453_vm0, %v1106_v57 }
 0x621   : > { %3004 = vmatpush.xpose.msk.msra.mxu1 %vm453_vm0, %v1062_v42  ;;  %v1130_v42 = vld [vmem:[%s4822_s7 + $0x4b0] sm:$0xff] }
 0x624   : > { %3027 = vmatpush.xpose.msk.msra.mxu0 %vm453_vm0, %v1105_v61  ;;  %v3202_v61 = vld [vmem:[%s4820_s5] ss:$0 sm:$0xff] }
 0x625   : > { %3005 = vmatpush.xpose.msk.msra.mxu1 %vm453_vm0, %v1061_v45  ;;  %v1129_v45 = vld [vmem:[%s4822_s7 + $0x4a8] sm:$0xff] }
 0x628   : > { %3028 = vmatpush.xpose.msk.msra.mxu0 %vm453_vm0, %v1104_v1 }
 0x629   : > { %3006 = vmatpush.xpose.msk.msra.mxu1 %vm453_vm0, %v1060_v49  ;;  %v1128_v49 = vld [vmem:[%s4822_s7 + $0x4a0] sm:$0xff] }
 0x62c   : > { %3029 = vmatpush.xpose.msk.msra.mxu0 %vm453_vm0, %v1103_v6  ;;  %v1171_v6 = vld [vmem:[%s4822_s7 + $0x5f8] sm:$0xff] }
 0x651   : > { %v945_v9 = vpop.xlane.xlu1 %944 }
 0x652   : > { %v953_v10 = vmul.f32 %v3603_v4, %v945_v9  ;;  %v1086_v9 = vld [vmem:[%s4822_s7 + $0x350] sm:$0xff] }
 0x654   : > { %v3631_v14 = vsub.f32 %v3505_v37, %v953_v10  ;;  %v1015_v37 = vld [vmem:[%s4822_s7 + $0x118] sm:$0xff]  ;;  %v1102_v10 = vld [vmem:[%s4822_s7 + $0x3d0] sm:$0xff] }
 0x655   : > { %2952 = vmatpush.xpose.msk.msra.mxu3 %vm453_vm0, %v1015_v37  ;;  %3030 = vmatpush.xpose.msk.msra.mxu0 %vm453_vm0, %v1102_v10  ;;  %v1047_v37 = vld [vmem:[%s4822_s7 + $0x218] sm:$0xff]  ;;  %v1170_v10 = vld [vmem:[%s4822_s7 + $0x5f0] sm:$0xff] }
 0x656   : > { %v955_v17 = vmul.f32 %v3631_v14, %v3631_v14 }
 0x658   : > { %v956_v20 = vsel %vm453_vm0, %v955_v17, 0.0  ;;  %v1052_v17 = vld [vmem:[%s4822_s7 + $0x240] sm:$0xff] }
 0x659   : > { %957 = vadd.xlane.f32.xlu2 %v956_v20  ;;  %2953 = vmatpush.xpose.msk.msra.mxu3 %vm453_vm0, %v1014_v41  ;;  %v1100_v20 = vld [vmem:[%s4822_s7 + $0x3c0] sm:$0xff]  ;;  %v1046_v41 = vld [vmem:[%s4822_s7 + $0x210] sm:$0xff] }
 0x65a   : > { %3031 = vmatpush.xpose.msk.msra.mxu0 %vm453_vm0, %v1101_v16  ;;  %2981 = vmatpush.xpose.msk.msra.mxu2 %vm453_vm0, %v1052_v17  ;;  %v1169_v16 = vld [vmem:[%s4822_s7 + $0x5e8] sm:$0xff]  ;;  %v1120_v17 = vld [vmem:[%s4822_s7 + $0x460] sm:$0xff] }
 0x65d   : > { %2954 = vmatpush.xpose.msk.msra.mxu3 %vm453_vm0, %v1013_v44  ;;  %v1045_v44 = vld [vmem:[%s4822_s7 + $0x208] sm:$0xff] }
 0x65e   : > { %3032 = vmatpush.xpose.msk.msra.mxu0 %vm453_vm0, %v1100_v20  ;;  %2982 = vmatpush.xpose.msk.msra.mxu2 %vm453_vm0, %v1051_v21  ;;  %v1168_v20 = vld [vmem:[%s4822_s7 + $0x5e0] sm:$0xff]  ;;  %v1119_v21 = vld [vmem:[%s4822_s7 + $0x458] sm:$0xff] }
 0x661   : > { %2955 = vmatpush.xpose.msk.msra.mxu3 %vm453_vm0, %v1012_v48  ;;  %v1044_v48 = vld [vmem:[%s4822_s7 + $0x200] sm:$0xff] }
 0x662   : > { %3033 = vmatpush.xpose.msk.msra.mxu0 %vm453_vm0, %v1099_v24  ;;  %2983 = vmatpush.xpose.msk.msra.mxu2 %vm453_vm0, %v1050_v25  ;;  %v1167_v24 = vld [vmem:[%s4822_s7 + $0x5d8] sm:$0xff]  ;;  %v1118_v25 = vld [vmem:[%s4822_s7 + $0x450] sm:$0xff] }
 0x665   : > { %3008 = vmatpush.xpose.msk.msrb.mxu3 %vm453_vm0, %v1091_v52 }
 0x666   : > { %3034 = vmatpush.xpose.msk.msra.mxu0 %vm453_vm0, %v1098_v28  ;;  %2984 = vmatpush.xpose.msk.msra.mxu2 %vm453_vm0, %v1049_v29  ;;  %v1166_v28 = vld [vmem:[%s4822_s7 + $0x5d0] sm:$0xff]  ;;  %v1117_v29 = vld [vmem:[%s4822_s7 + $0x448] sm:$0xff] }
 0x669   : > { %3009 = vmatpush.xpose.msk.msrb.mxu3 %vm453_vm0, %v1090_v56 }
 0x66a   : > { %3035 = vmatpush.xpose.msk.msra.mxu0 %vm453_vm0, %v1097_v32  ;;  %2985 = vmatpush.xpose.msk.msra.mxu2 %vm453_vm0, %v1048_v33  ;;  %v1165_v32 = vld [vmem:[%s4822_s7 + $0x5c8] sm:$0xff]  ;;  %v1116_v33 = vld [vmem:[%s4822_s7 + $0x440] sm:$0xff] }
 0x66d   : > { %3010 = vmatpush.xpose.msk.msrb.mxu3 %vm453_vm0, %v1089_v60 }
 0x66e   : > { %3036 = vmatpush.xpose.msk.msra.mxu0 %vm453_vm0, %v1096_v36  ;;  %2986 = vmatpush.xpose.msk.msra.mxu2 %vm453_vm0, %v1047_v37  ;;  %v1164_v36 = vld [vmem:[%s4822_s7 + $0x5c0] sm:$0xff]  ;;  %v1115_v37 = vld [vmem:[%s4822_s7 + $0x438] sm:$0xff] }
 0x671   : > { %3011 = vmatpush.xpose.msk.msrb.mxu3 %vm453_vm0, %v1088_v0 }
 0x672   : > { %3037 = vmatpush.xpose.msk.msra.mxu0 %vm453_vm0, %v1095_v40  ;;  %2987 = vmatpush.xpose.msk.msra.mxu2 %vm453_vm0, %v1046_v41  ;;  %v1163_v40 = vld [vmem:[%s4822_s7 + $0x5b8] sm:$0xff]  ;;  %v1114_v41 = vld [vmem:[%s4822_s7 + $0x430] sm:$0xff] }
 0x675   : > { %3012 = vmatpush.xpose.msk.msrb.mxu3 %vm453_vm0, %v1087_v5  ;;  %v1139_v5 = vld [vmem:[%s4822_s7 + $0x4f8] sm:$0xff] }
 0x676   : > { %3038 = vmatpush.xpose.msk.msra.mxu0 %vm453_vm0, %v1094_v43  ;;  %2988 = vmatpush.xpose.msk.msra.mxu2 %vm453_vm0, %v1045_v44  ;;  %v1162_v43 = vld [vmem:[%s4822_s7 + $0x5b0] sm:$0xff]  ;;  %v1113_v44 = vld [vmem:[%s4822_s7 + $0x428] sm:$0xff] }
 0x679   : > { %3013 = vmatpush.xpose.msk.msrb.mxu3 %vm453_vm0, %v1086_v9  ;;  %v1154_v9 = vld [vmem:[%s4822_s7 + $0x570] sm:$0xff] }
 0x67a   : > { %3039 = vmatpush.xpose.msk.msra.mxu0 %vm453_vm0, %v1093_v47  ;;  %2989 = vmatpush.xpose.msk.msra.mxu2 %vm453_vm0, %v1044_v48  ;;  %v1161_v47 = vld [vmem:[%s4822_s7 + $0x5a8] sm:$0xff]  ;;  %v1112_v48 = vld [vmem:[%s4822_s7 + $0x420] sm:$0xff] }
 0x67d   : > { %3014 = vmatpush.xpose.msk.msrb.mxu3 %vm453_vm0, %v1085_v15  ;;  %v1153_v15 = vld [vmem:[%s4822_s7 + $0x568] sm:$0xff] }
 0x67e   : > { %3040 = vmatpush.xpose.msk.msra.mxu0 %vm453_vm0, %v1092_v51  ;;  %v1160_v51 = vld [vmem:[%s4822_s7 + $0x5a0] sm:$0xff] }
 0x681   : > { %3015 = vmatpush.xpose.msk.msrb.mxu3 %vm453_vm0, %v1084_v19  ;;  %v1152_v19 = vld [vmem:[%s4822_s7 + $0x560] sm:$0xff] }
 0x685   : > { %3016 = vmatpush.xpose.msk.msrb.mxu3 %vm453_vm0, %v1083_v23  ;;  %v1151_v23 = vld [vmem:[%s4822_s7 + $0x558] sm:$0xff] }
 0x689   : > { %3017 = vmatpush.xpose.msk.msrb.mxu3 %vm453_vm0, %v1082_v27  ;;  %v1150_v27 = vld [vmem:[%s4822_s7 + $0x550] sm:$0xff] }
 0x68d   : > { %3018 = vmatpush.xpose.msk.msrb.mxu3 %vm453_vm0, %v1081_v31  ;;  %v1149_v31 = vld [vmem:[%s4822_s7 + $0x548] sm:$0xff] }
 0x691   : > { %3019 = vmatpush.xpose.msk.msrb.mxu3 %vm453_vm0, %v1080_v35  ;;  %v1148_v35 = vld [vmem:[%s4822_s7 + $0x540] sm:$0xff] }
 0x695   : > { %3020 = vmatpush.xpose.msk.msrb.mxu3 %vm453_vm0, %v1079_v39  ;;  %v1147_v39 = vld [vmem:[%s4822_s7 + $0x538] sm:$0xff] }
 0x699   : > { %3021 = vmatpush.xpose.msk.msrb.mxu3 %vm453_vm0, %v1078_v12  ;;  %v1146_v12 = vld [vmem:[%s4822_s7 + $0x530] sm:$0xff] }
 0x69d   : > { %3022 = vmatpush.xpose.msk.msrb.mxu3 %vm453_vm0, %v1077_v46  ;;  %v1145_v46 = vld [vmem:[%s4822_s7 + $0x528] sm:$0xff] }
 0x6a1   : > { %3023 = vmatpush.xpose.msk.msrb.mxu3 %vm453_vm0, %v1076_v50  ;;  %v1144_v50 = vld [vmem:[%s4822_s7 + $0x520] sm:$0xff] }
 0x6cc   : > { %v958_v52 = vpop.xlane.xlu2 %957 }
 0x6cd   : > { %v959_v53 = vmul.f32 %v958_v52, %v3603_v4  ;;  %v1111_v52 = vld [vmem:[%s4822_s7 + $0x418] sm:$0xff] }
 0x6cf   : > { %v960_v54 = vadd.f32 1e-05, %v959_v53  ;;  %v1127_v53 = vld [vmem:[%s4822_s7 + $0x498] sm:$0xff] }
 0x6d1   : > { %3225 = vrsqrt.f32 %v960_v54  ;;  %vm967_vm4 = vweird.f32 %v960_v54 }
 0x6d7   : > { %v3226_v55 = vpop.eup %3225 }
 0x6d8   : > { %v962_v56 = vmul.f32 %v3226_v55, %v960_v54  ;;  %vm968_vm3 = vweird.f32 %v3226_v55  ;;  %v1143_v54 = vld [vmem:[%s4822_s7 + $0x518] sm:$0xff] }
 0x6d9   : > { %vm969_vm5 = vmor %vm967_vm4, %vm968_vm3 }
 0x6da   : > { %v963_v57 = vmul.f32 %v3226_v55, %v962_v56  ;;  %v1110_v56 = vld [vmem:[%s4822_s7 + $0x410] sm:$0xff] }
 0x6dc   : > { %v964_v58 = vmul.f32 0.5, %v963_v57  ;;  %v1126_v57 = vld [vmem:[%s4822_s7 + $0x490] sm:$0xff] }
 0x6de   : > { %v965_v59 = vsub.f32 1.5, %v964_v58  ;;  %v1142_v58 = vld [vmem:[%s4822_s7 + $0x510] sm:$0xff] }
 0x6e0   : > { %v966_v60 = vmul.f32 %v3226_v55, %v965_v59  ;;  %v1158_v59 = vld [vmem:[%s4822_s7 + $0x590] sm:$0xff] }
 0x6e2   : > { %v970_v62 = vsel %vm969_vm5, %v3226_v55, %v966_v60  ;;  %v1159_v55 = vld [vmem:[%s4822_s7 + $0x598] sm:$0xff]  ;;  %v1109_v60 = vld [vmem:[%s4822_s7 + $0x408] sm:$0xff] }
 0x6e3   : > { %v971_v0 = vmul.f32 %v970_v62, %v3631_v14  ;;  %v1155_v14 = vld [vmem:[%s4822_s7 + $0x578] sm:$0xff]  ;;  %v1141_v62 = vld [vmem:[%s4822_s7 + $0x508] sm:$0xff] }
 0x6e5   : > { %v975_v1 = vmul.f32 %v3202_v61, %v971_v0  ;;  %v1125_v61 = vld [vmem:[%s4822_s7 + $0x488] sm:$0xff]  ;;  %v1108_v0 = vld [vmem:[%s4822_s7 + $0x400] sm:$0xff] }
 0x6e7   : > { %v4038_v2 = vadd.f32 %v3203_v63, %v975_v1  ;;  %v1157_v63 = vld [vmem:[%s4822_s7 + $0x588] sm:$0xff]  ;;  %v1124_v1 = vld [vmem:[%s4822_s7 + $0x480] sm:$0xff] }
 0x6e9   : > { %2922 = vmatmul.msk.f32.vlgmr.msrb.gmra.mxu2 %vm453_vm0, %v4038_v2  ;;  %2939 = vmatmul.msk.f32.vlgmr.msrb.gmra.mxu1 %vm453_vm0, %v4038_v2 }
 0x6ea   : > { %2956 = vmatmul.msk.f32.vlgmr.msra.gmra.mxu3 %vm453_vm0, %v4038_v2  ;;  %2973 = vmatmul.msk.f32.vlgmr.msrb.gmra.mxu0 %vm453_vm0, %v4038_v2 }
 0x6eb   : > { %3042 = vmatpush.xpose.msk.msrb.mxu2 %vm453_vm0, %v1123_v3  ;;  %3059 = vmatpush.xpose.msk.msrb.mxu1 %vm453_vm0, %v1139_v5  ;;  %v1140_v3 = vld [vmem:[%s4822_s7 + $0x500] sm:$0xff] }
 0x6ec   : > { %3076 = vmatpush.xpose.msk.msra.mxu3 %vm453_vm0, %v1155_v14  ;;  %3093 = vmatpush.xpose.msk.msrb.mxu0 %vm453_vm0, %v1171_v6  ;;  %v1156_v5 = vld [vmem:[%s4822_s7 + $0x580] sm:$0xff]  ;;  %v1187_v14 = vld [vmem:[%s4822_s7 + $0x678] sm:$0xff] }
 0x6ed   : > { %v1203_v6 = vld [vmem:[%s4822_s7 + $0x6f8] sm:$0xff] }
 0x6ef   : > { %3043 = vmatpush.xpose.msk.msrb.mxu2 %vm453_vm0, %v1122_v7  ;;  %3060 = vmatpush.xpose.msk.msrb.mxu1 %vm453_vm0, %v1138_v8  ;;  %v1219_v7 = vld [vmem:[%s4822_s7 + $0x778] sm:$0xff] }
 0x6f0   : > { %3077 = vmatpush.xpose.msk.msra.mxu3 %vm453_vm0, %v1154_v9  ;;  %3094 = vmatpush.xpose.msk.msrb.mxu0 %vm453_vm0, %v1170_v10  ;;  %v1235_v8 = vld [vmem:[%s4822_s7 + $0x7f8] sm:$0xff]  ;;  %v1186_v9 = vld [vmem:[%s4822_s7 + $0x670] sm:$0xff] }
 0x6f1   : > { %2990 = vmatmul.msk.f32.vlgmr.msra.gmra.mxu2 %vm453_vm0, %v4038_v2  ;;  %3007 = vmatmul.msk.f32.vlgmr.msra.gmra.mxu1 %vm453_vm0, %v4038_v2  ;;  %v1202_v10 = vld [vmem:[%s4822_s7 + $0x6f0] sm:$0xff] }
 0x6f2   : > { %3024 = vmatmul.msk.f32.vlgmr.msrb.gmra.mxu3 %vm453_vm0, %v4038_v2  ;;  %3041 = vmatmul.msk.f32.vlgmr.msra.gmra.mxu0 %vm453_vm0, %v4038_v2 }
 0x6f3   : > { %3044 = vmatpush.xpose.msk.msrb.mxu2 %vm453_vm0, %v1121_v11  ;;  %3061 = vmatpush.xpose.msk.msrb.mxu1 %vm453_vm0, %v1137_v13  ;;  %v1218_v11 = vld [vmem:[%s4822_s7 + $0x770] sm:$0xff] }
 0x6f4   : > { %3078 = vmatpush.xpose.msk.msra.mxu3 %vm453_vm0, %v1153_v15  ;;  %3095 = vmatpush.xpose.msk.msrb.mxu0 %vm453_vm0, %v1169_v16  ;;  %v1234_v13 = vld [vmem:[%s4822_s7 + $0x7f0] sm:$0xff]  ;;  %v1185_v15 = vld [vmem:[%s4822_s7 + $0x668] sm:$0xff] }
 0x6f5   : > { %v1201_v16 = vld [vmem:[%s4822_s7 + $0x6e8] sm:$0xff] }
 0x6f7   : > { %3045 = vmatpush.xpose.msk.msrb.mxu2 %vm453_vm0, %v1120_v17  ;;  %3062 = vmatpush.xpose.msk.msrb.mxu1 %vm453_vm0, %v1136_v18  ;;  %v1217_v17 = vld [vmem:[%s4822_s7 + $0x768] sm:$0xff] }
 0x6f8   : > { %3079 = vmatpush.xpose.msk.msra.mxu3 %vm453_vm0, %v1152_v19  ;;  %3096 = vmatpush.xpose.msk.msrb.mxu0 %vm453_vm0, %v1168_v20  ;;  %v1233_v18 = vld [vmem:[%s4822_s7 + $0x7e8] sm:$0xff]  ;;  %v1184_v19 = vld [vmem:[%s4822_s7 + $0x660] sm:$0xff] }
 0x6f9   : > { %v1200_v20 = vld [vmem:[%s4822_s7 + $0x6e0] sm:$0xff] }
 0x6fb   : > { %3046 = vmatpush.xpose.msk.msrb.mxu2 %vm453_vm0, %v1119_v21  ;;  %3063 = vmatpush.xpose.msk.msrb.mxu1 %vm453_vm0, %v1135_v22  ;;  %v1216_v21 = vld [vmem:[%s4822_s7 + $0x760] sm:$0xff] }
 0x6fc   : > { %3080 = vmatpush.xpose.msk.msra.mxu3 %vm453_vm0, %v1151_v23  ;;  %3097 = vmatpush.xpose.msk.msrb.mxu0 %vm453_vm0, %v1167_v24  ;;  %v1232_v22 = vld [vmem:[%s4822_s7 + $0x7e0] sm:$0xff]  ;;  %v1183_v23 = vld [vmem:[%s4822_s7 + $0x658] sm:$0xff] }
 0x6fd   : > { %v1199_v24 = vld [vmem:[%s4822_s7 + $0x6d8] sm:$0xff] }
 0x6ff   : > { %3047 = vmatpush.xpose.msk.msrb.mxu2 %vm453_vm0, %v1118_v25  ;;  %3064 = vmatpush.xpose.msk.msrb.mxu1 %vm453_vm0, %v1134_v26  ;;  %v1215_v25 = vld [vmem:[%s4822_s7 + $0x758] sm:$0xff] }
 0x700   : > { %3081 = vmatpush.xpose.msk.msra.mxu3 %vm453_vm0, %v1150_v27  ;;  %3098 = vmatpush.xpose.msk.msrb.mxu0 %vm453_vm0, %v1166_v28  ;;  %v1231_v26 = vld [vmem:[%s4822_s7 + $0x7d8] sm:$0xff]  ;;  %v1182_v27 = vld [vmem:[%s4822_s7 + $0x650] sm:$0xff] }
 0x701   : > { %v1198_v28 = vld [vmem:[%s4822_s7 + $0x6d0] sm:$0xff] }
 0x703   : > { %3048 = vmatpush.xpose.msk.msrb.mxu2 %vm453_vm0, %v1117_v29  ;;  %3065 = vmatpush.xpose.msk.msrb.mxu1 %vm453_vm0, %v1133_v30  ;;  %v1214_v29 = vld [vmem:[%s4822_s7 + $0x750] sm:$0xff] }
 0x704   : > { %3082 = vmatpush.xpose.msk.msra.mxu3 %vm453_vm0, %v1149_v31  ;;  %3099 = vmatpush.xpose.msk.msrb.mxu0 %vm453_vm0, %v1165_v32  ;;  %v1230_v30 = vld [vmem:[%s4822_s7 + $0x7d0] sm:$0xff]  ;;  %v1181_v31 = vld [vmem:[%s4822_s7 + $0x648] sm:$0xff] }
 0x705   : > { %v1197_v32 = vld [vmem:[%s4822_s7 + $0x6c8] sm:$0xff] }
 0x707   : > { %3049 = vmatpush.xpose.msk.msrb.mxu2 %vm453_vm0, %v1116_v33  ;;  %3066 = vmatpush.xpose.msk.msrb.mxu1 %vm453_vm0, %v1132_v34  ;;  %v1213_v33 = vld [vmem:[%s4822_s7 + $0x748] sm:$0xff] }
 0x708   : > { %3083 = vmatpush.xpose.msk.msra.mxu3 %vm453_vm0, %v1148_v35  ;;  %3100 = vmatpush.xpose.msk.msrb.mxu0 %vm453_vm0, %v1164_v36  ;;  %v1229_v34 = vld [vmem:[%s4822_s7 + $0x7c8] sm:$0xff]  ;;  %v1180_v35 = vld [vmem:[%s4822_s7 + $0x640] sm:$0xff] }
 0x709   : > { %v1196_v36 = vld [vmem:[%s4822_s7 + $0x6c0] sm:$0xff] }
 0x70b   : > { %3050 = vmatpush.xpose.msk.msrb.mxu2 %vm453_vm0, %v1115_v37  ;;  %3067 = vmatpush.xpose.msk.msrb.mxu1 %vm453_vm0, %v1131_v38  ;;  %v1212_v37 = vld [vmem:[%s4822_s7 + $0x740] sm:$0xff] }
 0x70c   : > { %3084 = vmatpush.xpose.msk.msra.mxu3 %vm453_vm0, %v1147_v39  ;;  %3101 = vmatpush.xpose.msk.msrb.mxu0 %vm453_vm0, %v1163_v40  ;;  %v1228_v38 = vld [vmem:[%s4822_s7 + $0x7c0] sm:$0xff]  ;;  %v1179_v39 = vld [vmem:[%s4822_s7 + $0x638] sm:$0xff] }
 0x70d   : > { %v1195_v40 = vld [vmem:[%s4822_s7 + $0x6b8] sm:$0xff] }
 0x70f   : > { %3051 = vmatpush.xpose.msk.msrb.mxu2 %vm453_vm0, %v1114_v41  ;;  %3068 = vmatpush.xpose.msk.msrb.mxu1 %vm453_vm0, %v1130_v42  ;;  %v1211_v41 = vld [vmem:[%s4822_s7 + $0x738] sm:$0xff] }
 0x710   : > { %3085 = vmatpush.xpose.msk.msra.mxu3 %vm453_vm0, %v1146_v12  ;;  %3102 = vmatpush.xpose.msk.msrb.mxu0 %vm453_vm0, %v1162_v43  ;;  %v1227_v42 = vld [vmem:[%s4822_s7 + $0x7b8] sm:$0xff]  ;;  %v1178_v12 = vld [vmem:[%s4822_s7 + $0x630] sm:$0xff] }
 0x711   : > { %v1194_v43 = vld [vmem:[%s4822_s7 + $0x6b0] sm:$0xff] }
 0x713   : > { %3052 = vmatpush.xpose.msk.msrb.mxu2 %vm453_vm0, %v1113_v44  ;;  %3069 = vmatpush.xpose.msk.msrb.mxu1 %vm453_vm0, %v1129_v45  ;;  %v1210_v44 = vld [vmem:[%s4822_s7 + $0x730] sm:$0xff] }
 0x714   : > { %3086 = vmatpush.xpose.msk.msra.mxu3 %vm453_vm0, %v1145_v46  ;;  %3103 = vmatpush.xpose.msk.msrb.mxu0 %vm453_vm0, %v1161_v47  ;;  %v1226_v45 = vld [vmem:[%s4822_s7 + $0x7b0] sm:$0xff]  ;;  %v1177_v46 = vld [vmem:[%s4822_s7 + $0x628] sm:$0xff] }
 0x715   : > { %v1193_v47 = vld [vmem:[%s4822_s7 + $0x6a8] sm:$0xff] }
 0x717   : > { %3053 = vmatpush.xpose.msk.msrb.mxu2 %vm453_vm0, %v1112_v48  ;;  %3070 = vmatpush.xpose.msk.msrb.mxu1 %vm453_vm0, %v1128_v49  ;;  %v1209_v48 = vld [vmem:[%s4822_s7 + $0x728] sm:$0xff] }
 0x718   : > { %3087 = vmatpush.xpose.msk.msra.mxu3 %vm453_vm0, %v1144_v50  ;;  %3104 = vmatpush.xpose.msk.msrb.mxu0 %vm453_vm0, %v1160_v51  ;;  %v1225_v49 = vld [vmem:[%s4822_s7 + $0x7a8] sm:$0xff]  ;;  %v1176_v50 = vld [vmem:[%s4822_s7 + $0x620] sm:$0xff] }
 0x719   : > { %v1192_v51 = vld [vmem:[%s4822_s7 + $0x6a0] sm:$0xff] }
 0x71b   : > { %3054 = vmatpush.xpose.msk.msrb.mxu2 %vm453_vm0, %v1111_v52  ;;  %3071 = vmatpush.xpose.msk.msrb.mxu1 %vm453_vm0, %v1127_v53  ;;  %v1208_v52 = vld [vmem:[%s4822_s7 + $0x720] sm:$0xff] }
 0x71c   : > { %3088 = vmatpush.xpose.msk.msra.mxu3 %vm453_vm0, %v1143_v54  ;;  %3105 = vmatpush.xpose.msk.msrb.mxu0 %vm453_vm0, %v1159_v55  ;;  %v1224_v53 = vld [vmem:[%s4822_s7 + $0x7a0] sm:$0xff]  ;;  %v1175_v54 = vld [vmem:[%s4822_s7 + $0x618] sm:$0xff] }
 0x71d   : > { %v1191_v55 = vld [vmem:[%s4822_s7 + $0x698] sm:$0xff] }
 0x71f   : > { %3055 = vmatpush.xpose.msk.msrb.mxu2 %vm453_vm0, %v1110_v56  ;;  %3072 = vmatpush.xpose.msk.msrb.mxu1 %vm453_vm0, %v1126_v57  ;;  %v1207_v56 = vld [vmem:[%s4822_s7 + $0x718] sm:$0xff] }
 0x720   : > { %3089 = vmatpush.xpose.msk.msra.mxu3 %vm453_vm0, %v1142_v58  ;;  %3106 = vmatpush.xpose.msk.msrb.mxu0 %vm453_vm0, %v1158_v59  ;;  %v1223_v57 = vld [vmem:[%s4822_s7 + $0x798] sm:$0xff]  ;;  %v1174_v58 = vld [vmem:[%s4822_s7 + $0x610] sm:$0xff] }
 0x721   : > { %v1190_v59 = vld [vmem:[%s4822_s7 + $0x690] sm:$0xff] }
 0x723   : > { %3056 = vmatpush.xpose.msk.msrb.mxu2 %vm453_vm0, %v1109_v60  ;;  %3073 = vmatpush.xpose.msk.msrb.mxu1 %vm453_vm0, %v1125_v61  ;;  %v1206_v60 = vld [vmem:[%s4822_s7 + $0x710] sm:$0xff] }
 0x724   : > { %3090 = vmatpush.xpose.msk.msra.mxu3 %vm453_vm0, %v1141_v62  ;;  %3107 = vmatpush.xpose.msk.msrb.mxu0 %vm453_vm0, %v1157_v63  ;;  %v1222_v61 = vld [vmem:[%s4822_s7 + $0x790] sm:$0xff]  ;;  %v1173_v62 = vld [vmem:[%s4822_s7 + $0x608] sm:$0xff] }
 0x725   : > { %v1189_v63 = vld [vmem:[%s4822_s7 + $0x688] sm:$0xff] }
 0x727   : > { %3057 = vmatpush.xpose.msk.msrb.mxu2 %vm453_vm0, %v1108_v0  ;;  %3074 = vmatpush.xpose.msk.msrb.mxu1 %vm453_vm0, %v1124_v1  ;;  %v1205_v0 = vld [vmem:[%s4822_s7 + $0x708] sm:$0xff] }
 0x728   : > { %3091 = vmatpush.xpose.msk.msra.mxu3 %vm453_vm0, %v1140_v3  ;;  %3108 = vmatpush.xpose.msk.msrb.mxu0 %vm453_vm0, %v1156_v5  ;;  %v1221_v1 = vld [vmem:[%s4822_s7 + $0x788] sm:$0xff]  ;;  %v1172_v3 = vld [vmem:[%s4822_s7 + $0x600] sm:$0xff] }
 0x729   : > { %v1188_v5 = vld [vmem:[%s4822_s7 + $0x680] sm:$0xff] }
 0x72a   : > { %3058 = vmatmul.msk.f32.vlgmr.msrb.gmra.mxu2 %vm453_vm0, %v4038_v2  ;;  %3075 = vmatmul.msk.f32.vlgmr.msrb.gmra.mxu1 %vm453_vm0, %v4038_v2 }
 0x72b   : > { %3110 = vmatpush.xpose.msk.msra.mxu2 %vm453_vm0, %v1187_v14  ;;  %3127 = vmatpush.xpose.msk.msra.mxu1 %vm453_vm0, %v1203_v6  ;;  %v1204_v14 = vld [vmem:[%s4822_s7 + $0x700] sm:$0xff] }
 0x72c   : > { %3144 = vmatpush.xpose.msk.msrb.mxu3 %vm453_vm0, %v1219_v7  ;;  %3161 = vmatpush.xpose.msk.msra.mxu0 %vm453_vm0, %v1235_v8  ;;  %v1220_v6 = vld [vmem:[%s4822_s7 + $0x780] sm:$0xff]  ;;  %v2428_v8 = vld [vmem:[%s4824_s9 + $0x188] sm:$0xff] }
 0x72d   : > { %3092 = vmatmul.msk.f32.vlgmr.msra.gmra.mxu3 %vm453_vm0, %v4038_v2  ;;  %3109 = vmatmul.msk.f32.vlgmr.msrb.gmra.mxu0 %vm453_vm0, %v4038_v2  ;;  %v2427_v7 = vld [vmem:[%s4824_s9 + $0x180] sm:$0xff] }
 0x72f   : > { %3111 = vmatpush.xpose.msk.msra.mxu2 %vm453_vm0, %v1186_v9  ;;  %3128 = vmatpush.xpose.msk.msra.mxu1 %vm453_vm0, %v1202_v10  ;;  %v2429_v9 = vld [vmem:[%s4824_s9 + $0x190] sm:$0xff]  ;;  %v2430_v10 = vld [vmem:[%s4824_s9 + $0x198] sm:$0xff] }
 0x730   : > { %3145 = vmatpush.xpose.msk.msrb.mxu3 %vm453_vm0, %v1218_v11  ;;  %3162 = vmatpush.xpose.msk.msra.mxu0 %vm453_vm0, %v1234_v13  ;;  %v2411_v11 = vld [vmem:[%s4824_s9 + $0x100] sm:$0xff]  ;;  %v2412_v13 = vld [vmem:[%s4824_s9 + $0x108] sm:$0xff] }
 0x733   : > { %3112 = vmatpush.xpose.msk.msra.mxu2 %vm453_vm0, %v1185_v15  ;;  %3129 = vmatpush.xpose.msk.msra.mxu1 %vm453_vm0, %v1201_v16  ;;  %v2413_v15 = vld [vmem:[%s4824_s9 + $0x110] sm:$0xff]  ;;  %v2414_v16 = vld [vmem:[%s4824_s9 + $0x118] sm:$0xff] }
 0x734   : > { %3146 = vmatpush.xpose.msk.msrb.mxu3 %vm453_vm0, %v1217_v17  ;;  %3163 = vmatpush.xpose.msk.msra.mxu0 %vm453_vm0, %v1233_v18  ;;  %v4611_v17 = vld [vmem:[%s4823_s8] sm:$0xff] }
 0x735   : > { %v1240_v18 = vperm.slane %v4611_v17, 0 }
 0x737   : > { %3113 = vmatpush.xpose.msk.msra.mxu2 %vm453_vm0, %v1184_v19  ;;  %3130 = vmatpush.xpose.msk.msra.mxu1 %vm453_vm0, %v1200_v20  ;;  %v2395_v19 = vld [vmem:[%s4824_s9 + $0x80] sm:$0xff]  ;;  %v2396_v20 = vld [vmem:[%s4824_s9 + $0x88] sm:$0xff] }
 0x738   : > { %3147 = vmatpush.xpose.msk.msrb.mxu3 %vm453_vm0, %v1216_v21  ;;  %3164 = vmatpush.xpose.msk.msra.mxu0 %vm453_vm0, %v1232_v22  ;;  %v1242_v22 = vperm.slane %v4611_v17, 2 }
 0x73b   : > { %3114 = vmatpush.xpose.msk.msra.mxu2 %vm453_vm0, %v1183_v23  ;;  %3131 = vmatpush.xpose.msk.msra.mxu1 %vm453_vm0, %v1199_v24  ;;  %v1241_v23 = vperm.slane %v4611_v17, 1  ;;  %v2397_v24 = vld [vmem:[%s4824_s9 + $0x90] sm:$0xff] }
 0x73c   : > { %3148 = vmatpush.xpose.msk.msrb.mxu3 %vm453_vm0, %v1215_v25  ;;  %3165 = vmatpush.xpose.msk.msra.mxu0 %vm453_vm0, %v1231_v26  ;;  %v2398_v25 = vld [vmem:[%s4824_s9 + $0x98] sm:$0xff] }
 0x73f   : > { %3115 = vmatpush.xpose.msk.msra.mxu2 %vm453_vm0, %v1182_v27  ;;  %3132 = vmatpush.xpose.msk.msra.mxu1 %vm453_vm0, %v1198_v28  ;;  %v1243_v28 = vperm.slane %v4611_v17, 3 }
 0x740   : > { %3149 = vmatpush.xpose.msk.msrb.mxu3 %vm453_vm0, %v1214_v29  ;;  %3166 = vmatpush.xpose.msk.msra.mxu0 %vm453_vm0, %v1230_v30 }
 0x743   : > { %3116 = vmatpush.xpose.msk.msra.mxu2 %vm453_vm0, %v1181_v31  ;;  %3133 = vmatpush.xpose.msk.msra.mxu1 %vm453_vm0, %v1197_v32  ;;  %v2379_v32 = vld [vmem:[%s4824_s9] sm:$0xff] }
 0x744   : > { %3150 = vmatpush.xpose.msk.msrb.mxu3 %vm453_vm0, %v1213_v33  ;;  %3167 = vmatpush.xpose.msk.msra.mxu0 %vm453_vm0, %v1229_v34  ;;  %v2380_v33 = vld [vmem:[%s4824_s9 + $0x8] sm:$0xff] }
 0x747   : > { %3117 = vmatpush.xpose.msk.msra.mxu2 %vm453_vm0, %v1180_v35  ;;  %3134 = vmatpush.xpose.msk.msra.mxu1 %vm453_vm0, %v1196_v36  ;;  %v2381_v35 = vld [vmem:[%s4824_s9 + $0x10] sm:$0xff]  ;;  %v2382_v36 = vld [vmem:[%s4824_s9 + $0x18] sm:$0xff] }
 0x748   : > { %3151 = vmatpush.xpose.msk.msrb.mxu3 %vm453_vm0, %v1212_v37  ;;  %3168 = vmatpush.xpose.msk.msra.mxu0 %vm453_vm0, %v1228_v38  ;;  %v2431_v38 = vld [vmem:[%s4824_s9 + $0x1a0] sm:$0xff] }
 0x74b   : > { %3118 = vmatpush.xpose.msk.msra.mxu2 %vm453_vm0, %v1179_v39  ;;  %3135 = vmatpush.xpose.msk.msra.mxu1 %vm453_vm0, %v1195_v40  ;;  %v2432_v39 = vld [vmem:[%s4824_s9 + $0x1a8] sm:$0xff] }
 0x74c   : > { %3152 = vmatpush.xpose.msk.msrb.mxu3 %vm453_vm0, %v1211_v41  ;;  %3169 = vmatpush.xpose.msk.msra.mxu0 %vm453_vm0, %v1227_v42  ;;  %v2433_v41 = vld [vmem:[%s4824_s9 + $0x1b0] sm:$0xff]  ;;  %v2434_v42 = vld [vmem:[%s4824_s9 + $0x1b8] sm:$0xff] }
 0x74f   : > { %3119 = vmatpush.xpose.msk.msra.mxu2 %vm453_vm0, %v1178_v12  ;;  %3136 = vmatpush.xpose.msk.msra.mxu1 %vm453_vm0, %v1194_v43 }
 0x750   : > { %3153 = vmatpush.xpose.msk.msrb.mxu3 %vm453_vm0, %v1210_v44  ;;  %3170 = vmatpush.xpose.msk.msra.mxu0 %vm453_vm0, %v1226_v45  ;;  %v2415_v45 = vld [vmem:[%s4824_s9 + $0x120] sm:$0xff] }
 0x753   : > { %3120 = vmatpush.xpose.msk.msra.mxu2 %vm453_vm0, %v1177_v46  ;;  %3137 = vmatpush.xpose.msk.msra.mxu1 %vm453_vm0, %v1193_v47  ;;  %v2416_v46 = vld [vmem:[%s4824_s9 + $0x128] sm:$0xff]  ;;  %v2417_v47 = vld [vmem:[%s4824_s9 + $0x130] sm:$0xff] }
 0x754   : > { %3154 = vmatpush.xpose.msk.msrb.mxu3 %vm453_vm0, %v1209_v48  ;;  %3171 = vmatpush.xpose.msk.msra.mxu0 %vm453_vm0, %v1225_v49  ;;  %v2418_v48 = vld [vmem:[%s4824_s9 + $0x138] sm:$0xff]  ;;  %v1245_v49 = vperm.slane %v4611_v17, 5 }
 0x757   : > { %3121 = vmatpush.xpose.msk.msra.mxu2 %vm453_vm0, %v1176_v50  ;;  %3138 = vmatpush.xpose.msk.msra.mxu1 %vm453_vm0, %v1192_v51  ;;  %v1244_v50 = vperm.slane %v4611_v17, 4  ;;  %v2399_v51 = vld [vmem:[%s4824_s9 + $0xa0] sm:$0xff] }
 0x758   : > { %3155 = vmatpush.xpose.msk.msrb.mxu3 %vm453_vm0, %v1208_v52  ;;  %3172 = vmatpush.xpose.msk.msra.mxu0 %vm453_vm0, %v1224_v53  ;;  %v2400_v52 = vld [vmem:[%s4824_s9 + $0xa8] sm:$0xff] }
 0x75b   : > { %3122 = vmatpush.xpose.msk.msra.mxu2 %vm453_vm0, %v1175_v54  ;;  %3139 = vmatpush.xpose.msk.msra.mxu1 %vm453_vm0, %v1191_v55  ;;  %v1247_v54 = vperm.slane %v4611_v17, 7 }
 0x75c   : > { %3156 = vmatpush.xpose.msk.msrb.mxu3 %vm453_vm0, %v1207_v56  ;;  %3173 = vmatpush.xpose.msk.msra.mxu0 %vm453_vm0, %v1223_v57  ;;  %v1246_v56 = vperm.slane %v4611_v17, 6  ;;  %v2401_v57 = vld [vmem:[%s4824_s9 + $0xb0] sm:$0xff]  ;;  %v2422_v17 = vld [vmem:[%s4824_s9 + $0x158] sm:$0xff] }
 0x75f   : > { %3123 = vmatpush.xpose.msk.msra.mxu2 %vm453_vm0, %v1174_v58  ;;  %3140 = vmatpush.xpose.msk.msra.mxu1 %vm453_vm0, %v1190_v59  ;;  %v2402_v58 = vld [vmem:[%s4824_s9 + $0xb8] sm:$0xff] }
 0x760   : > { %3157 = vmatpush.xpose.msk.msrb.mxu3 %vm453_vm0, %v1206_v60  ;;  %3174 = vmatpush.xpose.msk.msra.mxu0 %vm453_vm0, %v1222_v61 }
 0x763   : > { %3124 = vmatpush.xpose.msk.msra.mxu2 %vm453_vm0, %v1173_v62  ;;  %3141 = vmatpush.xpose.msk.msra.mxu1 %vm453_vm0, %v1189_v63  ;;  %v2383_v63 = vld [vmem:[%s4824_s9 + $0x20] sm:$0xff] }
 0x764   : > { %3158 = vmatpush.xpose.msk.msrb.mxu3 %vm453_vm0, %v1205_v0  ;;  %3175 = vmatpush.xpose.msk.msra.mxu0 %vm453_vm0, %v1221_v1  ;;  %v2384_v0 = vld [vmem:[%s4824_s9 + $0x28] sm:$0xff] }
 0x766   : > { %v2080_v27 = vpop.f32.mrf.mxu1 }
 0x767   : > { %3125 = vmatpush.xpose.msk.msra.mxu2 %vm453_vm0, %v1172_v3  ;;  %3142 = vmatpush.xpose.msk.msra.mxu1 %vm453_vm0, %v1188_v5  ;;  %v2120_v29 = vpop.f32.mrf.mxu0  ;;  %v2081_v34 = vadd.f32 %v2080_v27, %v1241_v23  ;;  %v2385_v5 = vld [vmem:[%s4824_s9 + $0x30] sm:$0xff]  ;;  %v2390_v23 = vld [vmem:[%s4824_s9 + $0x58] sm:$0xff] }
 0x768   : > { %3159 = vmatpush.xpose.msk.msrb.mxu3 %vm453_vm0, %v1204_v14  ;;  %3176 = vmatpush.xpose.msk.msra.mxu0 %vm453_vm0, %v1220_v6  ;;  %v2121_v37 = vadd.f32 %v2120_v29, %v1243_v28  ;;  %v2386_v14 = vld [vmem:[%s4824_s9 + $0x38] sm:$0xff]  ;;  %v2436_v6 = vld [vmem:[%s4824_s9 + $0x1c8] sm:$0xff]  ;;  %v2389_v27 = vld [vmem:[%s4824_s9 + $0x50] sm:$0xff] }
 0x769   : > { %v2364_v43 = vmax.f32 %v2081_v34, 0.0  ;;  %v2440_v28 = vld [vmem:[%s4824_s9 + $0x1e8] sm:$0xff]  ;;  %v2442_v29 = vld [vmem:[%s4824_s9 + $0x1f8] sm:$0xff] }
 0x76a   : > { %3126 = vmatmul.msk.f32.vlgmr.msra.gmra.mxu2 %vm453_vm0, %v4038_v2  ;;  %3143 = vmatmul.msk.f32.vlgmr.msra.gmra.mxu1 %vm453_vm0, %v4038_v2  ;;  %v2366_v44 = vmax.f32 %v2121_v37, 0.0  ;;  %v2408_v34 = vld [vmem:[%s4824_s9 + $0xe8] sm:$0xff] }
 0x76b   : > { %2459 = vmatpush.xpose.msrb.mxu2 %v2427_v7  ;;  %2479 = vmatpush.xpose.msrb.mxu1 %v2428_v8  ;;  %v2438_v7 = vld [vmem:[%s4824_s9 + $0x1d8] sm:$0xff] }
 0x76c   : > { %2499 = vmatpush.xpose.msra.mxu3 %v2429_v9  ;;  %2519 = vmatpush.xpose.msrb.mxu0 %v2430_v10  ;;  %v2060_v21 = vpop.f32.mrf.mxu2 }
 0x76d   : > { %3160 = vmatmul.msk.f32.vlgmr.msrb.gmra.mxu3 %vm453_vm0, %v4038_v2  ;;  %3177 = vmatmul.msk.f32.vlgmr.msra.gmra.mxu0 %vm453_vm0, %v4038_v2  ;;  %v2100_v26 = vpop.f32.mrf.mxu3  ;;  %v2061_v30 = vadd.f32 %v2060_v21, %v1240_v18  ;;  %v2404_v18 = vld [vmem:[%s4824_s9 + $0xc8] sm:$0xff]  ;;  %v2421_v21 = vld [vmem:[%s4824_s9 + $0x150] sm:$0xff] }
 0x76e   : > { %v2101_v31 = vadd.f32 %v2100_v26, %v1242_v22  ;;  %v2160_v53 = vpop.f32.mrf.mxu1  ;;  %v2388_v22 = vld [vmem:[%s4824_s9 + $0x48] sm:$0xff]  ;;  %v2387_v26 = vld [vmem:[%s4824_s9 + $0x40] sm:$0xff] }
 0x76f   : > { %2460 = vmatpush.xpose.msrb.mxu2 %v2411_v11  ;;  %2480 = vmatpush.xpose.msrb.mxu1 %v2412_v13  ;;  %v2363_v40 = vmax.f32 %v2061_v30, 0.0  ;;  %v2200_v59 = vpop.f32.mrf.mxu0  ;;  %v2161_v61 = vadd.f32 %v2160_v53, %v1245_v49  ;;  %v2435_v13 = vld [vmem:[%s4824_s9 + $0x1c0] sm:$0xff]  ;;  %v2425_v53 = vld [vmem:[%s4824_s9 + $0x170] sm:$0xff] }
 0x770   : > { %2500 = vmatpush.xpose.msra.mxu3 %v2413_v15  ;;  %2520 = vmatpush.xpose.msrb.mxu0 %v2414_v16  ;;  %v2365_v12 = vmax.f32 %v2101_v31, 0.0  ;;  %v2201_v1 = vadd.f32 %v2200_v59, %v1247_v54  ;;  %v2437_v15 = vld [vmem:[%s4824_s9 + $0x1d0] sm:$0xff]  ;;  %v2420_v16 = vld [vmem:[%s4824_s9 + $0x148] sm:$0xff]  ;;  %v2439_v30 = vld [vmem:[%s4824_s9 + $0x1e0] sm:$0xff] }
 0x771   : > { %v2368_v8 = vmax.f32 %v2161_v61, 0.0  ;;  %v2441_v31 = vld [vmem:[%s4824_s9 + $0x1f0] sm:$0xff]  ;;  %v2392_v54 = vld [vmem:[%s4824_s9 + $0x68] sm:$0xff] }
 0x772   : > { %v2370_v10 = vmax.f32 %v2201_v1, 0.0  ;;  %v2393_v59 = vld [vmem:[%s4824_s9 + $0x70] sm:$0xff] }
 0x773   : > { %2461 = vmatpush.xpose.msrb.mxu2 %v2395_v19  ;;  %2481 = vmatpush.xpose.msrb.mxu1 %v2396_v20  ;;  %v2406_v19 = vld [vmem:[%s4824_s9 + $0xd8] sm:$0xff]  ;;  %v2419_v20 = vld [vmem:[%s4824_s9 + $0x140] sm:$0xff] }
 0x774   : > { %2501 = vmatpush.xpose.msra.mxu3 %v2397_v24  ;;  %2521 = vmatpush.xpose.msrb.mxu0 %v2398_v25  ;;  %v2140_v55 = vpop.f32.mrf.mxu2  ;;  %v2403_v24 = vld [vmem:[%s4824_s9 + $0xc0] sm:$0xff]  ;;  %v2405_v25 = vld [vmem:[%s4824_s9 + $0xd0] sm:$0xff] }
 0x775   : > { %v2180_v60 = vpop.f32.mrf.mxu3  ;;  %v2141_v62 = vadd.f32 %v2140_v55, %v1244_v50  ;;  %v2394_v55 = vld [vmem:[%s4824_s9 + $0x78] sm:$0xff] }
 0x776   : > { %v2181_v3 = vadd.f32 %v2180_v60, %v1246_v56  ;;  %v2407_v56 = vld [vmem:[%s4824_s9 + $0xe0] sm:$0xff] }
 0x777   : > { %2462 = vmatpush.xpose.msrb.mxu2 %v2379_v32  ;;  %2482 = vmatpush.xpose.msrb.mxu1 %v2380_v33  ;;  %v2367_v9 = vmax.f32 %v2141_v62, 0.0  ;;  %v2424_v32 = vld [vmem:[%s4824_s9 + $0x168] sm:$0xff]  ;;  %v2426_v33 = vld [vmem:[%s4824_s9 + $0x178] sm:$0xff] }
 0x778   : > { %2502 = vmatpush.xpose.msra.mxu3 %v2381_v35  ;;  %2522 = vmatpush.xpose.msrb.mxu0 %v2382_v36  ;;  %v2369_v11 = vmax.f32 %v2181_v3, 0.0  ;;  %v2410_v35 = vld [vmem:[%s4824_s9 + $0xf8] sm:$0xff]  ;;  %v1237_v36 = vld [vmem:[%s4823_s8 + $0x8] sm:$0xff] }
 0x779   : > { %v1249_v37 = vperm.slane %v1237_v36, 1  ;;  %v1253_v60 = vperm.slane %v1237_v36, 5  ;;  %v1255_v61 = vperm.slane %v1237_v36, 7 }
 0x77a   : > { %2463 = vmatmul.f32.vlgmr.msrb.gmra.mxu2 %v2363_v40  ;;  %2483 = vmatmul.f32.vlgmr.msrb.gmra.mxu1 %v2364_v43  ;;  %v1248_v43 = vperm.slane %v1237_v36, 0 }
 0x77b   : > { %2539 = vmatpush.xpose.msra.mxu2 %v2431_v38  ;;  %2559 = vmatpush.xpose.msra.mxu1 %v2432_v39  ;;  %v1251_v38 = vperm.slane %v1237_v36, 3 }
 0x77c   : > { %2579 = vmatpush.xpose.msrb.mxu3 %v2433_v41  ;;  %2599 = vmatpush.xpose.msra.mxu0 %v2434_v42 }
 0x77d   : > { %2503 = vmatmul.f32.vlgmr.msra.gmra.mxu3 %v2365_v12  ;;  %2523 = vmatmul.f32.vlgmr.msrb.gmra.mxu0 %v2366_v44 }
 0x77f   : > { %2540 = vmatpush.xpose.msra.mxu2 %v2415_v45  ;;  %2560 = vmatpush.xpose.msra.mxu1 %v2416_v46  ;;  %v1250_v45 = vperm.slane %v1237_v36, 2 }
 0x780   : > { %2580 = vmatpush.xpose.msrb.mxu3 %v2417_v47  ;;  %2600 = vmatpush.xpose.msra.mxu0 %v2418_v48 }
 0x783   : > { %2541 = vmatpush.xpose.msra.mxu2 %v2399_v51  ;;  %2561 = vmatpush.xpose.msra.mxu1 %v2400_v52  ;;  %v2423_v52 = vld [vmem:[%s4824_s9 + $0x160] sm:$0xff] }
 0x784   : > { %2581 = vmatpush.xpose.msrb.mxu3 %v2401_v57  ;;  %2601 = vmatpush.xpose.msra.mxu0 %v2402_v58  ;;  %v2409_v57 = vld [vmem:[%s4824_s9 + $0xf0] sm:$0xff]  ;;  %v2391_v58 = vld [vmem:[%s4824_s9 + $0x60] sm:$0xff] }
 0x787   : > { %2542 = vmatpush.xpose.msra.mxu2 %v2383_v63  ;;  %2562 = vmatpush.xpose.msra.mxu1 %v2384_v0 }
 0x788   : > { %2582 = vmatpush.xpose.msrb.mxu3 %v2385_v5  ;;  %2602 = vmatpush.xpose.msra.mxu0 %v2386_v14  ;;  %v1252_v5 = vperm.slane %v1237_v36, 4 }
 0x78a   : > { %2543 = vmatmul.f32.vlgmr.msra.gmra.mxu2 %v2367_v9  ;;  %2563 = vmatmul.f32.vlgmr.msra.gmra.mxu1 %v2368_v8 }
 0x78b   : > { %2639 = vmatpush.xpose.msrb.mxu1 %v2436_v6  ;;  %2583 = vmatmul.f32.vlgmr.msrb.gmra.mxu3 %v2369_v11  ;;  %v1254_v6 = vperm.slane %v1237_v36, 6 }
 0x78c   : > { %2679 = vmatpush.xpose.msrb.mxu0 %v2438_v7  ;;  %2619 = vmatpush.xpose.msrb.mxu2 %v2435_v13 }
 0x78d   : > { %2603 = vmatmul.f32.vlgmr.msra.gmra.mxu0 %v2370_v10  ;;  %2659 = vmatpush.xpose.msra.mxu3 %v2437_v15  ;;  %v3204_v15 = vld [vmem:[%s4825_s10] ss:$0 sm:$0xff] }
 0x78f   : > { %2640 = vmatpush.xpose.msrb.mxu1 %v2420_v16 }
 0x790   : > { %2680 = vmatpush.xpose.msrb.mxu0 %v2422_v17  ;;  %2620 = vmatpush.xpose.msrb.mxu2 %v2419_v20 }
 0x791   : > { %2660 = vmatpush.xpose.msra.mxu3 %v2421_v21 }
 0x793   : > { %2641 = vmatpush.xpose.msrb.mxu1 %v2404_v18 }
 0x794   : > { %2681 = vmatpush.xpose.msrb.mxu0 %v2406_v19  ;;  %2621 = vmatpush.xpose.msrb.mxu2 %v2403_v24 }
 0x795   : > { %2661 = vmatpush.xpose.msra.mxu3 %v2405_v25 }
 0x797   : > { %2642 = vmatpush.xpose.msrb.mxu1 %v2388_v22 }
 0x798   : > { %2682 = vmatpush.xpose.msrb.mxu0 %v2390_v23  ;;  %2622 = vmatpush.xpose.msrb.mxu2 %v2387_v26 }
 0x799   : > { %2662 = vmatpush.xpose.msra.mxu3 %v2389_v27 }
 0x79b   : > { %2719 = vmatpush.xpose.msra.mxu1 %v2440_v28 }
 0x79c   : > { %2759 = vmatpush.xpose.msra.mxu0 %v2442_v29  ;;  %2699 = vmatpush.xpose.msra.mxu2 %v2439_v30 }
 0x79d   : > { %2739 = vmatpush.xpose.msrb.mxu3 %v2441_v31 }
 0x79f   : > { %2720 = vmatpush.xpose.msra.mxu1 %v2424_v32 }
 0x7a0   : > { %2760 = vmatpush.xpose.msra.mxu0 %v2426_v33  ;;  %2700 = vmatpush.xpose.msra.mxu2 %v2423_v52 }
 0x7a1   : > { %2740 = vmatpush.xpose.msrb.mxu3 %v2425_v53 }
 0x7a3   : > { %2721 = vmatpush.xpose.msra.mxu1 %v2408_v34 }
 0x7a4   : > { %2761 = vmatpush.xpose.msra.mxu0 %v2410_v35  ;;  %2701 = vmatpush.xpose.msra.mxu2 %v2407_v56 }
 0x7a5   : > { %2741 = vmatpush.xpose.msrb.mxu3 %v2409_v57 }
 0x7a7   : > { %v2240_v39 = vpop.f32.mrf.mxu1  ;;  %2722 = vmatpush.xpose.msra.mxu1 %v2392_v54 }
 0x7a8   : > { %v2241_v40 = vadd.f32 %v2240_v39, %v1249_v37  ;;  %2762 = vmatpush.xpose.msra.mxu0 %v2394_v55  ;;  %2702 = vmatpush.xpose.msra.mxu2 %v2391_v58 }
 0x7a9   : > { %2742 = vmatpush.xpose.msrb.mxu3 %v2393_v59 }
 0x7aa   : > { %v2280_v41 = vpop.f32.mrf.mxu0  ;;  %v2372_v12 = vmax.f32 %v2241_v40, 0.0 }
 0x7ab   : > { %v2281_v42 = vadd.f32 %v2280_v41, %v1251_v38 }
 0x7ac   : > { %2643 = vmatmul.f32.vlgmr.msrb.gmra.mxu1 %v2372_v12 }
 0x7ad   : > { %v2374_v44 = vmax.f32 %v2281_v42, 0.0  ;;  %v2220_v46 = vpop.f32.mrf.mxu2 }
 0x7ae   : > { %v2221_v47 = vadd.f32 %v2220_v46, %v1248_v43 }
 0x7af   : > { %2683 = vmatmul.f32.vlgmr.msrb.gmra.mxu0 %v2374_v44 }
 0x7b0   : > { %v2260_v48 = vpop.f32.mrf.mxu3  ;;  %v2371_v50 = vmax.f32 %v2221_v47, 0.0 }
 0x7b1   : > { %v2261_v49 = vadd.f32 %v2260_v48, %v1250_v45 }
 0x7b2   : > { %2623 = vmatmul.f32.vlgmr.msrb.gmra.mxu2 %v2371_v50 }
 0x7b3   : > { %v2373_v51 = vmax.f32 %v2261_v49, 0.0 }
 0x7b5   : > { %2663 = vmatmul.f32.vlgmr.msra.gmra.mxu3 %v2373_v51 }
 0x7e7   : > { %v2320_v62 = vpop.f32.mrf.mxu1 }
 0x7e8   : > { %v2321_v63 = vadd.f32 %v2320_v62, %v1253_v60  ;;  %v3205_v62 = vld [vmem:[%s4826_s11] ss:$0 sm:$0xff] }
 0x7ea   : > { %v2360_v0 = vpop.f32.mrf.mxu0  ;;  %v2376_v3 = vmax.f32 %v2321_v63, 0.0 }
 0x7eb   : > { %v2361_v1 = vadd.f32 %v2360_v0, %v1255_v61 }
 0x7ec   : > { %2723 = vmatmul.f32.vlgmr.msra.gmra.mxu1 %v2376_v3 }
 0x7ed   : > { %v2378_v14 = vmax.f32 %v2361_v1, 0.0  ;;  %v2300_v7 = vpop.f32.mrf.mxu2 }
 0x7ee   : > { %v2301_v8 = vadd.f32 %v2300_v7, %v1252_v5 }
 0x7ef   : > { %2763 = vmatmul.f32.vlgmr.msra.gmra.mxu0 %v2378_v14 }
 0x7f0   : > { %v2340_v9 = vpop.f32.mrf.mxu3  ;;  %v2375_v11 = vmax.f32 %v2301_v8, 0.0 }
 0x7f1   : > { %v2341_v10 = vadd.f32 %v2340_v9, %v1254_v6 }
 0x7f2   : > { %2703 = vmatmul.f32.vlgmr.msra.gmra.mxu2 %v2375_v11 }
 0x7f3   : > { %v2377_v13 = vmax.f32 %v2341_v10, 0.0 }
 0x7f5   : > { %2743 = vmatmul.f32.vlgmr.msrb.gmra.mxu3 %v2377_v13 }
 0x7f7   : > { %v2484_v18 = vpop.f32.mrf.mxu1 }
 0x7fa   : > { %v2524_v22 = vpop.f32.mrf.mxu0 }
 0x7fd   : > { %v2464_v16 = vpop.f32.mrf.mxu2 }
 0x7fe   : > { %v2465_v17 = vadd.f32 %v3204_v15, %v2464_v16 }
 0x800   : > { %v2485_v19 = vadd.f32 %v2484_v18, %v2465_v17  ;;  %v2504_v20 = vpop.f32.mrf.mxu3 }
 0x802   : > { %v2505_v21 = vadd.f32 %v2504_v20, %v2485_v19 }
 0x804   : > { %v2525_v24 = vadd.f32 %v2524_v22, %v2505_v21 }
 0x807   : > { %v2564_v26 = vpop.f32.mrf.mxu1 }
 0x80a   : > { %v2604_v30 = vpop.f32.mrf.mxu0 }
 0x80d   : > { %v2544_v23 = vpop.f32.mrf.mxu2 }
 0x80e   : > { %v2545_v25 = vadd.f32 %v2544_v23, %v2525_v24  ;;  %v2584_v28 = vpop.f32.mrf.mxu3 }
 0x810   : > { %v2565_v27 = vadd.f32 %v2564_v26, %v2545_v25 }
 0x812   : > { %v2585_v29 = vadd.f32 %v2584_v28, %v2565_v27 }
 0x814   : > { %v2605_v32 = vadd.f32 %v2604_v30, %v2585_v29 }
 0x829   : > { %v2644_v34 = vpop.f32.mrf.mxu1 }
 0x82c   : > { %v2684_v38 = vpop.f32.mrf.mxu0 }
 0x835   : > { %v2624_v31 = vpop.f32.mrf.mxu2 }
 0x836   : > { %v2625_v33 = vadd.f32 %v2624_v31, %v2605_v32 }
 0x838   : > { %v2645_v35 = vadd.f32 %v2644_v34, %v2625_v33  ;;  %v2664_v36 = vpop.f32.mrf.mxu3 }
 0x83a   : > { %v2665_v37 = vadd.f32 %v2664_v36, %v2645_v35 }
 0x83c   : > { %v2685_v39 = vadd.f32 %v2684_v38, %v2665_v37 }
 0x869   : > { %v2724_v42 = vpop.f32.mrf.mxu1 }
 0x86c   : > { %v2764_v45 = vpop.f32.mrf.mxu0 }
 0x875   : > { %v2704_v40 = vpop.f32.mrf.mxu2 }
 0x876   : > { %v2705_v41 = vadd.f32 %v2704_v40, %v2685_v39 }
 0x878   : > { %v2725_v12 = vadd.f32 %v2724_v42, %v2705_v41  ;;  %v2744_v43 = vpop.f32.mrf.mxu3 }
 0x87a   : > { %v2745_v44 = vadd.f32 %v2744_v43, %v2725_v12 }
 0x87c   : > { %v2765_v46 = vadd.f32 %v2764_v45, %v2745_v44 }
 0x87e   : > { %v2767_v47 = vadd.f32 %v2765_v46, %v4038_v2 }
 0x880   : > { %v2770_v48 = vsel %vm453_vm0, %v2767_v47, 0.0 }
 0x881   : > { %2771 = vadd.xlane.f32.xlu0 %v2770_v48 }
 0x8f4   : > { %v2772_v49 = vpop.xlane.xlu0 %2771 }
 0x8f5   : > { %v2773_v50 = vmul.f32 %v2772_v49, %v3603_v4 }
 0x8f7   : > { %v2774_v51 = vsub.f32 %v2767_v47, %v2773_v50 }
 0x8f9   : > { %v2775_v52 = vmul.f32 %v2774_v51, %v2774_v51 }
 0x8fb   : > { %v2776_v53 = vsel %vm453_vm0, %v2775_v52, 0.0 }
 0x8fc   : > { %2777 = vadd.xlane.f32.xlu1 %v2776_v53 }
 0x96f   : > { %v2778_v54 = vpop.xlane.xlu1 %2777 }
 0x970   : > { %v2779_v55 = vmul.f32 %v2778_v54, %v3603_v4  ;;  %v3206_v4 = vld [vmem:[%s4827_s12] ss:$0 sm:$0xff] }
 0x972   : > { %v2780_v56 = vadd.f32 1e-05, %v2779_v55 }
 0x974   : > { %3227 = vrsqrt.f32 %v2780_v56  ;;  %vm2787_vm7 = vweird.f32 %v2780_v56 }
 0x97a   : > { %v3228_v57 = vpop.eup %3227 }
 0x97b   : > { %v2782_v58 = vmul.f32 %v3228_v57, %v2780_v56  ;;  %vm2788_vm6 = vweird.f32 %v3228_v57 }
 0x97c   : > { %vm2789_vm8 = vmor %vm2787_vm7, %vm2788_vm6 }
 0x97d   : > { %v2783_v2 = vmul.f32 %v3228_v57, %v2782_v58 }
 0x97f   : > { %v2784_v59 = vmul.f32 0.5, %v2783_v2 }
 0x981   : > { %v2785_v60 = vsub.f32 1.5, %v2784_v59 }
 0x983   : > { %v2786_v61 = vmul.f32 %v3228_v57, %v2785_v60 }
 0x985   : > { %v2790_v63 = vsel %vm2789_vm8, %v3228_v57, %v2786_v61 }
 0x986   : > { %v2791_v0 = vmul.f32 %v2790_v63, %v2774_v51 }
 0x988   : > { %v2795_v1 = vmul.f32 %v3205_v62, %v2791_v0 }
 0x98a   : > { %v2799_v3 = vadd.f32 %v3206_v4, %v2795_v1 }
 0x98c   : > { %2800 = vst.msk [vmem:[%s435_s27] sm:$0xff] %vm453_vm0, %v2799_v3 }
 0x98d PF: > { %s23_s25 = sadd.s32 1, %s3235_s25  }
 0x98e   : > { %p20_p4 = scmp.ge.s32.totalorder %s23_s25, 4  }
 0x990   :  { %22 = sbr.rel (!%p20_p4) target bundleno = 1 (0x1), region = 102 }

// kernel: transformer_encoder_forward.5
= control target key start
LH: loop header
LB: loop body
LE: loop exit
PB: predicated region body
PF: predicated region fallthrough
CT: control target
= control target key end

     0   :  { %s4986_s0 = inlined_call_operand.vmem [shape: f32[2,8,32], index: 0, kind: input, shape index: {}]   ;;  %s4987_s1 = inlined_call_operand.vmem [shape: f32[96,32], index: 1, kind: input, shape index: {}]   ;;  %s4988_s2 = inlined_call_operand.vmem [shape: f32[1,96], index: 2, kind: input, shape index: {}]   ;;  %s4989_s3 = inlined_call_operand.vmem [shape: f32[32,32], index: 3, kind: input, shape index: {}]   ;;  %s4990_s4 = inlined_call_operand.vmem [shape: f32[1,32], index: 4, kind: input, shape index: {}]   ;;  %s4991_s5 = inlined_call_operand.vmem [shape: f32[1,32], index: 5, kind: input, shape index: {}]   ;;  %s4992_s6 = inlined_call_operand.vmem [shape: f32[1,32], index: 6, kind: input, shape index: {}]   ;;  %s4993_s7 = inlined_call_operand.vmem [shape: f32[2048,32], index: 7, kind: input, shape index: {}]   ;;  %s4994_s8 = inlined_call_operand.vmem [shape: f32[1,2048], index: 8, kind: input, shape index: {}]   ;;  %s4995_s9 = inlined_call_operand.vmem [shape: f32[32,2048], index: 9, kind: input, shape index: {}]   ;;  %s4996_s10 = inlined_call_operand.vmem [shape: f32[1,32], index: 10, kind: input, shape index: {}]   ;;  %s4997_s11 = inlined_call_operand.vmem [shape: f32[1,32], index: 11, kind: input, shape index: {}]   ;;  %s4998_s12 = inlined_call_operand.vmem [shape: f32[1,32], index: 12, kind: input, shape index: {}]   ;;  %s4999_s13 = inlined_call_operand.hbm [shape: f32[2,8,32], index: 13, kind: output, shape index: {}]  }
   0x1   :  { %5003 = sst [smem:[#allocation8_spill]] %s4986_s0 }
   0x2   :  { %18 = vsyncpa [#allocation3], 0 }
   0x3   :  { %20 = vsyncpa [#allocation3 + $0x1], 0  ;;  %s3429_s25 = smov 0   ;;  %s3431_s26 = smov 0  }
   0x4   :  { %s3433_s27 = smov 0   ;;  %s3435_s28 = smov 0  }
   0x5 LB: > { %5004 = sst [smem:[#allocation5_spill]] %s3341_s27  ;;  %s3450_s29 = sadd.s32 4294967295, %s3345_s28   ;;  %s3345_s28 = sphi %s3435_s28, %s5010_s28   ;;  %s3341_s27 = sphi %s3433_s27, %s5012_s27   ;;  %s3337_s26 = sphi %s3431_s26, %s5014_s26   ;;  %s3333_s25 = sphi %s3429_s25, %s5013_s25  }
   0x6   : > { %s2876_s30 = sadd.s32 4294967294, %s3345_s28   ;;  %s3454_s14 = sadd.s32 1, %s3345_s28  }
   0x7   : > { %5005 = sst [smem:[#allocation6_spill]] %s3454_s14  ;;  %s311_s15 = sadd.s32 1, %s3341_s27 }
   0x8   : > { %s308_s16 = ssub.s32 %s3345_s28, %s3454_s14  ;;  %p321_p0 = scmp.ne.s32.totalorder %s3341_s27, %s3337_s26 }
   0x9   : > { %p309_p1 = scmp.eq.s32.totalorder %s308_s16, 0  ;;  %p322_p2 = scmp.eq.s32.totalorder %s3450_s29, 1 }
   0xa   : > { %p327_p3 = scmp.ne.s32.totalorder %s3337_s26, %s3333_s25  ;;  %p328_p4 = scmp.eq.s32.totalorder %s2876_s30, 1 }
   0xb   : > { %s3465_s17 = scalar_select %p309_p1, %s3341_s27, %s311_s15  }
   0xc   : > { %p3467_p5 = por %p322_p2, %p321_p0  ;;  %p3471_p6 = por %p328_p4, %p327_p3 }
   0xd   : > { %5006 = sst [smem:[#allocation7_spill]] %s3465_s17  ;;  %p2879_p7 = scmp.ge.s32.totalorder %s3345_s28, 1 }
   0xe   : > { %p389_p8 = scmp.lt.s32.totalorder %s3345_s28, 3 }
  0x10   : > { %p390_p9 = pnand %p2879_p7, %p389_p8 }
  0x11   : > { %p432_p10 = scmp.lt.s32.totalorder (!%p390_p9), %s3450_s29, 1  ;;  %s5009_s0 = sld [smem:[#allocation8_spill]] (!%p390_p9) }
  0x12   : > { %393 = sbr.rel (%p390_p9) target bundleno = 2459 (0x99b), region = 72  ;;  %s3347_s23 = smov (!%p390_p9), 120  }
  0x13   : > { %s3348_s27 = smov (!%p390_p9), 96   ;;  %s3351_s30 = smov (!%p390_p9), 72  }
  0x14   : > { %s3353_s16 = smov (!%p390_p9), 104   ;;  %s3355_s20 = smov (!%p390_p9), 112  }
  0x15   : > { %s3356_s21 = smov (!%p390_p9), 48   ;;  %s3357_s17 = smov (!%p390_p9), 40  }
  0x17   : > { %v448_v0 = vld [vmem:[%s4987_s1 + $0x58] sm:$0xff]  ;;  %vm453_vm0 = vcmask 261120   ;;  %v447_v1 = vld [vmem:[%s4987_s1 + $0x50] sm:$0xff]  ;;  %v446_v2 = vld [vmem:[%s4987_s1 + $0x48] sm:$0xff]  ;;  %s433_s24 = scalar_select %p432_p10, %s3450_s29, 1  ;;  %vm520_vm1 = vcmask 64512  }
  0x18   : > { %2882 = vmatpush.xpose.msk.msra.mxu0 %vm453_vm0, %v448_v0  ;;  %v445_v3 = vld [vmem:[%s4987_s1 + $0x40] sm:$0xff]  ;;  %v444_v4 = vld [vmem:[%s4987_s1 + $0x38] sm:$0xff]  ;;  %v443_v5 = vld [vmem:[%s4987_s1 + $0x30] sm:$0xff] }
  0x19   : > { %v442_v6 = vld [vmem:[%s4987_s1 + $0x28] sm:$0xff]  ;;  %v441_v7 = vld [vmem:[%s4987_s1 + $0x20] sm:$0xff]  ;;  %v440_v8 = vld [vmem:[%s4987_s1 + $0x18] sm:$0xff]  ;;  %s2881_s15 = sshll.u32 %s433_s24, 3  ;;  %s3349_s24 = smov 88  }
  0x1a   : > { %v439_v9 = vld [vmem:[%s4987_s1 + $0x10] sm:$0xff]  ;;  %v438_v10 = vld [vmem:[%s4987_s1 + $0x8] sm:$0xff]  ;;  %v437_v11 = vld [vmem:[%s4987_s1] sm:$0xff]  ;;  %s435_s14 = scalar_lea.vmem %s5009_s0, %s2881_s15  ;;  %s3352_s15 = smov 80  }
  0x1b   : > { %v3530_v12 = vld [vmem:[%s435_s14] sm:$0xff]  ;;  %s3350_s14 = smov 56   ;;  %v3558_v25 = vld [vmem:[%s4989_s3 + $0x18] sm:$0xff]  ;;  %v3565_v26 = vld [vmem:[%s4989_s3 + $0x10] sm:$0xff]  ;;  %s3200_s0 = sshll.u32 %s3450_s29, 3 }
  0x1c   : > { %2883 = vmatpush.xpose.msk.msra.mxu0 %vm453_vm0, %v447_v1  ;;  %v3254_v13 = vld [vmem:[%s4988_s2] ss:$0 sm:$0xff]  ;;  %v3572_v27 = vld [vmem:[%s4989_s3 + $0x8] sm:$0xff] }
  0x1d   : > { %v3579_v28 = vld [vmem:[%s4989_s3] sm:$0xff] }
  0x20   : > { %2884 = vmatpush.xpose.msk.msra.mxu0 %vm453_vm0, %v446_v2 }
  0x24   : > { %2885 = vmatpush.xpose.msk.msra.mxu0 %vm453_vm0, %v445_v3 }
  0x28   : > { %2886 = vmatpush.xpose.msk.msra.mxu0 %vm453_vm0, %v444_v4 }
  0x2c   : > { %2887 = vmatpush.xpose.msk.msra.mxu0 %vm453_vm0, %v443_v5 }
  0x30   : > { %2888 = vmatpush.xpose.msk.msra.mxu0 %vm453_vm0, %v442_v6 }
  0x34   : > { %2889 = vmatpush.xpose.msk.msra.mxu0 %vm453_vm0, %v441_v7 }
  0x38   : > { %2890 = vmatpush.xpose.msk.msra.mxu0 %vm453_vm0, %v440_v8 }
  0x3c   : > { %2891 = vmatpush.xpose.msk.msra.mxu0 %vm453_vm0, %v439_v9 }
  0x40   : > { %2892 = vmatpush.xpose.msk.msra.mxu0 %vm453_vm0, %v438_v10 }
  0x44   : > { %2893 = vmatpush.xpose.msk.msra.mxu0 %vm453_vm0, %v437_v11 }
  0x47   : > { %2894 = vmatmul.msk.f32.vlgmr.msra.gmra.mxu0 %vm453_vm0, %v3530_v12 }
  0xc4   : > { %v510_v14 = vpop.f32.mrf.mxu0 }
  0xc5   : > { %v3537_v15 = vadd.f32 %v3254_v13, %v510_v14 }
  0xc7   : > { %583 = vrot.lane.b32.xlu1 %v3537_v15, %s3347_s23  ;;  %518 = vrot.lane.b32.xlu0 %v3537_v15, %s3348_s27  ;;  %s429_s27 = sand.u32 1, %s3337_s26  }
  0xcf   : > { %585 = vrot.lane.b32.xlu0 %v3537_v15, %s3349_s24  ;;  %s2880_s24 = sshll.u32 %s429_s27, 3 }
 0x139   : > { %v519_v16 = vpop.permute.xlu0 %518  ;;  %v584_v18 = vpop.permute.xlu1 %583 }
 0x13a   : > { %2895 = vmatpush.xpose.msk.msra.mxu1 %vm520_vm1, %v519_v16 }
 0x13d   : > { %2896 = vmatmul.msk.f32.vlgmr.msra.gmra.mxu1 %vm520_vm1, %v3537_v15 }
 0x141   : > { %v586_v17 = vpop.permute.xlu0 %585 }
 0x142   : > { %2898 = vmatpush.xpose.msk.msra.mxu3 %vm520_vm1, %v586_v17 }
 0x145   : > { %2899 = vmatmul.msk.f32.vlgmr.msra.gmra.mxu3 %vm520_vm1, %v584_v18 }
 0x146   : > { %2906 = vmatpush.xpose.msk.msrb.mxu3 %vm520_vm1, %v3558_v25 }
 0x14a   : > { %2907 = vmatpush.xpose.msk.msrb.mxu3 %vm520_vm1, %v3565_v26 }
 0x14e   : > { %2908 = vmatpush.xpose.msk.msrb.mxu3 %vm520_vm1, %v3572_v27 }
 0x152   : > { %2909 = vmatpush.xpose.msk.msrb.mxu3 %vm520_vm1, %v3579_v28 }
 0x1ba   : > { %v542_v19 = vpop.f32.mrf.mxu1 }
 0x1bb   : > { %v545_v20 = vmul.f32 0.35355338, %v542_v19 }
 0x1bd   : > { %v546_v21 = vsel %vm520_vm1, %v545_v20, -inf }
 0x1be   : > { %547 = vmax.xlane.f32.xlu1 %v546_v21 }
 0x1c8   : > { %v608_v22 = vpop.f32.mrf.mxu3 }
 0x1c9   : > { %v611_v23 = vmul.f32 0.35355338, %v608_v22 }
 0x1cb   : > { %v612_v24 = vsel %vm520_vm1, %v611_v23, -inf }
 0x1cc   : > { %613 = vmax.xlane.f32.xlu0 %v612_v24 }
 0x1d7   : > { %623 = vrot.lane.b32.xlu1 %v3537_v15, %s3350_s14  ;;  %s2802_s14 = scalar_lea.sflag [#allocation3], %s429_s27 }
 0x1df   : > { %831 = vrot.lane.b32.xlu1 %v3537_v15, %s3351_s30 }
 0x1e0   : > { %725 = vrot.lane.b32.xlu0 %v3537_v15, %s3352_s15  ;;  %s3354_s15 = smov 64  }
 0x1e8   : > { %829 = vrot.lane.b32.xlu0 %v3537_v15, %s3353_s16 }
 0x231   : > { %v548_v29 = vpop.xlane.xlu1 %547 }
 0x232   : > { %v549_v30 = vsub.f32 %v545_v20, %v548_v29 }
 0x234   : > { %v550_v31 = vmul.f32 1.442695, %v549_v30 }
 0x236   : > { %3261 = vpow2.f32 %v550_v31 }
 0x23c   : > { %v3262_v32 = vpop.eup %3261 }
 0x23d   : > { %v552_v33 = vsel %vm520_vm1, %v3262_v32, 0.0 }
 0x23e   : > { %553 = vadd.xlane.f32.xlu2 %v552_v33  ;;  %v3255_v33 = vld [vmem:[%s4990_s4] ss:$0 sm:$0xff] }
 0x23f   : > { %v614_v36 = vpop.xlane.xlu0 %613 }
 0x240   : > { %v615_v37 = vsub.f32 %v611_v23, %v614_v36 }
 0x242   : > { %v616_v38 = vmul.f32 1.442695, %v615_v37 }
 0x244   : > { %3263 = vpow2.f32 %v616_v38 }
 0x249   : > { %v624_v34 = vpop.permute.xlu1 %623 }
 0x24a   : > { %v3264_v39 = vpop.eup %3263 }
 0x24b   : > { %v618_v40 = vsel %vm520_vm1, %v3264_v39, 0.0 }
 0x251   : > { %v832_v35 = vpop.permute.xlu1 %831 }
 0x252   : > { %2919 = vmatpush.xpose.msk.msra.mxu3 %vm520_vm1, %v832_v35  ;;  %v726_v45 = vpop.permute.xlu0 %725 }
 0x256   : > { %557 = vrot.lane.b32.xlu2 %v3537_v15, %s3354_s15 }
 0x25a   : > { %v830_v51 = vpop.permute.xlu0 %829 }
 0x27f   : > { %619 = vadd.xlane.f32.xlu2 %v618_v40  ;;  %v995_v40 = vld [vmem:[%s4993_s7 + $0x78] sm:$0xff] }
 0x297   : > { %723 = vrot.lane.b32.xlu2 %v3537_v15, %s3355_s20 }
 0x2b1   : > { %v554_v41 = vpop.xlane.xlu2 %553 }
 0x2b2   : > { %3265 = vrcp.f32 %v554_v41  ;;  %v1011_v41 = vld [vmem:[%s4993_s7 + $0xf8] sm:$0xff] }
 0x2b8   : > { %v3266_v42 = vpop.eup %3265 }
 0x2b9   : > { %v558_v43 = vpop.permute.xlu2 %557  ;;  %v556_v44 = vmul.f32 %v3266_v42, %v3262_v32  ;;  %v1027_v42 = vld [vmem:[%s4993_s7 + $0x178] sm:$0xff] }
 0x2ba   : > { %578 = vmatpush.msra.mxu2 %v558_v43  ;;  %v994_v43 = vld [vmem:[%s4993_s7 + $0x70] sm:$0xff] }
 0x2bb   : > { %2897 = vmatmul.msk.f32.vlgmr.msra.gmra.mxu2 %vm520_vm1, %v556_v44  ;;  %v1010_v44 = vld [vmem:[%s4993_s7 + $0xf0] sm:$0xff] }
 0x2bc   : > { %644 = vmatpush.msrb.mxu2 %v624_v34 }
 0x2be   : > { %2911 = vmatpush.xpose.msk.msra.mxu2 %vm520_vm1, %v726_v45 }
 0x2f2   : > { %v620_v46 = vpop.xlane.xlu2 %619 }
 0x2f3   : > { %3267 = vrcp.f32 %v620_v46  ;;  %v1026_v46 = vld [vmem:[%s4993_s7 + $0x170] sm:$0xff] }
 0x2f9   : > { %v3268_v47 = vpop.eup %3267 }
 0x2fa   : > { %v622_v48 = vmul.f32 %v3268_v47, %v3264_v39  ;;  %v724_v49 = vpop.permute.xlu2 %723  ;;  %v3358_v39 = vmov 32.0   ;;  %v1042_v47 = vld [vmem:[%s4993_s7 + $0x1f0] sm:$0xff] }
 0x2fc   : > { %2900 = vmatmul.msk.f32.vlgmr.msrb.gmra.mxu2 %vm520_vm1, %v622_v48 }
 0x304   : > { %2912 = vmatmul.msk.f32.vlgmr.msra.gmra.mxu2 %vm520_vm1, %v724_v49  ;;  %v993_v49 = vld [vmem:[%s4993_s7 + $0x68] sm:$0xff] }
 0x33e   : > { %v580_v50 = vpop.f32.mrf.mxu2 }
 0x33f   : > { %2910 = vmatmul.msk.f32.vlgmr.msrb.gmra.mxu3 %vm520_vm1, %v580_v50  ;;  %v1009_v50 = vld [vmem:[%s4993_s7 + $0xe8] sm:$0xff] }
 0x347   : > { %2920 = vmatmul.msk.f32.vlgmr.msra.gmra.mxu3 %vm520_vm1, %v830_v51  ;;  %v1025_v51 = vld [vmem:[%s4993_s7 + $0x168] sm:$0xff] }
 0x37f   : > { %v3595_v52 = vpop.f32.mrf.mxu2 }
 0x387   : > { %v748_v53 = vpop.f32.mrf.mxu2 }
 0x388   : > { %v751_v54 = vmul.f32 0.35355338, %v748_v53 }
 0x38a   : > { %v752_v55 = vsel %vm520_vm1, %v751_v54, -inf }
 0x38b   : > { %753 = vmax.xlane.f32.xlu1 %v752_v55  ;;  %v1008_v55 = vld [vmem:[%s4993_s7 + $0xe0] sm:$0xff] }
 0x3c2   : > { %v3598_v56 = vpop.f32.mrf.mxu3 }
 0x3ca   : > { %v854_v57 = vpop.f32.mrf.mxu3 }
 0x3cb   : > { %v857_v58 = vmul.f32 0.35355338, %v854_v57  ;;  %v1040_v57 = vld [vmem:[%s4993_s7 + $0x1e0] sm:$0xff] }
 0x3cd   : > { %v858_v59 = vsel %vm520_vm1, %v857_v58, -inf }
 0x3ce   : > { %859 = vmax.xlane.f32.xlu0 %v858_v59  ;;  %v991_v59 = vld [vmem:[%s4993_s7 + $0x58] sm:$0xff] }
 0x3e2   : > { %763 = vrot.lane.b32.xlu0 %v3537_v15, %s3356_s21  ;;  %s2812_s21 = scalar_lea.hbm %s4999_s13, %s3200_s0 }
 0x3e3   : > { %s2816_s22 = sshll.u32 %s2812_s21, 4  ;;  %s2817_s22 = int_to_ptr.hbm [resolvable:$true] %s2816_s22 }
 0x3e4   : > { %s3297_s30 = sshra.s32 %s2817_s22, 4  ;;  %s3298_s30 = int_to_ptr.hbm [resolvable:$true] %s3297_s30 }
 0x3e5   : > { %s3299_s0 = scalar_lea.hbm %s3298_s30, 8  ;;  %p3304_p0 = scmp.lt.s32.totalorder %s3298_s30, %s4999_s13 }
 0x3e6   : > { %p3300_p11 = scmp.ne.s32.totalorder %s3298_s30, %s3299_s0 }
 0x3e8   : > { %p3301_p12 = pnand %p3300_p11, %p3467_p5 }
 0x3ea   : > { %657 = vrot.lane.b32.xlu0 %v3565_v26, %s3347_s23  ;;  %p3302_p13 = pneg %p3301_p12 }
 0x3f2   : > { %901 = vrot.lane.b32.xlu0 %v3558_v25, %s3353_s16 }
 0x3fa   : > { %899 = vrot.lane.b32.xlu0 %v3565_v26, %s3353_s16 }
 0x3fe   : > { %v754_v60 = vpop.xlane.xlu1 %753 }
 0x3ff   : > { %v755_v61 = vsub.f32 %v751_v54, %v754_v60  ;;  %v992_v54 = vld [vmem:[%s4993_s7 + $0x60] sm:$0xff]  ;;  %v1007_v60 = vld [vmem:[%s4993_s7 + $0xd8] sm:$0xff] }
 0x401   : > { %v756_v62 = vmul.f32 1.442695, %v755_v61  ;;  %v1023_v61 = vld [vmem:[%s4993_s7 + $0x158] sm:$0xff] }
 0x402   : > { %897 = vrot.lane.b32.xlu0 %v3572_v27, %s3353_s16 }
 0x403   : > { %3269 = vpow2.f32 %v756_v62  ;;  %v1039_v62 = vld [vmem:[%s4993_s7 + $0x1d8] sm:$0xff] }
 0x409   : > { %v3270_v63 = vpop.eup %3269 }
 0x40a   : > { %v758_v0 = vsel %vm520_vm1, %v3270_v63, 0.0  ;;  %789 = vrot.lane.b32.xlu0 %v3579_v28, %s3355_s20 }
 0x40b   : > { %759 = vadd.xlane.f32.xlu2 %v758_v0  ;;  %v990_v0 = vld [vmem:[%s4993_s7 + $0x50] sm:$0xff] }
 0x423   : > { %659 = vrot.lane.b32.xlu2 %v3558_v25, %s3347_s23 }
 0x42b   : > { %795 = vrot.lane.b32.xlu2 %v3558_v25, %s3355_s20 }
 0x433   : > { %793 = vrot.lane.b32.xlu2 %v3565_v26, %s3355_s20 }
 0x43b   : > { %895 = vrot.lane.b32.xlu2 %v3579_v28, %s3353_s16  ;;  %s431_s16 = scalar_lea.vmem [#allocation2], %s2880_s24  ;;  %s3303_s24 = scalar_lea.hbm %s4999_s13, 16 }
 0x43c   : > { %s2814_s29 = sshll.u32 %s431_s16, 4  ;;  %p3305_p1 = scmp.lt.s32.totalorder %s3303_s24, %s3299_s0  ;;  %s2815_s29 = int_to_ptr.vmem [resolvable:$true] %s2814_s29 }
 0x43e   : > { %p3306_p2 = por %p3305_p1, %p3304_p0 }
 0x440   : > { %p3307_p3 = pnand %p3306_p2, %p3302_p13 }
 0x441   : > { %v860_v1 = vpop.xlane.xlu0 %859 }
 0x442   : > { %v861_v2 = vsub.f32 %v857_v58, %v860_v1  ;;  %v1006_v1 = vld [vmem:[%s4993_s7 + $0xd0] sm:$0xff] }
 0x444   : > { %v862_v3 = vmul.f32 1.442695, %v861_v2  ;;  %v1022_v2 = vld [vmem:[%s4993_s7 + $0x150] sm:$0xff] }
 0x446   : > { %3271 = vpow2.f32 %v862_v3  ;;  %v1038_v3 = vld [vmem:[%s4993_s7 + $0x1d0] sm:$0xff] }
 0x44c   : > { %v3272_v4 = vpop.eup %3271 }
 0x44d   : > { %v864_v5 = vsel %vm520_vm1, %v3272_v4, 0.0 }
 0x44e   : > { %865 = vadd.xlane.f32.xlu1 %v864_v5  ;;  %v989_v5 = vld [vmem:[%s4993_s7 + $0x48] sm:$0xff] }
 0x454   : > { %v764_v6 = vpop.permute.xlu0 %763 }
 0x455   : > { %784 = vmatpush.msrb.mxu2 %v764_v6  ;;  %v1005_v6 = vld [vmem:[%s4993_s7 + $0xc8] sm:$0xff] }
 0x45c   : > { %v658_v11 = vpop.permute.xlu0 %657 }
 0x464   : > { %v902_v14 = vpop.permute.xlu0 %901 }
 0x465   : > { %2922 = vmatpush.xpose.msk.msrb.mxu3 %vm520_vm1, %v902_v14 }
 0x467   : > { %869 = vrot.lane.b32.xlu1 %v3537_v15, %s3357_s17 }
 0x46c   : > { %v900_v15 = vpop.permute.xlu0 %899 }
 0x46d   : > { %2923 = vmatpush.xpose.msk.msrb.mxu3 %vm520_vm1, %v900_v15  ;;  %v1020_v15 = vld [vmem:[%s4993_s7 + $0x140] sm:$0xff] }
 0x46f   : > { %655 = vrot.lane.b32.xlu1 %v3572_v27, %s3347_s23 }
 0x474   : > { %v898_v20 = vpop.permute.xlu0 %897 }
 0x475   : > { %2924 = vmatpush.xpose.msk.msrb.mxu3 %vm520_vm1, %v898_v20 }
 0x477   : > { %653 = vrot.lane.b32.xlu1 %v3579_v28, %s3347_s23 }
 0x47c   : > { %v790_v26 = vpop.permute.xlu0 %789 }
 0x47e   : > { %v760_v7 = vpop.xlane.xlu2 %759 }
 0x47f   : > { %3273 = vrcp.f32 %v760_v7  ;;  %791 = vrot.lane.b32.xlu1 %v3572_v27, %s3355_s20  ;;  %v1021_v7 = vld [vmem:[%s4993_s7 + $0x148] sm:$0xff] }
 0x485   : > { %v3274_v8 = vpop.eup %3273 }
 0x486   : > { %v762_v9 = vmul.f32 %v3274_v8, %v3270_v63  ;;  %v660_v10 = vpop.permute.xlu2 %659  ;;  %v1037_v8 = vld [vmem:[%s4993_s7 + $0x1c8] sm:$0xff] }
 0x487   : > { %2901 = vmatpush.xpose.msk.msrb.mxu1 %vm520_vm1, %v660_v10 }
 0x488   : > { %2913 = vmatmul.msk.f32.vlgmr.msrb.gmra.mxu2 %vm520_vm1, %v762_v9 }
 0x48b   : > { %2902 = vmatpush.xpose.msk.msrb.mxu1 %vm520_vm1, %v658_v11  ;;  %v988_v11 = vld [vmem:[%s4993_s7 + $0x40] sm:$0xff] }
 0x48e   : > { %v796_v19 = vpop.permute.xlu2 %795 }
 0x496   : > { %v794_v22 = vpop.permute.xlu2 %793 }
 0x49e   : > { %v896_v24 = vpop.permute.xlu2 %895 }
 0x49f   : > { %2925 = vmatpush.xpose.msk.msrb.mxu3 %vm520_vm1, %v896_v24  ;;  %v1002_v24 = vld [vmem:[%s4993_s7 + $0xb0] sm:$0xff] }
 0x4a3   : > { %2961 = vmatpush.xpose.msk.msra.mxu3 %vm453_vm0, %v1027_v42  ;;  %v1030_v42 = vld [vmem:[%s4993_s7 + $0x190] sm:$0xff] }
 0x4a7   : > { %2962 = vmatpush.xpose.msk.msra.mxu3 %vm453_vm0, %v1026_v46  ;;  %v980_v46 = vld [vmem:[%s4993_s7] sm:$0xff] }
 0x4ab   : > { %2963 = vmatpush.xpose.msk.msra.mxu3 %vm453_vm0, %v1025_v51  ;;  %v1075_v51 = vld [vmem:[%s4993_s7 + $0x2f8] sm:$0xff] }
 0x4c1   : > { %v866_v13 = vpop.xlane.xlu1 %865 }
 0x4c2   : > { %3275 = vrcp.f32 %v866_v13  ;;  %v1004_v13 = vld [vmem:[%s4993_s7 + $0xc0] sm:$0xff] }
 0x4c3   : > { %3277 = vrcp.f32 %v3358_v39  ;;  %v982_v39 = vld [vmem:[%s4993_s7 + $0x10] sm:$0xff] }
 0x4c8   : > { %v3276_v16 = vpop.eup %3275 }
 0x4c9   : > { %v868_v17 = vmul.f32 %v3276_v16, %v3272_v4  ;;  %v3278_v45 = vpop.eup %3277  ;;  %v1036_v16 = vld [vmem:[%s4993_s7 + $0x1c0] sm:$0xff] }
 0x4ca   : > { %v947_v48 = vmul.f32 32.0, %v3278_v45  ;;  %vm951_vm2 = vweird.f32 %v3278_v45 }
 0x4cc   : > { %v948_v53 = vsub.f32 1.0, %v947_v48  ;;  %v1012_v48 = vld [vmem:[%s4993_s7 + $0x100] sm:$0xff] }
 0x4ce   : > { %v949_v58 = vmul.f32 %v3278_v45, %v948_v53  ;;  %v1107_v53 = vld [vmem:[%s4993_s7 + $0x3f8] sm:$0xff] }
 0x4d0   : > { %v950_v63 = vadd.f32 %v3278_v45, %v949_v58  ;;  %v1057_v58 = vld [vmem:[%s4993_s7 + $0x268] sm:$0xff] }
 0x4d2   : > { %v3750_v4 = vsel %vm951_vm2, %v3278_v45, %v950_v63  ;;  %v1029_v45 = vld [vmem:[%s4993_s7 + $0x188] sm:$0xff]  ;;  %v1072_v63 = vld [vmem:[%s4993_s7 + $0x2e0] sm:$0xff] }
 0x4d9   : > { %v870_v18 = vpop.permute.xlu1 %869 }
 0x4da   : > { %890 = vmatpush.msra.mxu2 %v870_v18  ;;  %v987_v18 = vld [vmem:[%s4993_s7 + $0x38] sm:$0xff] }
 0x4db   : > { %2921 = vmatmul.msk.f32.vlgmr.msra.gmra.mxu2 %vm520_vm1, %v868_v17 }
 0x4dc   : > { %2927 = vmatpush.xpose.msk.msrb.mxu2 %vm453_vm0, %v995_v40  ;;  %v998_v40 = vld [vmem:[%s4993_s7 + $0x90] sm:$0xff] }
 0x4e0   : > { %2928 = vmatpush.xpose.msk.msrb.mxu2 %vm453_vm0, %v994_v43  ;;  %v997_v43 = vld [vmem:[%s4993_s7 + $0x88] sm:$0xff] }
 0x4e1   : > { %v656_v21 = vpop.permute.xlu1 %655 }
 0x4e2   : > { %2903 = vmatpush.xpose.msk.msrb.mxu1 %vm520_vm1, %v656_v21  ;;  %v1019_v21 = vld [vmem:[%s4993_s7 + $0x138] sm:$0xff] }
 0x4e4   : > { %2929 = vmatpush.xpose.msk.msrb.mxu2 %vm453_vm0, %v993_v49  ;;  %v1028_v49 = vld [vmem:[%s4993_s7 + $0x180] sm:$0xff] }
 0x4e8   : > { %2930 = vmatpush.xpose.msk.msrb.mxu2 %vm453_vm0, %v992_v54  ;;  %v1058_v54 = vld [vmem:[%s4993_s7 + $0x270] sm:$0xff] }
 0x4e9   : > { %v654_v23 = vpop.permute.xlu1 %653 }
 0x4ea   : > { %2904 = vmatpush.xpose.msk.msrb.mxu1 %vm520_vm1, %v654_v23  ;;  %v986_v23 = vld [vmem:[%s4993_s7 + $0x30] sm:$0xff] }
 0x4ec   : > { %2931 = vmatpush.xpose.msk.msrb.mxu2 %vm453_vm0, %v991_v59  ;;  %v1073_v59 = vld [vmem:[%s4993_s7 + $0x2e8] sm:$0xff] }
 0x4ed   : > { %2905 = vmatmul.msk.f32.vlgmr.msrb.gmra.mxu1 %vm520_vm1, %v3595_v52  ;;  %v1041_v52 = vld [vmem:[%s4993_s7 + $0x1e8] sm:$0xff] }
 0x4ee   : > { %2914 = vmatpush.xpose.msk.msra.mxu1 %vm520_vm1, %v796_v19  ;;  %v1003_v19 = vld [vmem:[%s4993_s7 + $0xb8] sm:$0xff] }
 0x4f0   : > { %2932 = vmatpush.xpose.msk.msrb.mxu2 %vm453_vm0, %v990_v0  ;;  %v1088_v0 = vld [vmem:[%s4993_s7 + $0x360] sm:$0xff] }
 0x4f1   : > { %v792_v25 = vpop.permute.xlu1 %791 }
 0x4f2   : > { %2915 = vmatpush.xpose.msk.msra.mxu1 %vm520_vm1, %v794_v22  ;;  %v1035_v22 = vld [vmem:[%s4993_s7 + $0x1b8] sm:$0xff] }
 0x4f4   : > { %2933 = vmatpush.xpose.msk.msrb.mxu2 %vm453_vm0, %v989_v5  ;;  %v1087_v5 = vld [vmem:[%s4993_s7 + $0x358] sm:$0xff] }
 0x4f6   : > { %2916 = vmatpush.xpose.msk.msra.mxu1 %vm520_vm1, %v792_v25  ;;  %v1018_v25 = vld [vmem:[%s4993_s7 + $0x130] sm:$0xff] }
 0x4f8   : > { %2934 = vmatpush.xpose.msk.msrb.mxu2 %vm453_vm0, %v988_v11  ;;  %v1053_v11 = vld [vmem:[%s4993_s7 + $0x248] sm:$0xff] }
 0x4fa   : > { %2917 = vmatpush.xpose.msk.msra.mxu1 %vm520_vm1, %v790_v26  ;;  %v1034_v26 = vld [vmem:[%s4993_s7 + $0x1b0] sm:$0xff] }
 0x4fc   : > { %2935 = vmatpush.xpose.msk.msrb.mxu2 %vm453_vm0, %v987_v18  ;;  %v1068_v18 = vld [vmem:[%s4993_s7 + $0x2c0] sm:$0xff] }
 0x4fe   : > { %2944 = vmatpush.xpose.msk.msrb.mxu1 %vm453_vm0, %v1011_v41  ;;  %v1014_v41 = vld [vmem:[%s4993_s7 + $0x110] sm:$0xff] }
 0x500   : > { %2936 = vmatpush.xpose.msk.msrb.mxu2 %vm453_vm0, %v986_v23  ;;  %v1083_v23 = vld [vmem:[%s4993_s7 + $0x338] sm:$0xff] }
 0x502   : > { %2945 = vmatpush.xpose.msk.msrb.mxu1 %vm453_vm0, %v1010_v44  ;;  %v1013_v44 = vld [vmem:[%s4993_s7 + $0x108] sm:$0xff] }
 0x506   : > { %2946 = vmatpush.xpose.msk.msrb.mxu1 %vm453_vm0, %v1009_v50  ;;  %v1059_v50 = vld [vmem:[%s4993_s7 + $0x278] sm:$0xff] }
 0x50a   : > { %2947 = vmatpush.xpose.msk.msrb.mxu1 %vm453_vm0, %v1008_v55  ;;  %v1074_v55 = vld [vmem:[%s4993_s7 + $0x2f0] sm:$0xff] }
 0x50b   : > { %v786_v27 = vpop.f32.mrf.mxu2 }
 0x50c   : > { %2918 = vmatmul.msk.f32.vlgmr.msra.gmra.mxu1 %vm520_vm1, %v786_v27  ;;  %v985_v27 = vld [vmem:[%s4993_s7 + $0x28] sm:$0xff] }
 0x50d   : > { %2937 = vmatpush.xpose.msk.msrb.mxu2 %vm453_vm0, %v985_v27  ;;  %v1082_v27 = vld [vmem:[%s4993_s7 + $0x330] sm:$0xff] }
 0x50e   : > { %2948 = vmatpush.xpose.msk.msrb.mxu1 %vm453_vm0, %v1007_v60  ;;  %v1089_v60 = vld [vmem:[%s4993_s7 + $0x368] sm:$0xff] }
 0x512   : > { %2949 = vmatpush.xpose.msk.msrb.mxu1 %vm453_vm0, %v1006_v1  ;;  %v1104_v1 = vld [vmem:[%s4993_s7 + $0x3e0] sm:$0xff] }
 0x516   : > { %2950 = vmatpush.xpose.msk.msrb.mxu1 %vm453_vm0, %v1005_v6  ;;  %v1103_v6 = vld [vmem:[%s4993_s7 + $0x3d8] sm:$0xff] }
 0x51a   : > { %2951 = vmatpush.xpose.msk.msrb.mxu1 %vm453_vm0, %v1004_v13  ;;  %v1069_v13 = vld [vmem:[%s4993_s7 + $0x2c8] sm:$0xff] }
 0x51e   : > { %2952 = vmatpush.xpose.msk.msrb.mxu1 %vm453_vm0, %v1003_v19  ;;  %v1084_v19 = vld [vmem:[%s4993_s7 + $0x340] sm:$0xff] }
 0x522   : > { %2953 = vmatpush.xpose.msk.msrb.mxu1 %vm453_vm0, %v1002_v24  ;;  %v1099_v24 = vld [vmem:[%s4993_s7 + $0x3b8] sm:$0xff] }
 0x55e   : > { %v892_v28 = vpop.f32.mrf.mxu2 }
 0x55f   : > { %2926 = vmatmul.msk.f32.vlgmr.msrb.gmra.mxu3 %vm520_vm1, %v892_v28  ;;  %v1001_v28 = vld [vmem:[%s4993_s7 + $0xa8] sm:$0xff] }
 0x560   : > { %2954 = vmatpush.xpose.msk.msrb.mxu1 %vm453_vm0, %v1001_v28  ;;  %v1098_v28 = vld [vmem:[%s4993_s7 + $0x3b0] sm:$0xff] }
 0x56a   : > { %v689_v29 = vpop.f32.mrf.mxu1 }
 0x56b   : > { %v721_v31 = vadd.f32 %v3598_v56, %v689_v29  ;;  %v1024_v56 = vld [vmem:[%s4993_s7 + $0x160] sm:$0xff]  ;;  %v1017_v29 = vld [vmem:[%s4993_s7 + $0x128] sm:$0xff] }
 0x56c   : > { %2964 = vmatpush.xpose.msk.msra.mxu3 %vm453_vm0, %v1024_v56  ;;  %v1090_v56 = vld [vmem:[%s4993_s7 + $0x370] sm:$0xff] }
 0x570   : > { %2965 = vmatpush.xpose.msk.msra.mxu3 %vm453_vm0, %v1023_v61  ;;  %v1105_v61 = vld [vmem:[%s4993_s7 + $0x3e8] sm:$0xff] }
 0x574   : > { %2966 = vmatpush.xpose.msk.msra.mxu3 %vm453_vm0, %v1022_v2  ;;  %v1055_v2 = vld [vmem:[%s4993_s7 + $0x258] sm:$0xff] }
 0x578   : > { %2967 = vmatpush.xpose.msk.msra.mxu3 %vm453_vm0, %v1021_v7  ;;  %v1054_v7 = vld [vmem:[%s4993_s7 + $0x250] sm:$0xff] }
 0x57c   : > { %2968 = vmatpush.xpose.msk.msra.mxu3 %vm453_vm0, %v1020_v15  ;;  %v1085_v15 = vld [vmem:[%s4993_s7 + $0x348] sm:$0xff] }
 0x580   : > { %2969 = vmatpush.xpose.msk.msra.mxu3 %vm453_vm0, %v1019_v21  ;;  %v1051_v21 = vld [vmem:[%s4993_s7 + $0x238] sm:$0xff] }
 0x584   : > { %2970 = vmatpush.xpose.msk.msra.mxu3 %vm453_vm0, %v1018_v25  ;;  %v1050_v25 = vld [vmem:[%s4993_s7 + $0x230] sm:$0xff] }
 0x588   : > { %2971 = vmatpush.xpose.msk.msra.mxu3 %vm453_vm0, %v1017_v29  ;;  %v1049_v29 = vld [vmem:[%s4993_s7 + $0x228] sm:$0xff] }
 0x589   : > { %v825_v30 = vpop.f32.mrf.mxu1 }
 0x58a   : > { %v828_v32 = vadd.f32 %v825_v30, %v721_v31  ;;  %v1033_v30 = vld [vmem:[%s4993_s7 + $0x1a8] sm:$0xff]  ;;  %v984_v31 = vld [vmem:[%s4993_s7 + $0x20] sm:$0xff] }
 0x58b   : > { %2938 = vmatpush.xpose.msk.msrb.mxu2 %vm453_vm0, %v984_v31  ;;  %v1081_v31 = vld [vmem:[%s4993_s7 + $0x328] sm:$0xff] }
 0x5e2   : > { %v931_v34 = vpop.f32.mrf.mxu3 }
 0x5e3   : > { %v934_v35 = vadd.f32 %v931_v34, %v828_v32  ;;  %v1000_v32 = vld [vmem:[%s4993_s7 + $0xa0] sm:$0xff] }
 0x5e4   : > { %v1032_v34 = vld [vmem:[%s4993_s7 + $0x1a0] sm:$0xff]  ;;  %2955 = vmatpush.xpose.msk.msrb.mxu1 %vm453_vm0, %v1000_v32  ;;  %v1097_v32 = vld [vmem:[%s4993_s7 + $0x3a8] sm:$0xff] }
 0x5e5   : > { %v939_v36 = vadd.f32 %v3255_v33, %v934_v35  ;;  %v1016_v33 = vld [vmem:[%s4993_s7 + $0x120] sm:$0xff]  ;;  %v983_v35 = vld [vmem:[%s4993_s7 + $0x18] sm:$0xff] }
 0x5e6   : > { %2972 = vmatpush.xpose.msk.msra.mxu3 %vm453_vm0, %v1016_v33  ;;  %2939 = vmatpush.xpose.msk.msrb.mxu2 %vm453_vm0, %v983_v35  ;;  %v1048_v33 = vld [vmem:[%s4993_s7 + $0x220] sm:$0xff] }
 0x5e7   : > { %v3652_v37 = vadd.f32 %v939_v36, %v3530_v12  ;;  %v1043_v12 = vld [vmem:[%s4993_s7 + $0x1f8] sm:$0xff]  ;;  %v1080_v35 = vld [vmem:[%s4993_s7 + $0x320] sm:$0xff] }
 0x5e8   : > { %2978 = vmatpush.xpose.msk.msrb.mxu0 %vm453_vm0, %v1043_v12  ;;  %v999_v36 = vld [vmem:[%s4993_s7 + $0x98] sm:$0xff]  ;;  %v981_v12 = vld [vmem:[%s4993_s7 + $0x8] sm:$0xff] }
 0x5e9   : > { %v943_v38 = vsel %vm453_vm0, %v3652_v37, 0.0  ;;  %2956 = vmatpush.xpose.msk.msrb.mxu1 %vm453_vm0, %v999_v36  ;;  %v1096_v36 = vld [vmem:[%s4993_s7 + $0x3a0] sm:$0xff] }
 0x5ea   : > { %944 = vadd.xlane.f32.xlu1 %v943_v38  ;;  %v1031_v38 = vld [vmem:[%s4993_s7 + $0x198] sm:$0xff]  ;;  %2940 = vmatpush.xpose.msk.msrb.mxu2 %vm453_vm0, %v982_v39 }
 0x5eb   : > { %v1079_v39 = vld [vmem:[%s4993_s7 + $0x318] sm:$0xff] }
 0x5ec   : > { %2979 = vmatpush.xpose.msk.msrb.mxu0 %vm453_vm0, %v1042_v47  ;;  %v996_v47 = vld [vmem:[%s4993_s7 + $0x80] sm:$0xff] }
 0x5ed   : > { %2957 = vmatpush.xpose.msk.msrb.mxu1 %vm453_vm0, %v998_v40  ;;  %v1095_v40 = vld [vmem:[%s4993_s7 + $0x398] sm:$0xff] }
 0x5ee   : > { %2941 = vmatpush.xpose.msk.msrb.mxu2 %vm453_vm0, %v981_v12  ;;  %v1078_v12 = vld [vmem:[%s4993_s7 + $0x310] sm:$0xff] }
 0x5f0   : > { %2980 = vmatpush.xpose.msk.msrb.mxu0 %vm453_vm0, %v1041_v52  ;;  %v1091_v52 = vld [vmem:[%s4993_s7 + $0x378] sm:$0xff] }
 0x5f1   : > { %2958 = vmatpush.xpose.msk.msrb.mxu1 %vm453_vm0, %v997_v43  ;;  %v1094_v43 = vld [vmem:[%s4993_s7 + $0x390] sm:$0xff] }
 0x5f2   : > { %2942 = vmatpush.xpose.msk.msrb.mxu2 %vm453_vm0, %v980_v46  ;;  %v1077_v46 = vld [vmem:[%s4993_s7 + $0x308] sm:$0xff] }
 0x5f4   : > { %2981 = vmatpush.xpose.msk.msrb.mxu0 %vm453_vm0, %v1040_v57  ;;  %v1106_v57 = vld [vmem:[%s4993_s7 + $0x3f0] sm:$0xff] }
 0x5f5   : > { %2959 = vmatpush.xpose.msk.msrb.mxu1 %vm453_vm0, %v996_v47  ;;  %v1093_v47 = vld [vmem:[%s4993_s7 + $0x388] sm:$0xff] }
 0x5f6   : > { %2995 = vmatpush.xpose.msk.msra.mxu2 %vm453_vm0, %v1059_v50  ;;  %v1076_v50 = vld [vmem:[%s4993_s7 + $0x300] sm:$0xff] }
 0x5f8   : > { %2982 = vmatpush.xpose.msk.msrb.mxu0 %vm453_vm0, %v1039_v62  ;;  %v1056_v62 = vld [vmem:[%s4993_s7 + $0x260] sm:$0xff] }
 0x5f9   : > { %3012 = vmatpush.xpose.msk.msra.mxu1 %vm453_vm0, %v1075_v51  ;;  %v1092_v51 = vld [vmem:[%s4993_s7 + $0x380] sm:$0xff] }
 0x5fa   : > { %2996 = vmatpush.xpose.msk.msra.mxu2 %vm453_vm0, %v1058_v54 }
 0x5fc   : > { %2983 = vmatpush.xpose.msk.msrb.mxu0 %vm453_vm0, %v1038_v3  ;;  %v1071_v3 = vld [vmem:[%s4993_s7 + $0x2d8] sm:$0xff] }
 0x5fd   : > { %3013 = vmatpush.xpose.msk.msra.mxu1 %vm453_vm0, %v1074_v55 }
 0x5fe   : > { %2997 = vmatpush.xpose.msk.msra.mxu2 %vm453_vm0, %v1057_v58 }
 0x600   : > { %2984 = vmatpush.xpose.msk.msrb.mxu0 %vm453_vm0, %v1037_v8  ;;  %v1070_v8 = vld [vmem:[%s4993_s7 + $0x2d0] sm:$0xff] }
 0x601   : > { %3014 = vmatpush.xpose.msk.msra.mxu1 %vm453_vm0, %v1073_v59 }
 0x602   : > { %2998 = vmatpush.xpose.msk.msra.mxu2 %vm453_vm0, %v1056_v62 }
 0x604   : > { %2985 = vmatpush.xpose.msk.msrb.mxu0 %vm453_vm0, %v1036_v16  ;;  %v1101_v16 = vld [vmem:[%s4993_s7 + $0x3c8] sm:$0xff] }
 0x605   : > { %3015 = vmatpush.xpose.msk.msra.mxu1 %vm453_vm0, %v1072_v63  ;;  %v3257_v63 = vld [vmem:[%s4992_s6] ss:$0 sm:$0xff] }
 0x606   : > { %2999 = vmatpush.xpose.msk.msra.mxu2 %vm453_vm0, %v1055_v2 }
 0x608   : > { %2986 = vmatpush.xpose.msk.msrb.mxu0 %vm453_vm0, %v1035_v22  ;;  %v1067_v22 = vld [vmem:[%s4993_s7 + $0x2b8] sm:$0xff] }
 0x609   : > { %3016 = vmatpush.xpose.msk.msra.mxu1 %vm453_vm0, %v1071_v3  ;;  %v1123_v3 = vld [vmem:[%s4993_s7 + $0x478] sm:$0xff] }
 0x60a   : > { %3000 = vmatpush.xpose.msk.msra.mxu2 %vm453_vm0, %v1054_v7  ;;  %v1122_v7 = vld [vmem:[%s4993_s7 + $0x470] sm:$0xff] }
 0x60c   : > { %2987 = vmatpush.xpose.msk.msrb.mxu0 %vm453_vm0, %v1034_v26  ;;  %v1066_v26 = vld [vmem:[%s4993_s7 + $0x2b0] sm:$0xff] }
 0x60d   : > { %3017 = vmatpush.xpose.msk.msra.mxu1 %vm453_vm0, %v1070_v8  ;;  %v1138_v8 = vld [vmem:[%s4993_s7 + $0x4f0] sm:$0xff] }
 0x60e   : > { %3001 = vmatpush.xpose.msk.msra.mxu2 %vm453_vm0, %v1053_v11  ;;  %v1121_v11 = vld [vmem:[%s4993_s7 + $0x468] sm:$0xff] }
 0x610   : > { %2988 = vmatpush.xpose.msk.msrb.mxu0 %vm453_vm0, %v1033_v30  ;;  %v1065_v30 = vld [vmem:[%s4993_s7 + $0x2a8] sm:$0xff] }
 0x611   : > { %3018 = vmatpush.xpose.msk.msra.mxu1 %vm453_vm0, %v1069_v13  ;;  %v1137_v13 = vld [vmem:[%s4993_s7 + $0x4e8] sm:$0xff] }
 0x614   : > { %2989 = vmatpush.xpose.msk.msrb.mxu0 %vm453_vm0, %v1032_v34  ;;  %v1064_v34 = vld [vmem:[%s4993_s7 + $0x2a0] sm:$0xff] }
 0x615   : > { %3019 = vmatpush.xpose.msk.msra.mxu1 %vm453_vm0, %v1068_v18  ;;  %v1136_v18 = vld [vmem:[%s4993_s7 + $0x4e0] sm:$0xff] }
 0x618   : > { %2990 = vmatpush.xpose.msk.msrb.mxu0 %vm453_vm0, %v1031_v38  ;;  %v1063_v38 = vld [vmem:[%s4993_s7 + $0x298] sm:$0xff] }
 0x619   : > { %3020 = vmatpush.xpose.msk.msra.mxu1 %vm453_vm0, %v1067_v22  ;;  %v1135_v22 = vld [vmem:[%s4993_s7 + $0x4d8] sm:$0xff] }
 0x61c   : > { %2991 = vmatpush.xpose.msk.msrb.mxu0 %vm453_vm0, %v1030_v42  ;;  %v1062_v42 = vld [vmem:[%s4993_s7 + $0x290] sm:$0xff] }
 0x61d   : > { %3021 = vmatpush.xpose.msk.msra.mxu1 %vm453_vm0, %v1066_v26  ;;  %v1134_v26 = vld [vmem:[%s4993_s7 + $0x4d0] sm:$0xff] }
 0x620   : > { %2992 = vmatpush.xpose.msk.msrb.mxu0 %vm453_vm0, %v1029_v45  ;;  %v1061_v45 = vld [vmem:[%s4993_s7 + $0x288] sm:$0xff] }
 0x621   : > { %3022 = vmatpush.xpose.msk.msra.mxu1 %vm453_vm0, %v1065_v30  ;;  %v1133_v30 = vld [vmem:[%s4993_s7 + $0x4c8] sm:$0xff] }
 0x624   : > { %2993 = vmatpush.xpose.msk.msrb.mxu0 %vm453_vm0, %v1028_v49  ;;  %v1060_v49 = vld [vmem:[%s4993_s7 + $0x280] sm:$0xff] }
 0x625   : > { %3023 = vmatpush.xpose.msk.msra.mxu1 %vm453_vm0, %v1064_v34  ;;  %v1132_v34 = vld [vmem:[%s4993_s7 + $0x4c0] sm:$0xff] }
 0x628   : > { %3046 = vmatpush.xpose.msk.msra.mxu0 %vm453_vm0, %v1107_v53 }
 0x629   : > { %3024 = vmatpush.xpose.msk.msra.mxu1 %vm453_vm0, %v1063_v38  ;;  %v1131_v38 = vld [vmem:[%s4993_s7 + $0x4b8] sm:$0xff] }
 0x62c   : > { %3047 = vmatpush.xpose.msk.msra.mxu0 %vm453_vm0, %v1106_v57 }
 0x62d   : > { %3025 = vmatpush.xpose.msk.msra.mxu1 %vm453_vm0, %v1062_v42  ;;  %v1130_v42 = vld [vmem:[%s4993_s7 + $0x4b0] sm:$0xff] }
 0x630   : > { %3048 = vmatpush.xpose.msk.msra.mxu0 %vm453_vm0, %v1105_v61  ;;  %v3256_v61 = vld [vmem:[%s4991_s5] ss:$0 sm:$0xff] }
 0x631   : > { %3026 = vmatpush.xpose.msk.msra.mxu1 %vm453_vm0, %v1061_v45  ;;  %v1129_v45 = vld [vmem:[%s4993_s7 + $0x4a8] sm:$0xff] }
 0x634   : > { %3049 = vmatpush.xpose.msk.msra.mxu0 %vm453_vm0, %v1104_v1 }
 0x635   : > { %3027 = vmatpush.xpose.msk.msra.mxu1 %vm453_vm0, %v1060_v49  ;;  %v1128_v49 = vld [vmem:[%s4993_s7 + $0x4a0] sm:$0xff] }
 0x638   : > { %3050 = vmatpush.xpose.msk.msra.mxu0 %vm453_vm0, %v1103_v6  ;;  %v1171_v6 = vld [vmem:[%s4993_s7 + $0x5f8] sm:$0xff] }
 0x65d   : > { %v945_v9 = vpop.xlane.xlu1 %944 }
 0x65e   : > { %v953_v10 = vmul.f32 %v3750_v4, %v945_v9  ;;  %v1086_v9 = vld [vmem:[%s4993_s7 + $0x350] sm:$0xff] }
 0x660   : > { %v3778_v14 = vsub.f32 %v3652_v37, %v953_v10  ;;  %v1015_v37 = vld [vmem:[%s4993_s7 + $0x118] sm:$0xff]  ;;  %v1102_v10 = vld [vmem:[%s4993_s7 + $0x3d0] sm:$0xff] }
 0x661   : > { %2973 = vmatpush.xpose.msk.msra.mxu3 %vm453_vm0, %v1015_v37  ;;  %3051 = vmatpush.xpose.msk.msra.mxu0 %vm453_vm0, %v1102_v10  ;;  %v1047_v37 = vld [vmem:[%s4993_s7 + $0x218] sm:$0xff]  ;;  %v1170_v10 = vld [vmem:[%s4993_s7 + $0x5f0] sm:$0xff] }
 0x662   : > { %v955_v17 = vmul.f32 %v3778_v14, %v3778_v14 }
 0x664   : > { %v956_v20 = vsel %vm453_vm0, %v955_v17, 0.0  ;;  %v1052_v17 = vld [vmem:[%s4993_s7 + $0x240] sm:$0xff] }
 0x665   : > { %957 = vadd.xlane.f32.xlu2 %v956_v20  ;;  %2974 = vmatpush.xpose.msk.msra.mxu3 %vm453_vm0, %v1014_v41  ;;  %v1100_v20 = vld [vmem:[%s4993_s7 + $0x3c0] sm:$0xff]  ;;  %v1046_v41 = vld [vmem:[%s4993_s7 + $0x210] sm:$0xff] }
 0x666   : > { %3052 = vmatpush.xpose.msk.msra.mxu0 %vm453_vm0, %v1101_v16  ;;  %3002 = vmatpush.xpose.msk.msra.mxu2 %vm453_vm0, %v1052_v17  ;;  %v1169_v16 = vld [vmem:[%s4993_s7 + $0x5e8] sm:$0xff]  ;;  %v1120_v17 = vld [vmem:[%s4993_s7 + $0x460] sm:$0xff] }
 0x669   : > { %2975 = vmatpush.xpose.msk.msra.mxu3 %vm453_vm0, %v1013_v44  ;;  %v1045_v44 = vld [vmem:[%s4993_s7 + $0x208] sm:$0xff] }
 0x66a   : > { %3053 = vmatpush.xpose.msk.msra.mxu0 %vm453_vm0, %v1100_v20  ;;  %3003 = vmatpush.xpose.msk.msra.mxu2 %vm453_vm0, %v1051_v21  ;;  %v1168_v20 = vld [vmem:[%s4993_s7 + $0x5e0] sm:$0xff]  ;;  %v1119_v21 = vld [vmem:[%s4993_s7 + $0x458] sm:$0xff] }
 0x66d   : > { %2976 = vmatpush.xpose.msk.msra.mxu3 %vm453_vm0, %v1012_v48  ;;  %v1044_v48 = vld [vmem:[%s4993_s7 + $0x200] sm:$0xff] }
 0x66e   : > { %3054 = vmatpush.xpose.msk.msra.mxu0 %vm453_vm0, %v1099_v24  ;;  %3004 = vmatpush.xpose.msk.msra.mxu2 %vm453_vm0, %v1050_v25  ;;  %v1167_v24 = vld [vmem:[%s4993_s7 + $0x5d8] sm:$0xff]  ;;  %v1118_v25 = vld [vmem:[%s4993_s7 + $0x450] sm:$0xff] }
 0x671   : > { %3029 = vmatpush.xpose.msk.msrb.mxu3 %vm453_vm0, %v1091_v52 }
 0x672   : > { %3055 = vmatpush.xpose.msk.msra.mxu0 %vm453_vm0, %v1098_v28  ;;  %3005 = vmatpush.xpose.msk.msra.mxu2 %vm453_vm0, %v1049_v29  ;;  %v1166_v28 = vld [vmem:[%s4993_s7 + $0x5d0] sm:$0xff]  ;;  %v1117_v29 = vld [vmem:[%s4993_s7 + $0x448] sm:$0xff] }
 0x675   : > { %3030 = vmatpush.xpose.msk.msrb.mxu3 %vm453_vm0, %v1090_v56 }
 0x676   : > { %3056 = vmatpush.xpose.msk.msra.mxu0 %vm453_vm0, %v1097_v32  ;;  %3006 = vmatpush.xpose.msk.msra.mxu2 %vm453_vm0, %v1048_v33  ;;  %v1165_v32 = vld [vmem:[%s4993_s7 + $0x5c8] sm:$0xff]  ;;  %v1116_v33 = vld [vmem:[%s4993_s7 + $0x440] sm:$0xff] }
 0x679   : > { %3031 = vmatpush.xpose.msk.msrb.mxu3 %vm453_vm0, %v1089_v60 }
 0x67a   : > { %3057 = vmatpush.xpose.msk.msra.mxu0 %vm453_vm0, %v1096_v36  ;;  %3007 = vmatpush.xpose.msk.msra.mxu2 %vm453_vm0, %v1047_v37  ;;  %v1164_v36 = vld [vmem:[%s4993_s7 + $0x5c0] sm:$0xff]  ;;  %v1115_v37 = vld [vmem:[%s4993_s7 + $0x438] sm:$0xff] }
 0x67d   : > { %3032 = vmatpush.xpose.msk.msrb.mxu3 %vm453_vm0, %v1088_v0 }
 0x67e   : > { %3058 = vmatpush.xpose.msk.msra.mxu0 %vm453_vm0, %v1095_v40  ;;  %3008 = vmatpush.xpose.msk.msra.mxu2 %vm453_vm0, %v1046_v41  ;;  %v1163_v40 = vld [vmem:[%s4993_s7 + $0x5b8] sm:$0xff]  ;;  %v1114_v41 = vld [vmem:[%s4993_s7 + $0x430] sm:$0xff] }
 0x681   : > { %3033 = vmatpush.xpose.msk.msrb.mxu3 %vm453_vm0, %v1087_v5  ;;  %v1139_v5 = vld [vmem:[%s4993_s7 + $0x4f8] sm:$0xff] }
 0x682   : > { %3059 = vmatpush.xpose.msk.msra.mxu0 %vm453_vm0, %v1094_v43  ;;  %3009 = vmatpush.xpose.msk.msra.mxu2 %vm453_vm0, %v1045_v44  ;;  %v1162_v43 = vld [vmem:[%s4993_s7 + $0x5b0] sm:$0xff]  ;;  %v1113_v44 = vld [vmem:[%s4993_s7 + $0x428] sm:$0xff] }
 0x685   : > { %3034 = vmatpush.xpose.msk.msrb.mxu3 %vm453_vm0, %v1086_v9  ;;  %v1154_v9 = vld [vmem:[%s4993_s7 + $0x570] sm:$0xff] }
 0x686   : > { %3060 = vmatpush.xpose.msk.msra.mxu0 %vm453_vm0, %v1093_v47  ;;  %3010 = vmatpush.xpose.msk.msra.mxu2 %vm453_vm0, %v1044_v48  ;;  %v1161_v47 = vld [vmem:[%s4993_s7 + $0x5a8] sm:$0xff]  ;;  %v1112_v48 = vld [vmem:[%s4993_s7 + $0x420] sm:$0xff] }
 0x689   : > { %3035 = vmatpush.xpose.msk.msrb.mxu3 %vm453_vm0, %v1085_v15  ;;  %v1153_v15 = vld [vmem:[%s4993_s7 + $0x568] sm:$0xff] }
 0x68a   : > { %3061 = vmatpush.xpose.msk.msra.mxu0 %vm453_vm0, %v1092_v51  ;;  %v1160_v51 = vld [vmem:[%s4993_s7 + $0x5a0] sm:$0xff] }
 0x68d   : > { %3036 = vmatpush.xpose.msk.msrb.mxu3 %vm453_vm0, %v1084_v19  ;;  %v1152_v19 = vld [vmem:[%s4993_s7 + $0x560] sm:$0xff] }
 0x691   : > { %3037 = vmatpush.xpose.msk.msrb.mxu3 %vm453_vm0, %v1083_v23  ;;  %v1151_v23 = vld [vmem:[%s4993_s7 + $0x558] sm:$0xff] }
 0x695   : > { %3038 = vmatpush.xpose.msk.msrb.mxu3 %vm453_vm0, %v1082_v27  ;;  %v1150_v27 = vld [vmem:[%s4993_s7 + $0x550] sm:$0xff] }
 0x699   : > { %3039 = vmatpush.xpose.msk.msrb.mxu3 %vm453_vm0, %v1081_v31  ;;  %v1149_v31 = vld [vmem:[%s4993_s7 + $0x548] sm:$0xff] }
 0x69d   : > { %3040 = vmatpush.xpose.msk.msrb.mxu3 %vm453_vm0, %v1080_v35  ;;  %v1148_v35 = vld [vmem:[%s4993_s7 + $0x540] sm:$0xff] }
 0x6a1   : > { %3041 = vmatpush.xpose.msk.msrb.mxu3 %vm453_vm0, %v1079_v39  ;;  %v1147_v39 = vld [vmem:[%s4993_s7 + $0x538] sm:$0xff] }
 0x6a5   : > { %3042 = vmatpush.xpose.msk.msrb.mxu3 %vm453_vm0, %v1078_v12  ;;  %v1146_v12 = vld [vmem:[%s4993_s7 + $0x530] sm:$0xff] }
 0x6a9   : > { %3043 = vmatpush.xpose.msk.msrb.mxu3 %vm453_vm0, %v1077_v46  ;;  %v1145_v46 = vld [vmem:[%s4993_s7 + $0x528] sm:$0xff] }
 0x6ad   : > { %3044 = vmatpush.xpose.msk.msrb.mxu3 %vm453_vm0, %v1076_v50  ;;  %v1144_v50 = vld [vmem:[%s4993_s7 + $0x520] sm:$0xff] }
 0x6d8   : > { %v958_v52 = vpop.xlane.xlu2 %957 }
 0x6d9   : > { %v959_v53 = vmul.f32 %v958_v52, %v3750_v4  ;;  %v1111_v52 = vld [vmem:[%s4993_s7 + $0x418] sm:$0xff] }
 0x6db   : > { %v960_v54 = vadd.f32 1e-05, %v959_v53  ;;  %v1127_v53 = vld [vmem:[%s4993_s7 + $0x498] sm:$0xff] }
 0x6dd   : > { %3279 = vrsqrt.f32 %v960_v54  ;;  %vm967_vm4 = vweird.f32 %v960_v54 }
 0x6e3   : > { %v3280_v55 = vpop.eup %3279 }
 0x6e4   : > { %v962_v56 = vmul.f32 %v3280_v55, %v960_v54  ;;  %vm968_vm3 = vweird.f32 %v3280_v55  ;;  %v1143_v54 = vld [vmem:[%s4993_s7 + $0x518] sm:$0xff] }
 0x6e5   : > { %vm969_vm5 = vmor %vm967_vm4, %vm968_vm3 }
 0x6e6   : > { %v963_v57 = vmul.f32 %v3280_v55, %v962_v56  ;;  %v1110_v56 = vld [vmem:[%s4993_s7 + $0x410] sm:$0xff] }
 0x6e8   : > { %v964_v58 = vmul.f32 0.5, %v963_v57  ;;  %v1126_v57 = vld [vmem:[%s4993_s7 + $0x490] sm:$0xff] }
 0x6ea   : > { %v965_v59 = vsub.f32 1.5, %v964_v58  ;;  %v1142_v58 = vld [vmem:[%s4993_s7 + $0x510] sm:$0xff] }
 0x6ec   : > { %v966_v60 = vmul.f32 %v3280_v55, %v965_v59  ;;  %v1158_v59 = vld [vmem:[%s4993_s7 + $0x590] sm:$0xff] }
 0x6ee   : > { %v970_v62 = vsel %vm969_vm5, %v3280_v55, %v966_v60  ;;  %v1159_v55 = vld [vmem:[%s4993_s7 + $0x598] sm:$0xff]  ;;  %v1109_v60 = vld [vmem:[%s4993_s7 + $0x408] sm:$0xff] }
 0x6ef   : > { %v971_v0 = vmul.f32 %v970_v62, %v3778_v14  ;;  %v1155_v14 = vld [vmem:[%s4993_s7 + $0x578] sm:$0xff]  ;;  %v1141_v62 = vld [vmem:[%s4993_s7 + $0x508] sm:$0xff] }
 0x6f1   : > { %v975_v1 = vmul.f32 %v3256_v61, %v971_v0  ;;  %v1125_v61 = vld [vmem:[%s4993_s7 + $0x488] sm:$0xff]  ;;  %v1108_v0 = vld [vmem:[%s4993_s7 + $0x400] sm:$0xff] }
 0x6f3   : > { %v4185_v2 = vadd.f32 %v3257_v63, %v975_v1  ;;  %v1157_v63 = vld [vmem:[%s4993_s7 + $0x588] sm:$0xff]  ;;  %v1124_v1 = vld [vmem:[%s4993_s7 + $0x480] sm:$0xff] }
 0x6f5   : > { %2943 = vmatmul.msk.f32.vlgmr.msrb.gmra.mxu2 %vm453_vm0, %v4185_v2  ;;  %2960 = vmatmul.msk.f32.vlgmr.msrb.gmra.mxu1 %vm453_vm0, %v4185_v2 }
 0x6f6   : > { %2977 = vmatmul.msk.f32.vlgmr.msra.gmra.mxu3 %vm453_vm0, %v4185_v2  ;;  %2994 = vmatmul.msk.f32.vlgmr.msrb.gmra.mxu0 %vm453_vm0, %v4185_v2 }
 0x6f7   : > { %3063 = vmatpush.xpose.msk.msrb.mxu2 %vm453_vm0, %v1123_v3  ;;  %3080 = vmatpush.xpose.msk.msrb.mxu1 %vm453_vm0, %v1139_v5  ;;  %v1140_v3 = vld [vmem:[%s4993_s7 + $0x500] sm:$0xff] }
 0x6f8   : > { %3097 = vmatpush.xpose.msk.msra.mxu3 %vm453_vm0, %v1155_v14  ;;  %3114 = vmatpush.xpose.msk.msrb.mxu0 %vm453_vm0, %v1171_v6  ;;  %v1156_v5 = vld [vmem:[%s4993_s7 + $0x580] sm:$0xff]  ;;  %v1187_v14 = vld [vmem:[%s4993_s7 + $0x678] sm:$0xff] }
 0x6f9   : > { %v1203_v6 = vld [vmem:[%s4993_s7 + $0x6f8] sm:$0xff] }
 0x6fb   : > { %3064 = vmatpush.xpose.msk.msrb.mxu2 %vm453_vm0, %v1122_v7  ;;  %3081 = vmatpush.xpose.msk.msrb.mxu1 %vm453_vm0, %v1138_v8  ;;  %v1219_v7 = vld [vmem:[%s4993_s7 + $0x778] sm:$0xff] }
 0x6fc   : > { %3098 = vmatpush.xpose.msk.msra.mxu3 %vm453_vm0, %v1154_v9  ;;  %3115 = vmatpush.xpose.msk.msrb.mxu0 %vm453_vm0, %v1170_v10  ;;  %v1235_v8 = vld [vmem:[%s4993_s7 + $0x7f8] sm:$0xff]  ;;  %v1186_v9 = vld [vmem:[%s4993_s7 + $0x670] sm:$0xff] }
 0x6fd   : > { %3011 = vmatmul.msk.f32.vlgmr.msra.gmra.mxu2 %vm453_vm0, %v4185_v2  ;;  %3028 = vmatmul.msk.f32.vlgmr.msra.gmra.mxu1 %vm453_vm0, %v4185_v2  ;;  %v1202_v10 = vld [vmem:[%s4993_s7 + $0x6f0] sm:$0xff] }
 0x6fe   : > { %3045 = vmatmul.msk.f32.vlgmr.msrb.gmra.mxu3 %vm453_vm0, %v4185_v2  ;;  %3062 = vmatmul.msk.f32.vlgmr.msra.gmra.mxu0 %vm453_vm0, %v4185_v2 }
 0x6ff   : > { %3065 = vmatpush.xpose.msk.msrb.mxu2 %vm453_vm0, %v1121_v11  ;;  %3082 = vmatpush.xpose.msk.msrb.mxu1 %vm453_vm0, %v1137_v13  ;;  %v1218_v11 = vld [vmem:[%s4993_s7 + $0x770] sm:$0xff] }
 0x700   : > { %3099 = vmatpush.xpose.msk.msra.mxu3 %vm453_vm0, %v1153_v15  ;;  %3116 = vmatpush.xpose.msk.msrb.mxu0 %vm453_vm0, %v1169_v16  ;;  %v1234_v13 = vld [vmem:[%s4993_s7 + $0x7f0] sm:$0xff]  ;;  %v1185_v15 = vld [vmem:[%s4993_s7 + $0x668] sm:$0xff] }
 0x701   : > { %v1201_v16 = vld [vmem:[%s4993_s7 + $0x6e8] sm:$0xff] }
 0x703   : > { %3066 = vmatpush.xpose.msk.msrb.mxu2 %vm453_vm0, %v1120_v17  ;;  %3083 = vmatpush.xpose.msk.msrb.mxu1 %vm453_vm0, %v1136_v18  ;;  %v1217_v17 = vld [vmem:[%s4993_s7 + $0x768] sm:$0xff] }
 0x704   : > { %3100 = vmatpush.xpose.msk.msra.mxu3 %vm453_vm0, %v1152_v19  ;;  %3117 = vmatpush.xpose.msk.msrb.mxu0 %vm453_vm0, %v1168_v20  ;;  %v1233_v18 = vld [vmem:[%s4993_s7 + $0x7e8] sm:$0xff]  ;;  %v1184_v19 = vld [vmem:[%s4993_s7 + $0x660] sm:$0xff] }
 0x705   : > { %v1200_v20 = vld [vmem:[%s4993_s7 + $0x6e0] sm:$0xff] }
 0x707   : > { %3067 = vmatpush.xpose.msk.msrb.mxu2 %vm453_vm0, %v1119_v21  ;;  %3084 = vmatpush.xpose.msk.msrb.mxu1 %vm453_vm0, %v1135_v22  ;;  %v1216_v21 = vld [vmem:[%s4993_s7 + $0x760] sm:$0xff] }
 0x708   : > { %3101 = vmatpush.xpose.msk.msra.mxu3 %vm453_vm0, %v1151_v23  ;;  %3118 = vmatpush.xpose.msk.msrb.mxu0 %vm453_vm0, %v1167_v24  ;;  %v1232_v22 = vld [vmem:[%s4993_s7 + $0x7e0] sm:$0xff]  ;;  %v1183_v23 = vld [vmem:[%s4993_s7 + $0x658] sm:$0xff] }
 0x709   : > { %v1199_v24 = vld [vmem:[%s4993_s7 + $0x6d8] sm:$0xff] }
 0x70b   : > { %3068 = vmatpush.xpose.msk.msrb.mxu2 %vm453_vm0, %v1118_v25  ;;  %3085 = vmatpush.xpose.msk.msrb.mxu1 %vm453_vm0, %v1134_v26  ;;  %v1215_v25 = vld [vmem:[%s4993_s7 + $0x758] sm:$0xff] }
 0x70c   : > { %3102 = vmatpush.xpose.msk.msra.mxu3 %vm453_vm0, %v1150_v27  ;;  %3119 = vmatpush.xpose.msk.msrb.mxu0 %vm453_vm0, %v1166_v28  ;;  %v1231_v26 = vld [vmem:[%s4993_s7 + $0x7d8] sm:$0xff]  ;;  %v1182_v27 = vld [vmem:[%s4993_s7 + $0x650] sm:$0xff] }
 0x70d   : > { %v1198_v28 = vld [vmem:[%s4993_s7 + $0x6d0] sm:$0xff] }
 0x70f   : > { %3069 = vmatpush.xpose.msk.msrb.mxu2 %vm453_vm0, %v1117_v29  ;;  %3086 = vmatpush.xpose.msk.msrb.mxu1 %vm453_vm0, %v1133_v30  ;;  %v1214_v29 = vld [vmem:[%s4993_s7 + $0x750] sm:$0xff] }
 0x710   : > { %3103 = vmatpush.xpose.msk.msra.mxu3 %vm453_vm0, %v1149_v31  ;;  %3120 = vmatpush.xpose.msk.msrb.mxu0 %vm453_vm0, %v1165_v32  ;;  %v1230_v30 = vld [vmem:[%s4993_s7 + $0x7d0] sm:$0xff]  ;;  %v1181_v31 = vld [vmem:[%s4993_s7 + $0x648] sm:$0xff] }
 0x711   : > { %v1197_v32 = vld [vmem:[%s4993_s7 + $0x6c8] sm:$0xff] }
 0x713   : > { %3070 = vmatpush.xpose.msk.msrb.mxu2 %vm453_vm0, %v1116_v33  ;;  %3087 = vmatpush.xpose.msk.msrb.mxu1 %vm453_vm0, %v1132_v34  ;;  %v1213_v33 = vld [vmem:[%s4993_s7 + $0x748] sm:$0xff] }
 0x714   : > { %3104 = vmatpush.xpose.msk.msra.mxu3 %vm453_vm0, %v1148_v35  ;;  %3121 = vmatpush.xpose.msk.msrb.mxu0 %vm453_vm0, %v1164_v36  ;;  %v1229_v34 = vld [vmem:[%s4993_s7 + $0x7c8] sm:$0xff]  ;;  %v1180_v35 = vld [vmem:[%s4993_s7 + $0x640] sm:$0xff] }
 0x715   : > { %v1196_v36 = vld [vmem:[%s4993_s7 + $0x6c0] sm:$0xff] }
 0x717   : > { %3071 = vmatpush.xpose.msk.msrb.mxu2 %vm453_vm0, %v1115_v37  ;;  %3088 = vmatpush.xpose.msk.msrb.mxu1 %vm453_vm0, %v1131_v38  ;;  %v1212_v37 = vld [vmem:[%s4993_s7 + $0x740] sm:$0xff] }
 0x718   : > { %3105 = vmatpush.xpose.msk.msra.mxu3 %vm453_vm0, %v1147_v39  ;;  %3122 = vmatpush.xpose.msk.msrb.mxu0 %vm453_vm0, %v1163_v40  ;;  %v1228_v38 = vld [vmem:[%s4993_s7 + $0x7c0] sm:$0xff]  ;;  %v1179_v39 = vld [vmem:[%s4993_s7 + $0x638] sm:$0xff] }
 0x719   : > { %v1195_v40 = vld [vmem:[%s4993_s7 + $0x6b8] sm:$0xff] }
 0x71b   : > { %3072 = vmatpush.xpose.msk.msrb.mxu2 %vm453_vm0, %v1114_v41  ;;  %3089 = vmatpush.xpose.msk.msrb.mxu1 %vm453_vm0, %v1130_v42  ;;  %v1211_v41 = vld [vmem:[%s4993_s7 + $0x738] sm:$0xff] }
 0x71c   : > { %3106 = vmatpush.xpose.msk.msra.mxu3 %vm453_vm0, %v1146_v12  ;;  %3123 = vmatpush.xpose.msk.msrb.mxu0 %vm453_vm0, %v1162_v43  ;;  %v1227_v42 = vld [vmem:[%s4993_s7 + $0x7b8] sm:$0xff]  ;;  %v1178_v12 = vld [vmem:[%s4993_s7 + $0x630] sm:$0xff] }
 0x71d   : > { %v1194_v43 = vld [vmem:[%s4993_s7 + $0x6b0] sm:$0xff] }
 0x71f   : > { %3073 = vmatpush.xpose.msk.msrb.mxu2 %vm453_vm0, %v1113_v44  ;;  %3090 = vmatpush.xpose.msk.msrb.mxu1 %vm453_vm0, %v1129_v45  ;;  %v1210_v44 = vld [vmem:[%s4993_s7 + $0x730] sm:$0xff] }
 0x720   : > { %3107 = vmatpush.xpose.msk.msra.mxu3 %vm453_vm0, %v1145_v46  ;;  %3124 = vmatpush.xpose.msk.msrb.mxu0 %vm453_vm0, %v1161_v47  ;;  %v1226_v45 = vld [vmem:[%s4993_s7 + $0x7b0] sm:$0xff]  ;;  %v1177_v46 = vld [vmem:[%s4993_s7 + $0x628] sm:$0xff] }
 0x721   : > { %v1193_v47 = vld [vmem:[%s4993_s7 + $0x6a8] sm:$0xff] }
 0x723   : > { %3074 = vmatpush.xpose.msk.msrb.mxu2 %vm453_vm0, %v1112_v48  ;;  %3091 = vmatpush.xpose.msk.msrb.mxu1 %vm453_vm0, %v1128_v49  ;;  %v1209_v48 = vld [vmem:[%s4993_s7 + $0x728] sm:$0xff] }
 0x724   : > { %3108 = vmatpush.xpose.msk.msra.mxu3 %vm453_vm0, %v1144_v50  ;;  %3125 = vmatpush.xpose.msk.msrb.mxu0 %vm453_vm0, %v1160_v51  ;;  %v1225_v49 = vld [vmem:[%s4993_s7 + $0x7a8] sm:$0xff]  ;;  %v1176_v50 = vld [vmem:[%s4993_s7 + $0x620] sm:$0xff] }
 0x725   : > { %v1192_v51 = vld [vmem:[%s4993_s7 + $0x6a0] sm:$0xff] }
 0x727   : > { %3075 = vmatpush.xpose.msk.msrb.mxu2 %vm453_vm0, %v1111_v52  ;;  %3092 = vmatpush.xpose.msk.msrb.mxu1 %vm453_vm0, %v1127_v53  ;;  %v1208_v52 = vld [vmem:[%s4993_s7 + $0x720] sm:$0xff] }
 0x728   : > { %3109 = vmatpush.xpose.msk.msra.mxu3 %vm453_vm0, %v1143_v54  ;;  %3126 = vmatpush.xpose.msk.msrb.mxu0 %vm453_vm0, %v1159_v55  ;;  %v1224_v53 = vld [vmem:[%s4993_s7 + $0x7a0] sm:$0xff]  ;;  %v1175_v54 = vld [vmem:[%s4993_s7 + $0x618] sm:$0xff] }
 0x729   : > { %v1191_v55 = vld [vmem:[%s4993_s7 + $0x698] sm:$0xff] }
 0x72b   : > { %3076 = vmatpush.xpose.msk.msrb.mxu2 %vm453_vm0, %v1110_v56  ;;  %3093 = vmatpush.xpose.msk.msrb.mxu1 %vm453_vm0, %v1126_v57  ;;  %v1207_v56 = vld [vmem:[%s4993_s7 + $0x718] sm:$0xff] }
 0x72c   : > { %3110 = vmatpush.xpose.msk.msra.mxu3 %vm453_vm0, %v1142_v58  ;;  %3127 = vmatpush.xpose.msk.msrb.mxu0 %vm453_vm0, %v1158_v59  ;;  %v1223_v57 = vld [vmem:[%s4993_s7 + $0x798] sm:$0xff]  ;;  %v1174_v58 = vld [vmem:[%s4993_s7 + $0x610] sm:$0xff] }
 0x72d   : > { %v1190_v59 = vld [vmem:[%s4993_s7 + $0x690] sm:$0xff] }
 0x72f   : > { %3077 = vmatpush.xpose.msk.msrb.mxu2 %vm453_vm0, %v1109_v60  ;;  %3094 = vmatpush.xpose.msk.msrb.mxu1 %vm453_vm0, %v1125_v61  ;;  %v1206_v60 = vld [vmem:[%s4993_s7 + $0x710] sm:$0xff] }
 0x730   : > { %3111 = vmatpush.xpose.msk.msra.mxu3 %vm453_vm0, %v1141_v62  ;;  %3128 = vmatpush.xpose.msk.msrb.mxu0 %vm453_vm0, %v1157_v63  ;;  %v1222_v61 = vld [vmem:[%s4993_s7 + $0x790] sm:$0xff]  ;;  %v1173_v62 = vld [vmem:[%s4993_s7 + $0x608] sm:$0xff] }
 0x731   : > { %v1189_v63 = vld [vmem:[%s4993_s7 + $0x688] sm:$0xff] }
 0x733   : > { %3078 = vmatpush.xpose.msk.msrb.mxu2 %vm453_vm0, %v1108_v0  ;;  %3095 = vmatpush.xpose.msk.msrb.mxu1 %vm453_vm0, %v1124_v1  ;;  %v1205_v0 = vld [vmem:[%s4993_s7 + $0x708] sm:$0xff] }
 0x734   : > { %3112 = vmatpush.xpose.msk.msra.mxu3 %vm453_vm0, %v1140_v3  ;;  %3129 = vmatpush.xpose.msk.msrb.mxu0 %vm453_vm0, %v1156_v5  ;;  %v1221_v1 = vld [vmem:[%s4993_s7 + $0x788] sm:$0xff]  ;;  %v1172_v3 = vld [vmem:[%s4993_s7 + $0x600] sm:$0xff] }
 0x735   : > { %v1188_v5 = vld [vmem:[%s4993_s7 + $0x680] sm:$0xff] }
 0x736   : > { %3079 = vmatmul.msk.f32.vlgmr.msrb.gmra.mxu2 %vm453_vm0, %v4185_v2  ;;  %3096 = vmatmul.msk.f32.vlgmr.msrb.gmra.mxu1 %vm453_vm0, %v4185_v2 }
 0x737   : > { %3131 = vmatpush.xpose.msk.msra.mxu2 %vm453_vm0, %v1187_v14  ;;  %3148 = vmatpush.xpose.msk.msra.mxu1 %vm453_vm0, %v1203_v6  ;;  %v1204_v14 = vld [vmem:[%s4993_s7 + $0x700] sm:$0xff] }
 0x738   : > { %3165 = vmatpush.xpose.msk.msrb.mxu3 %vm453_vm0, %v1219_v7  ;;  %3182 = vmatpush.xpose.msk.msra.mxu0 %vm453_vm0, %v1235_v8  ;;  %v1220_v6 = vld [vmem:[%s4993_s7 + $0x780] sm:$0xff]  ;;  %v2428_v8 = vld [vmem:[%s4995_s9 + $0x188] sm:$0xff] }
 0x739   : > { %3113 = vmatmul.msk.f32.vlgmr.msra.gmra.mxu3 %vm453_vm0, %v4185_v2  ;;  %3130 = vmatmul.msk.f32.vlgmr.msrb.gmra.mxu0 %vm453_vm0, %v4185_v2  ;;  %v2427_v7 = vld [vmem:[%s4995_s9 + $0x180] sm:$0xff] }
 0x73b   : > { %3132 = vmatpush.xpose.msk.msra.mxu2 %vm453_vm0, %v1186_v9  ;;  %3149 = vmatpush.xpose.msk.msra.mxu1 %vm453_vm0, %v1202_v10  ;;  %v2429_v9 = vld [vmem:[%s4995_s9 + $0x190] sm:$0xff]  ;;  %v2430_v10 = vld [vmem:[%s4995_s9 + $0x198] sm:$0xff] }
 0x73c   : > { %3166 = vmatpush.xpose.msk.msrb.mxu3 %vm453_vm0, %v1218_v11  ;;  %3183 = vmatpush.xpose.msk.msra.mxu0 %vm453_vm0, %v1234_v13  ;;  %v2411_v11 = vld [vmem:[%s4995_s9 + $0x100] sm:$0xff]  ;;  %v2412_v13 = vld [vmem:[%s4995_s9 + $0x108] sm:$0xff] }
 0x73f   : > { %3133 = vmatpush.xpose.msk.msra.mxu2 %vm453_vm0, %v1185_v15  ;;  %3150 = vmatpush.xpose.msk.msra.mxu1 %vm453_vm0, %v1201_v16  ;;  %v2413_v15 = vld [vmem:[%s4995_s9 + $0x110] sm:$0xff]  ;;  %v2414_v16 = vld [vmem:[%s4995_s9 + $0x118] sm:$0xff] }
 0x740   : > { %3167 = vmatpush.xpose.msk.msrb.mxu3 %vm453_vm0, %v1217_v17  ;;  %3184 = vmatpush.xpose.msk.msra.mxu0 %vm453_vm0, %v1233_v18  ;;  %v4758_v17 = vld [vmem:[%s4994_s8] sm:$0xff] }
 0x741   : > { %v1240_v18 = vperm.slane %v4758_v17, 0 }
 0x743   : > { %3134 = vmatpush.xpose.msk.msra.mxu2 %vm453_vm0, %v1184_v19  ;;  %3151 = vmatpush.xpose.msk.msra.mxu1 %vm453_vm0, %v1200_v20  ;;  %v2395_v19 = vld [vmem:[%s4995_s9 + $0x80] sm:$0xff]  ;;  %v2396_v20 = vld [vmem:[%s4995_s9 + $0x88] sm:$0xff] }
 0x744   : > { %3168 = vmatpush.xpose.msk.msrb.mxu3 %vm453_vm0, %v1216_v21  ;;  %3185 = vmatpush.xpose.msk.msra.mxu0 %vm453_vm0, %v1232_v22  ;;  %v1242_v22 = vperm.slane %v4758_v17, 2 }
 0x747   : > { %3135 = vmatpush.xpose.msk.msra.mxu2 %vm453_vm0, %v1183_v23  ;;  %3152 = vmatpush.xpose.msk.msra.mxu1 %vm453_vm0, %v1199_v24  ;;  %v1241_v23 = vperm.slane %v4758_v17, 1  ;;  %v2397_v24 = vld [vmem:[%s4995_s9 + $0x90] sm:$0xff] }
 0x748   : > { %3169 = vmatpush.xpose.msk.msrb.mxu3 %vm453_vm0, %v1215_v25  ;;  %3186 = vmatpush.xpose.msk.msra.mxu0 %vm453_vm0, %v1231_v26  ;;  %v2398_v25 = vld [vmem:[%s4995_s9 + $0x98] sm:$0xff] }
 0x74b   : > { %3136 = vmatpush.xpose.msk.msra.mxu2 %vm453_vm0, %v1182_v27  ;;  %3153 = vmatpush.xpose.msk.msra.mxu1 %vm453_vm0, %v1198_v28  ;;  %v1243_v28 = vperm.slane %v4758_v17, 3 }
 0x74c   : > { %3170 = vmatpush.xpose.msk.msrb.mxu3 %vm453_vm0, %v1214_v29  ;;  %3187 = vmatpush.xpose.msk.msra.mxu0 %vm453_vm0, %v1230_v30 }
 0x74f   : > { %3137 = vmatpush.xpose.msk.msra.mxu2 %vm453_vm0, %v1181_v31  ;;  %3154 = vmatpush.xpose.msk.msra.mxu1 %vm453_vm0, %v1197_v32  ;;  %v2379_v32 = vld [vmem:[%s4995_s9] sm:$0xff] }
 0x750   : > { %3171 = vmatpush.xpose.msk.msrb.mxu3 %vm453_vm0, %v1213_v33  ;;  %3188 = vmatpush.xpose.msk.msra.mxu0 %vm453_vm0, %v1229_v34  ;;  %v2380_v33 = vld [vmem:[%s4995_s9 + $0x8] sm:$0xff] }
 0x753   : > { %3138 = vmatpush.xpose.msk.msra.mxu2 %vm453_vm0, %v1180_v35  ;;  %3155 = vmatpush.xpose.msk.msra.mxu1 %vm453_vm0, %v1196_v36  ;;  %v2381_v35 = vld [vmem:[%s4995_s9 + $0x10] sm:$0xff]  ;;  %v2382_v36 = vld [vmem:[%s4995_s9 + $0x18] sm:$0xff] }
 0x754   : > { %3172 = vmatpush.xpose.msk.msrb.mxu3 %vm453_vm0, %v1212_v37  ;;  %3189 = vmatpush.xpose.msk.msra.mxu0 %vm453_vm0, %v1228_v38  ;;  %v2431_v38 = vld [vmem:[%s4995_s9 + $0x1a0] sm:$0xff] }
 0x757   : > { %3139 = vmatpush.xpose.msk.msra.mxu2 %vm453_vm0, %v1179_v39  ;;  %3156 = vmatpush.xpose.msk.msra.mxu1 %vm453_vm0, %v1195_v40  ;;  %v2432_v39 = vld [vmem:[%s4995_s9 + $0x1a8] sm:$0xff] }
 0x758   : > { %3173 = vmatpush.xpose.msk.msrb.mxu3 %vm453_vm0, %v1211_v41  ;;  %3190 = vmatpush.xpose.msk.msra.mxu0 %vm453_vm0, %v1227_v42  ;;  %v2433_v41 = vld [vmem:[%s4995_s9 + $0x1b0] sm:$0xff]  ;;  %v2434_v42 = vld [vmem:[%s4995_s9 + $0x1b8] sm:$0xff] }
 0x75b   : > { %3140 = vmatpush.xpose.msk.msra.mxu2 %vm453_vm0, %v1178_v12  ;;  %3157 = vmatpush.xpose.msk.msra.mxu1 %vm453_vm0, %v1194_v43 }
 0x75c   : > { %3174 = vmatpush.xpose.msk.msrb.mxu3 %vm453_vm0, %v1210_v44  ;;  %3191 = vmatpush.xpose.msk.msra.mxu0 %vm453_vm0, %v1226_v45  ;;  %v2415_v45 = vld [vmem:[%s4995_s9 + $0x120] sm:$0xff] }
 0x75f   : > { %3141 = vmatpush.xpose.msk.msra.mxu2 %vm453_vm0, %v1177_v46  ;;  %3158 = vmatpush.xpose.msk.msra.mxu1 %vm453_vm0, %v1193_v47  ;;  %v2416_v46 = vld [vmem:[%s4995_s9 + $0x128] sm:$0xff]  ;;  %v2417_v47 = vld [vmem:[%s4995_s9 + $0x130] sm:$0xff] }
 0x760   : > { %3175 = vmatpush.xpose.msk.msrb.mxu3 %vm453_vm0, %v1209_v48  ;;  %3192 = vmatpush.xpose.msk.msra.mxu0 %vm453_vm0, %v1225_v49  ;;  %v2418_v48 = vld [vmem:[%s4995_s9 + $0x138] sm:$0xff]  ;;  %v1245_v49 = vperm.slane %v4758_v17, 5 }
 0x763   : > { %3142 = vmatpush.xpose.msk.msra.mxu2 %vm453_vm0, %v1176_v50  ;;  %3159 = vmatpush.xpose.msk.msra.mxu1 %vm453_vm0, %v1192_v51  ;;  %v1244_v50 = vperm.slane %v4758_v17, 4  ;;  %v2399_v51 = vld [vmem:[%s4995_s9 + $0xa0] sm:$0xff] }
 0x764   : > { %3176 = vmatpush.xpose.msk.msrb.mxu3 %vm453_vm0, %v1208_v52  ;;  %3193 = vmatpush.xpose.msk.msra.mxu0 %vm453_vm0, %v1224_v53  ;;  %v2400_v52 = vld [vmem:[%s4995_s9 + $0xa8] sm:$0xff] }
 0x767   : > { %3143 = vmatpush.xpose.msk.msra.mxu2 %vm453_vm0, %v1175_v54  ;;  %3160 = vmatpush.xpose.msk.msra.mxu1 %vm453_vm0, %v1191_v55  ;;  %v1247_v54 = vperm.slane %v4758_v17, 7 }
 0x768   : > { %3177 = vmatpush.xpose.msk.msrb.mxu3 %vm453_vm0, %v1207_v56  ;;  %3194 = vmatpush.xpose.msk.msra.mxu0 %vm453_vm0, %v1223_v57  ;;  %v1246_v56 = vperm.slane %v4758_v17, 6  ;;  %v2401_v57 = vld [vmem:[%s4995_s9 + $0xb0] sm:$0xff]  ;;  %v2422_v17 = vld [vmem:[%s4995_s9 + $0x158] sm:$0xff] }
 0x76b   : > { %3144 = vmatpush.xpose.msk.msra.mxu2 %vm453_vm0, %v1174_v58  ;;  %3161 = vmatpush.xpose.msk.msra.mxu1 %vm453_vm0, %v1190_v59  ;;  %v2402_v58 = vld [vmem:[%s4995_s9 + $0xb8] sm:$0xff] }
 0x76c   : > { %3178 = vmatpush.xpose.msk.msrb.mxu3 %vm453_vm0, %v1206_v60  ;;  %3195 = vmatpush.xpose.msk.msra.mxu0 %vm453_vm0, %v1222_v61 }
 0x76f   : > { %3145 = vmatpush.xpose.msk.msra.mxu2 %vm453_vm0, %v1173_v62  ;;  %3162 = vmatpush.xpose.msk.msra.mxu1 %vm453_vm0, %v1189_v63  ;;  %v2383_v63 = vld [vmem:[%s4995_s9 + $0x20] sm:$0xff] }
 0x770   : > { %3179 = vmatpush.xpose.msk.msrb.mxu3 %vm453_vm0, %v1205_v0  ;;  %3196 = vmatpush.xpose.msk.msra.mxu0 %vm453_vm0, %v1221_v1  ;;  %v2384_v0 = vld [vmem:[%s4995_s9 + $0x28] sm:$0xff] }
 0x772   : > { %v2080_v27 = vpop.f32.mrf.mxu1 }
 0x773   : > { %3146 = vmatpush.xpose.msk.msra.mxu2 %vm453_vm0, %v1172_v3  ;;  %3163 = vmatpush.xpose.msk.msra.mxu1 %vm453_vm0, %v1188_v5  ;;  %v2120_v29 = vpop.f32.mrf.mxu0  ;;  %v2081_v34 = vadd.f32 %v2080_v27, %v1241_v23  ;;  %v2385_v5 = vld [vmem:[%s4995_s9 + $0x30] sm:$0xff]  ;;  %v2390_v23 = vld [vmem:[%s4995_s9 + $0x58] sm:$0xff] }
 0x774   : > { %3180 = vmatpush.xpose.msk.msrb.mxu3 %vm453_vm0, %v1204_v14  ;;  %3197 = vmatpush.xpose.msk.msra.mxu0 %vm453_vm0, %v1220_v6  ;;  %v2121_v37 = vadd.f32 %v2120_v29, %v1243_v28  ;;  %v2386_v14 = vld [vmem:[%s4995_s9 + $0x38] sm:$0xff]  ;;  %v2436_v6 = vld [vmem:[%s4995_s9 + $0x1c8] sm:$0xff]  ;;  %v2389_v27 = vld [vmem:[%s4995_s9 + $0x50] sm:$0xff] }
 0x775   : > { %v2364_v43 = vmax.f32 %v2081_v34, 0.0  ;;  %v2440_v28 = vld [vmem:[%s4995_s9 + $0x1e8] sm:$0xff]  ;;  %v2442_v29 = vld [vmem:[%s4995_s9 + $0x1f8] sm:$0xff] }
 0x776   : > { %3147 = vmatmul.msk.f32.vlgmr.msra.gmra.mxu2 %vm453_vm0, %v4185_v2  ;;  %3164 = vmatmul.msk.f32.vlgmr.msra.gmra.mxu1 %vm453_vm0, %v4185_v2  ;;  %v2366_v44 = vmax.f32 %v2121_v37, 0.0  ;;  %v2408_v34 = vld [vmem:[%s4995_s9 + $0xe8] sm:$0xff] }
 0x777   : > { %2459 = vmatpush.xpose.msrb.mxu2 %v2427_v7  ;;  %2479 = vmatpush.xpose.msrb.mxu1 %v2428_v8  ;;  %v2438_v7 = vld [vmem:[%s4995_s9 + $0x1d8] sm:$0xff] }
 0x778   : > { %2499 = vmatpush.xpose.msra.mxu3 %v2429_v9  ;;  %2519 = vmatpush.xpose.msrb.mxu0 %v2430_v10  ;;  %v2060_v21 = vpop.f32.mrf.mxu2 }
 0x779   : > { %3181 = vmatmul.msk.f32.vlgmr.msrb.gmra.mxu3 %vm453_vm0, %v4185_v2  ;;  %3198 = vmatmul.msk.f32.vlgmr.msra.gmra.mxu0 %vm453_vm0, %v4185_v2  ;;  %v2100_v26 = vpop.f32.mrf.mxu3  ;;  %v2061_v30 = vadd.f32 %v2060_v21, %v1240_v18  ;;  %v2404_v18 = vld [vmem:[%s4995_s9 + $0xc8] sm:$0xff]  ;;  %v2421_v21 = vld [vmem:[%s4995_s9 + $0x150] sm:$0xff] }
 0x77a   : > { %v2101_v31 = vadd.f32 %v2100_v26, %v1242_v22  ;;  %v2160_v53 = vpop.f32.mrf.mxu1  ;;  %v2388_v22 = vld [vmem:[%s4995_s9 + $0x48] sm:$0xff]  ;;  %v2387_v26 = vld [vmem:[%s4995_s9 + $0x40] sm:$0xff] }
 0x77b   : > { %2460 = vmatpush.xpose.msrb.mxu2 %v2411_v11  ;;  %2480 = vmatpush.xpose.msrb.mxu1 %v2412_v13  ;;  %v2363_v40 = vmax.f32 %v2061_v30, 0.0  ;;  %v2200_v59 = vpop.f32.mrf.mxu0  ;;  %v2161_v61 = vadd.f32 %v2160_v53, %v1245_v49  ;;  %v2435_v13 = vld [vmem:[%s4995_s9 + $0x1c0] sm:$0xff]  ;;  %v2425_v53 = vld [vmem:[%s4995_s9 + $0x170] sm:$0xff] }
 0x77c   : > { %2500 = vmatpush.xpose.msra.mxu3 %v2413_v15  ;;  %2520 = vmatpush.xpose.msrb.mxu0 %v2414_v16  ;;  %v2365_v12 = vmax.f32 %v2101_v31, 0.0  ;;  %v2201_v1 = vadd.f32 %v2200_v59, %v1247_v54  ;;  %v2437_v15 = vld [vmem:[%s4995_s9 + $0x1d0] sm:$0xff]  ;;  %v2420_v16 = vld [vmem:[%s4995_s9 + $0x148] sm:$0xff]  ;;  %v2439_v30 = vld [vmem:[%s4995_s9 + $0x1e0] sm:$0xff] }
 0x77d   : > { %v2368_v8 = vmax.f32 %v2161_v61, 0.0  ;;  %v2441_v31 = vld [vmem:[%s4995_s9 + $0x1f0] sm:$0xff]  ;;  %v2392_v54 = vld [vmem:[%s4995_s9 + $0x68] sm:$0xff] }
 0x77e   : > { %v2370_v10 = vmax.f32 %v2201_v1, 0.0  ;;  %v2393_v59 = vld [vmem:[%s4995_s9 + $0x70] sm:$0xff] }
 0x77f   : > { %2461 = vmatpush.xpose.msrb.mxu2 %v2395_v19  ;;  %2481 = vmatpush.xpose.msrb.mxu1 %v2396_v20  ;;  %v2406_v19 = vld [vmem:[%s4995_s9 + $0xd8] sm:$0xff]  ;;  %v2419_v20 = vld [vmem:[%s4995_s9 + $0x140] sm:$0xff] }
 0x780   : > { %2501 = vmatpush.xpose.msra.mxu3 %v2397_v24  ;;  %2521 = vmatpush.xpose.msrb.mxu0 %v2398_v25  ;;  %v2140_v55 = vpop.f32.mrf.mxu2  ;;  %v2403_v24 = vld [vmem:[%s4995_s9 + $0xc0] sm:$0xff]  ;;  %v2405_v25 = vld [vmem:[%s4995_s9 + $0xd0] sm:$0xff] }
 0x781   : > { %v2180_v60 = vpop.f32.mrf.mxu3  ;;  %v2141_v62 = vadd.f32 %v2140_v55, %v1244_v50  ;;  %v2394_v55 = vld [vmem:[%s4995_s9 + $0x78] sm:$0xff] }
 0x782   : > { %v2181_v3 = vadd.f32 %v2180_v60, %v1246_v56  ;;  %v2407_v56 = vld [vmem:[%s4995_s9 + $0xe0] sm:$0xff] }
 0x783   : > { %2462 = vmatpush.xpose.msrb.mxu2 %v2379_v32  ;;  %2482 = vmatpush.xpose.msrb.mxu1 %v2380_v33  ;;  %v2367_v9 = vmax.f32 %v2141_v62, 0.0  ;;  %v2424_v32 = vld [vmem:[%s4995_s9 + $0x168] sm:$0xff]  ;;  %v2426_v33 = vld [vmem:[%s4995_s9 + $0x178] sm:$0xff] }
 0x784   : > { %2502 = vmatpush.xpose.msra.mxu3 %v2381_v35  ;;  %2522 = vmatpush.xpose.msrb.mxu0 %v2382_v36  ;;  %v2369_v11 = vmax.f32 %v2181_v3, 0.0  ;;  %v2410_v35 = vld [vmem:[%s4995_s9 + $0xf8] sm:$0xff]  ;;  %v1237_v36 = vld [vmem:[%s4994_s8 + $0x8] sm:$0xff] }
 0x785   : > { %v1249_v37 = vperm.slane %v1237_v36, 1  ;;  %v1253_v60 = vperm.slane %v1237_v36, 5  ;;  %v1255_v61 = vperm.slane %v1237_v36, 7 }
 0x786   : > { %2463 = vmatmul.f32.vlgmr.msrb.gmra.mxu2 %v2363_v40  ;;  %2483 = vmatmul.f32.vlgmr.msrb.gmra.mxu1 %v2364_v43  ;;  %v1248_v43 = vperm.slane %v1237_v36, 0 }
 0x787   : > { %2539 = vmatpush.xpose.msra.mxu2 %v2431_v38  ;;  %2559 = vmatpush.xpose.msra.mxu1 %v2432_v39  ;;  %v1251_v38 = vperm.slane %v1237_v36, 3 }
 0x788   : > { %2579 = vmatpush.xpose.msrb.mxu3 %v2433_v41  ;;  %2599 = vmatpush.xpose.msra.mxu0 %v2434_v42 }
 0x789   : > { %2503 = vmatmul.f32.vlgmr.msra.gmra.mxu3 %v2365_v12  ;;  %2523 = vmatmul.f32.vlgmr.msrb.gmra.mxu0 %v2366_v44 }
 0x78b   : > { %2540 = vmatpush.xpose.msra.mxu2 %v2415_v45  ;;  %2560 = vmatpush.xpose.msra.mxu1 %v2416_v46  ;;  %v1250_v45 = vperm.slane %v1237_v36, 2 }
 0x78c   : > { %2580 = vmatpush.xpose.msrb.mxu3 %v2417_v47  ;;  %2600 = vmatpush.xpose.msra.mxu0 %v2418_v48 }
 0x78f   : > { %2541 = vmatpush.xpose.msra.mxu2 %v2399_v51  ;;  %2561 = vmatpush.xpose.msra.mxu1 %v2400_v52  ;;  %v2423_v52 = vld [vmem:[%s4995_s9 + $0x160] sm:$0xff] }
 0x790   : > { %2581 = vmatpush.xpose.msrb.mxu3 %v2401_v57  ;;  %2601 = vmatpush.xpose.msra.mxu0 %v2402_v58  ;;  %v2409_v57 = vld [vmem:[%s4995_s9 + $0xf0] sm:$0xff]  ;;  %v2391_v58 = vld [vmem:[%s4995_s9 + $0x60] sm:$0xff] }
 0x793   : > { %2542 = vmatpush.xpose.msra.mxu2 %v2383_v63  ;;  %2562 = vmatpush.xpose.msra.mxu1 %v2384_v0 }
 0x794   : > { %2582 = vmatpush.xpose.msrb.mxu3 %v2385_v5  ;;  %2602 = vmatpush.xpose.msra.mxu0 %v2386_v14  ;;  %v1252_v5 = vperm.slane %v1237_v36, 4 }
 0x796   : > { %2543 = vmatmul.f32.vlgmr.msra.gmra.mxu2 %v2367_v9  ;;  %2563 = vmatmul.f32.vlgmr.msra.gmra.mxu1 %v2368_v8 }
 0x797   : > { %2639 = vmatpush.xpose.msrb.mxu1 %v2436_v6  ;;  %2583 = vmatmul.f32.vlgmr.msrb.gmra.mxu3 %v2369_v11  ;;  %v1254_v6 = vperm.slane %v1237_v36, 6 }
 0x798   : > { %2679 = vmatpush.xpose.msrb.mxu0 %v2438_v7  ;;  %2619 = vmatpush.xpose.msrb.mxu2 %v2435_v13 }
 0x799   : > { %2603 = vmatmul.f32.vlgmr.msra.gmra.mxu0 %v2370_v10  ;;  %2659 = vmatpush.xpose.msra.mxu3 %v2437_v15  ;;  %v3258_v15 = vld [vmem:[%s4996_s10] ss:$0 sm:$0xff] }
 0x79b   : > { %2640 = vmatpush.xpose.msrb.mxu1 %v2420_v16 }
 0x79c   : > { %2680 = vmatpush.xpose.msrb.mxu0 %v2422_v17  ;;  %2620 = vmatpush.xpose.msrb.mxu2 %v2419_v20 }
 0x79d   : > { %2660 = vmatpush.xpose.msra.mxu3 %v2421_v21 }
 0x79f   : > { %2641 = vmatpush.xpose.msrb.mxu1 %v2404_v18 }
 0x7a0   : > { %2681 = vmatpush.xpose.msrb.mxu0 %v2406_v19  ;;  %2621 = vmatpush.xpose.msrb.mxu2 %v2403_v24 }
 0x7a1   : > { %2661 = vmatpush.xpose.msra.mxu3 %v2405_v25 }
 0x7a3   : > { %2642 = vmatpush.xpose.msrb.mxu1 %v2388_v22 }
 0x7a4   : > { %2682 = vmatpush.xpose.msrb.mxu0 %v2390_v23  ;;  %2622 = vmatpush.xpose.msrb.mxu2 %v2387_v26 }
 0x7a5   : > { %2662 = vmatpush.xpose.msra.mxu3 %v2389_v27 }
 0x7a7   : > { %2719 = vmatpush.xpose.msra.mxu1 %v2440_v28 }
 0x7a8   : > { %2759 = vmatpush.xpose.msra.mxu0 %v2442_v29  ;;  %2699 = vmatpush.xpose.msra.mxu2 %v2439_v30 }
 0x7a9   : > { %2739 = vmatpush.xpose.msrb.mxu3 %v2441_v31 }
 0x7ab   : > { %2720 = vmatpush.xpose.msra.mxu1 %v2424_v32 }
 0x7ac   : > { %2760 = vmatpush.xpose.msra.mxu0 %v2426_v33  ;;  %2700 = vmatpush.xpose.msra.mxu2 %v2423_v52 }
 0x7ad   : > { %2740 = vmatpush.xpose.msrb.mxu3 %v2425_v53 }
 0x7af   : > { %2721 = vmatpush.xpose.msra.mxu1 %v2408_v34 }
 0x7b0   : > { %2761 = vmatpush.xpose.msra.mxu0 %v2410_v35  ;;  %2701 = vmatpush.xpose.msra.mxu2 %v2407_v56 }
 0x7b1   : > { %2741 = vmatpush.xpose.msrb.mxu3 %v2409_v57 }
 0x7b3   : > { %v2240_v39 = vpop.f32.mrf.mxu1  ;;  %2722 = vmatpush.xpose.msra.mxu1 %v2392_v54 }
 0x7b4   : > { %v2241_v40 = vadd.f32 %v2240_v39, %v1249_v37  ;;  %2762 = vmatpush.xpose.msra.mxu0 %v2394_v55  ;;  %2702 = vmatpush.xpose.msra.mxu2 %v2391_v58 }
 0x7b5   : > { %2742 = vmatpush.xpose.msrb.mxu3 %v2393_v59 }
 0x7b6   : > { %v2280_v41 = vpop.f32.mrf.mxu0  ;;  %v2372_v12 = vmax.f32 %v2241_v40, 0.0 }
 0x7b7   : > { %v2281_v42 = vadd.f32 %v2280_v41, %v1251_v38 }
 0x7b8   : > { %2643 = vmatmul.f32.vlgmr.msrb.gmra.mxu1 %v2372_v12 }
 0x7b9   : > { %v2374_v44 = vmax.f32 %v2281_v42, 0.0  ;;  %v2220_v46 = vpop.f32.mrf.mxu2 }
 0x7ba   : > { %v2221_v47 = vadd.f32 %v2220_v46, %v1248_v43 }
 0x7bb   : > { %2683 = vmatmul.f32.vlgmr.msrb.gmra.mxu0 %v2374_v44 }
 0x7bc   : > { %v2260_v48 = vpop.f32.mrf.mxu3  ;;  %v2371_v50 = vmax.f32 %v2221_v47, 0.0 }
 0x7bd   : > { %v2261_v49 = vadd.f32 %v2260_v48, %v1250_v45 }
 0x7be   : > { %2623 = vmatmul.f32.vlgmr.msrb.gmra.mxu2 %v2371_v50 }
 0x7bf   : > { %v2373_v51 = vmax.f32 %v2261_v49, 0.0 }
 0x7c1   : > { %2663 = vmatmul.f32.vlgmr.msra.gmra.mxu3 %v2373_v51 }
 0x7f3   : > { %v2320_v62 = vpop.f32.mrf.mxu1 }
 0x7f4   : > { %v2321_v63 = vadd.f32 %v2320_v62, %v1253_v60  ;;  %v3259_v62 = vld [vmem:[%s4997_s11] ss:$0 sm:$0xff] }
 0x7f6   : > { %v2360_v0 = vpop.f32.mrf.mxu0  ;;  %v2376_v3 = vmax.f32 %v2321_v63, 0.0 }
 0x7f7   : > { %v2361_v1 = vadd.f32 %v2360_v0, %v1255_v61  ;;  %v3260_v0 = vld [vmem:[%s4998_s12] ss:$0 sm:$0xff] }
 0x7f8   : > { %2723 = vmatmul.f32.vlgmr.msra.gmra.mxu1 %v2376_v3 }
 0x7f9   : > { %v2378_v14 = vmax.f32 %v2361_v1, 0.0  ;;  %v2300_v7 = vpop.f32.mrf.mxu2 }
 0x7fa   : > { %v2301_v8 = vadd.f32 %v2300_v7, %v1252_v5 }
 0x7fb   : > { %2763 = vmatmul.f32.vlgmr.msra.gmra.mxu0 %v2378_v14 }
 0x7fc   : > { %v2340_v9 = vpop.f32.mrf.mxu3  ;;  %v2375_v11 = vmax.f32 %v2301_v8, 0.0 }
 0x7fd   : > { %v2341_v10 = vadd.f32 %v2340_v9, %v1254_v6 }
 0x7fe   : > { %2703 = vmatmul.f32.vlgmr.msra.gmra.mxu2 %v2375_v11 }
 0x7ff   : > { %v2377_v13 = vmax.f32 %v2341_v10, 0.0 }
 0x801   : > { %2743 = vmatmul.f32.vlgmr.msrb.gmra.mxu3 %v2377_v13 }
 0x803   : > { %v2484_v18 = vpop.f32.mrf.mxu1 }
 0x806   : > { %v2524_v22 = vpop.f32.mrf.mxu0 }
 0x809   : > { %v2464_v16 = vpop.f32.mrf.mxu2 }
 0x80a   : > { %v2465_v17 = vadd.f32 %v3258_v15, %v2464_v16 }
 0x80c   : > { %v2485_v19 = vadd.f32 %v2484_v18, %v2465_v17  ;;  %v2504_v20 = vpop.f32.mrf.mxu3 }
 0x80e   : > { %v2505_v21 = vadd.f32 %v2504_v20, %v2485_v19 }
 0x810   : > { %v2525_v24 = vadd.f32 %v2524_v22, %v2505_v21 }
 0x813   : > { %v2564_v26 = vpop.f32.mrf.mxu1 }
 0x816   : > { %v2604_v30 = vpop.f32.mrf.mxu0 }
 0x819   : > { %v2544_v23 = vpop.f32.mrf.mxu2 }
 0x81a   : > { %v2545_v25 = vadd.f32 %v2544_v23, %v2525_v24  ;;  %v2584_v28 = vpop.f32.mrf.mxu3 }
 0x81c   : > { %v2565_v27 = vadd.f32 %v2564_v26, %v2545_v25 }
 0x81e   : > { %v2585_v29 = vadd.f32 %v2584_v28, %v2565_v27 }
 0x820   : > { %v2605_v32 = vadd.f32 %v2604_v30, %v2585_v29 }
 0x835   : > { %v2644_v34 = vpop.f32.mrf.mxu1 }
 0x838   : > { %v2684_v38 = vpop.f32.mrf.mxu0 }
 0x841   : > { %v2624_v31 = vpop.f32.mrf.mxu2 }
 0x842   : > { %v2625_v33 = vadd.f32 %v2624_v31, %v2605_v32 }
 0x844   : > { %v2645_v35 = vadd.f32 %v2644_v34, %v2625_v33  ;;  %v2664_v36 = vpop.f32.mrf.mxu3 }
 0x846   : > { %v2665_v37 = vadd.f32 %v2664_v36, %v2645_v35 }
 0x848   : > { %v2685_v39 = vadd.f32 %v2684_v38, %v2665_v37 }
 0x875   : > { %v2724_v42 = vpop.f32.mrf.mxu1 }
 0x878   : > { %v2764_v45 = vpop.f32.mrf.mxu0 }
 0x881   : > { %v2704_v40 = vpop.f32.mrf.mxu2 }
 0x882   : > { %v2705_v41 = vadd.f32 %v2704_v40, %v2685_v39 }
 0x884   : > { %v2725_v12 = vadd.f32 %v2724_v42, %v2705_v41  ;;  %v2744_v43 = vpop.f32.mrf.mxu3 }
 0x886   : > { %v2745_v44 = vadd.f32 %v2744_v43, %v2725_v12 }
 0x888   : > { %v2765_v46 = vadd.f32 %v2764_v45, %v2745_v44 }
 0x88a   : > { %v2767_v47 = vadd.f32 %v2765_v46, %v4185_v2 }
 0x88c   : > { %v2770_v48 = vsel %vm453_vm0, %v2767_v47, 0.0 }
 0x88d   : > { %2771 = vadd.xlane.f32.xlu0 %v2770_v48 }
 0x900   : > { %v2772_v49 = vpop.xlane.xlu0 %2771 }
 0x901   : > { %v2773_v50 = vmul.f32 %v2772_v49, %v3750_v4 }
 0x903   : > { %v2774_v51 = vsub.f32 %v2767_v47, %v2773_v50 }
 0x905   : > { %v2775_v52 = vmul.f32 %v2774_v51, %v2774_v51 }
 0x907   : > { %v2776_v53 = vsel %vm453_vm0, %v2775_v52, 0.0 }
 0x908   : > { %2777 = vadd.xlane.f32.xlu1 %v2776_v53 }
 0x97b   : > { %v2778_v54 = vpop.xlane.xlu1 %2777 }
 0x97c   : > { %v2779_v55 = vmul.f32 %v2778_v54, %v3750_v4 }
 0x97e   : > { %v2780_v56 = vadd.f32 1e-05, %v2779_v55 }
 0x980   : > { %3281 = vrsqrt.f32 %v2780_v56  ;;  %vm2787_vm7 = vweird.f32 %v2780_v56 }
 0x986   : > { %v3282_v57 = vpop.eup %3281 }
 0x987   : > { %v2782_v2 = vmul.f32 %v3282_v57, %v2780_v56  ;;  %vm2788_vm6 = vweird.f32 %v3282_v57 }
 0x988   : > { %vm2789_vm8 = vmor %vm2787_vm7, %vm2788_vm6 }
 0x989   : > { %v2783_v58 = vmul.f32 %v3282_v57, %v2782_v2 }
 0x98b   : > { %v2784_v59 = vmul.f32 0.5, %v2783_v58 }
 0x98d   : > { %v2785_v60 = vsub.f32 1.5, %v2784_v59 }
 0x98f   : > { %v2786_v61 = vmul.f32 %v3282_v57, %v2785_v60 }
 0x991   : > { %v2790_v4 = vsel %vm2789_vm8, %v3282_v57, %v2786_v61 }
 0x992   : > { %v2791_v63 = vmul.f32 %v2790_v4, %v2774_v51 }
 0x994   : > { %v2795_v1 = vmul.f32 %v3259_v62, %v2791_v63 }
 0x996   : > { %v2799_v3 = vadd.f32 %v3260_v0, %v2795_v1 }
 0x998   : > { %2800 = vst.msk [vmem:[%s431_s16] sm:$0xff] %vm453_vm0, %v2799_v3 }
 0x999   : > { %3310 = shalt.err (!%p3307_p3)
}
 0x99a   : > { %3203 = dma.vmem_to_hbm [thread:$0]  (%p3467_p5), %s2815_s29, 128, %s2817_s22, %s2802_s14  }
 0x99b PF: > { %p3209_p4 = scmp.ge.s32.totalorder %s3345_s28, 2  ;;  %s2828_s27 = sand.u32 1, %s3333_s25  }
 0x99c   : > { %s2829_s23 = scalar_lea.sflag [#allocation3], %s2828_s27 }
 0x99d   : > { %p3206_p7 = pnand %p3209_p4, %p3471_p6 }
 0x99f   : > { %p3207_p8 = pneg %p3206_p7 }
 0x9a1   : > { %3328 = dma.done.wait (%p3207_p8), %s2829_s23, 128  }
 0x9a2   : > { %3330 = vsyncadd (%p3207_p8), %s2829_s23, 4294967168  ;;  %s5010_s28 = sld [smem:[#allocation6_spill]]  ;;  %s5013_s25 = smov %s3337_s26 }
 0x9a3   : > { %s5011_s16 = sld [smem:[#allocation5_spill]] }
 0x9a4   : > { %s5012_s27 = sld [smem:[#allocation7_spill]] }
 0x9a8   : > { %p23_p9 = scmp.ge.s32.totalorder %s5010_s28, 4  }
 0x9a9   : > { %s5014_s26 = smov %s5011_s16 }
 0x9aa   :  { %25 = sbr.rel (!%p23_p9) target bundleno = 5 (0x5), region = 107 }
 0x9af   :  { %2835 = vsyncpa [#allocation3], 1 }
 0x9b0   :  { %2837 = vsyncpa [#allocation3 + $0x1], 1 }

</bundles_post_ra>
